<compile_context>
chip_gen: v5e
topology: v5e:2x2
jax: 0.10.0
libtpu: 0.0.40
codegen_flags: <defaults>
</compile_context>

<pallas_src>
import functools
import math

import jax
import jax.numpy as jnp
from jax.experimental import pallas as pl
from jax.experimental.pallas import tpu as pltpu


def _round_up(x, m):
    return (x + m - 1) // m * m


def _pad2(x, rows, cols):
    pr, pc = rows - x.shape[0], cols - x.shape[1]
    if pr == 0 and pc == 0:
        return x
    return jnp.pad(x, ((0, pr), (0, pc)))


def _pad1(x, n):
    if x.shape[0] == n:
        return x
    return jnp.pad(x, (0, n - x.shape[0]))


# ----------------------------------------------------------------------------
# 1. Batched embedding gather + positional-encoding add
#    (scalar-prefetched ids in SMEM, manual row DMAs from an HBM table)
# ----------------------------------------------------------------------------
def _embed_pe_kernel(ids_ref, pe_ref, table_ref, o_ref, gbuf, sems, *, tok_tile):
    base = pl.program_id(0) * tok_tile
    # Issue all row gathers, then wait; DMAs overlap each other.
    for t in range(tok_tile):
        pltpu.make_async_copy(table_ref.at[ids_ref[base + t]],
                              gbuf.at[t], sems.at[t]).start()
    for t in range(tok_tile):
        pltpu.make_async_copy(table_ref.at[ids_ref[base + t]],
                              gbuf.at[t], sems.at[t]).wait()
    o_ref[...] = gbuf[...] + pe_ref[...]


def embed_positional(ids, table, pe):
    """ids: int32 [B, S] (S % 8 == 0); table: f32 [V, D]; pe: f32 [max_seq, D]
    -> f32 [B*S, D] = table[ids] + pe[:S]."""
    b, s = ids.shape
    v, d = table.shape
    assert s % 8 == 0, "sequence length padded to a multiple of 8 upstream"
    if pe.shape[0] < s:
        pe = jnp.pad(pe, ((0, s - pe.shape[0]), (0, 0)))

    # Largest multiple-of-8 divisor of S (capped so the DMA unroll stays small).
    tok_tile = 8
    for cand in range(8, min(s, 64) + 1, 8):
        if s % cand == 0:
            tok_tile = cand
    n = b * s
    blocks_per_seq = s // tok_tile
    ids_flat = ids.reshape(n).astype(jnp.int32)

    return pl.pallas_call(
        functools.partial(_embed_pe_kernel, tok_tile=tok_tile),
        out_shape=jax.ShapeDtypeStruct((n, d), jnp.float32),
        grid_spec=pltpu.PrefetchScalarGridSpec(
            num_scalar_prefetch=1,
            grid=(n // tok_tile,),
            in_specs=[
                # Positional-encoding rows for this token tile.
                pl.BlockSpec((tok_tile, d),
                             lambda i, ids_ref: (i % blocks_per_seq, 0)),
                # Embedding table stays in HBM; rows gathered manually.
                pl.BlockSpec(memory_space=pl.ANY),
            ],
            out_specs=pl.BlockSpec((tok_tile, d), lambda i, ids_ref: (i, 0)),
            scratch_shapes=[pltpu.VMEM((tok_tile, d), jnp.float32),
                            pltpu.SemaphoreType.DMA((tok_tile,))],
        ),
        compiler_params=pltpu.CompilerParams(dimension_semantics=("parallel",)),
        cost_estimate=pl.CostEstimate(
            flops=n * d, transcendentals=0,
            bytes_accessed=3 * n * d * 4 + n * 4),
    )(ids_flat, pe, table)


# ----------------------------------------------------------------------------
# 2. Fused [LayerNorm] -> matmul -> bias [-> ReLU] [-> residual]
#    (K taken whole per tile; fine for K = embedding_dim)
# ----------------------------------------------------------------------------
def _fused_linear_kernel(*refs, has_ln, has_residual, activation, eps):
    it = iter(refs)
    x_ref, w_ref, b_ref = next(it), next(it), next(it)
    g_ref = be_ref = r_ref = None
    if has_ln:
        g_ref, be_ref = next(it), next(it)
    if has_residual:
        r_ref = next(it)
    o_ref = next(it)

    x = x_ref[...].astype(jnp.float32)
    if has_ln:
        mu = jnp.mean(x, axis=-1, keepdims=True)
        xc = x - mu
        var = jnp.mean(xc * xc, axis=-1, keepdims=True)
        x = xc * jax.lax.rsqrt(var + eps) * g_ref[...] + be_ref[...]
    y = jnp.dot(x.astype(jnp.bfloat16), w_ref[...].astype(jnp.bfloat16),
                preferred_element_type=jnp.float32)
    y = y + b_ref[...]
    if activation == "relu":
        y = jnp.maximum(y, 0.0)
    if has_residual:
        y = y + r_ref[...]
    o_ref[...] = y.astype(o_ref.dtype)


def fused_linear(x, w, b, *, gamma=None, beta=None, residual=None,
                 activation=None, eps=1e-5, bm=256, bn=256):
    m, kdim = x.shape
    _, n = w.shape
    bm = min(bm, _round_up(m, 8))
    bn = min(bn, _round_up(n, 128))
    m_pad, n_pad = _round_up(m, bm), _round_up(n, bn)

    x_p = _pad2(x, m_pad, kdim)
    w_p = _pad2(w, kdim, n_pad)
    b_p = _pad1(b, n_pad).reshape(1, n_pad)
    inputs = [x_p, w_p, b_p]
    in_specs = [
        pl.BlockSpec((bm, kdim), lambda i, j: (i, 0)),
        pl.BlockSpec((kdim, bn), lambda i, j: (0, j)),
        pl.BlockSpec((1, bn), lambda i, j: (0, j)),
    ]
    if gamma is not None:
        inputs += [gamma.reshape(1, kdim), beta.reshape(1, kdim)]
        in_specs += [pl.BlockSpec((1, kdim), lambda i, j: (0, 0))] * 2
    if residual is not None:
        inputs.append(_pad2(residual, m_pad, n_pad))
        in_specs.append(pl.BlockSpec((bm, bn), lambda i, j: (i, j)))

    out = pl.pallas_call(
        functools.partial(_fused_linear_kernel, has_ln=gamma is not None,
                          has_residual=residual is not None,
                          activation=activation, eps=eps),
        out_shape=jax.ShapeDtypeStruct((m_pad, n_pad), jnp.float32),
        grid_spec=pltpu.PrefetchScalarGridSpec(
            num_scalar_prefetch=0,
            grid=(m_pad // bm, n_pad // bn),
            in_specs=in_specs,
            out_specs=pl.BlockSpec((bm, bn), lambda i, j: (i, j)),
        ),
        compiler_params=pltpu.CompilerParams(
            dimension_semantics=("parallel", "parallel")),
        cost_estimate=pl.CostEstimate(
            flops=2 * m_pad * n_pad * kdim, transcendentals=0,
            bytes_accessed=4 * (m_pad * kdim + kdim * n_pad + m_pad * n_pad)),
    )(*inputs)
    if m_pad != m or n_pad != n:
        out = out[:m, :n]
    return out


# ----------------------------------------------------------------------------
# 3. K-tiled linear: x @ w + b (+ optional ReLU / residual) for large K (FFN2)
# ----------------------------------------------------------------------------
def _linear_ktiled_kernel(*refs, activation, has_residual):
    if has_residual:
        x_ref, w_ref, b_ref, r_ref, o_ref, acc_ref = refs
    else:
        x_ref, w_ref, b_ref, o_ref, acc_ref = refs
        r_ref = None
    k = pl.program_id(2)

    @pl.when(k == 0)
    def _():
        acc_ref[...] = jnp.zeros_like(acc_ref)

    acc_ref[...] += jnp.dot(x_ref[...].astype(jnp.bfloat16),
                            w_ref[...].astype(jnp.bfloat16),
                            preferred_element_type=jnp.float32)

    @pl.when(k == pl.num_programs(2) - 1)
    def _():
        y = acc_ref[...] + b_ref[...]
        if activation == "relu":
            y = jnp.maximum(y, 0.0)
        if r_ref is not None:
            y = y + r_ref[...]
        o_ref[...] = y.astype(o_ref.dtype)


def linear_ktiled(x, w, b, *, residual=None, activation=None,
                  bm=256, bn=256, bk=512):
    m, kdim = x.shape
    _, n = w.shape
    bm = min(bm, _round_up(m, 8))
    bn = min(bn, _round_up(n, 128))
    bk = min(bk, _round_up(kdim, 128))
    m_pad, n_pad, k_pad = _round_up(m, bm), _round_up(n, bn), _round_up(kdim, bk)

    x_p = _pad2(x, m_pad, k_pad)
    w_p = _pad2(w, k_pad, n_pad)
    b_p = _pad1(b, n_pad).reshape(1, n_pad)
    inputs = [x_p, w_p, b_p]
    in_specs = [
        pl.BlockSpec((bm, bk), lambda i, j, kk: (i, kk)),
        # NOTE: on v5e (low HBM BW) pipeline_mode=pl.Buffered(3) on this spec,
        # and bn=bk=1024 on v6e, are worthwhile; portable defaults kept here.
        pl.BlockSpec((bk, bn), lambda i, j, kk: (kk, j)),
        pl.BlockSpec((1, bn), lambda i, j, kk: (0, j)),
    ]
    if residual is not None:
        inputs.append(_pad2(residual, m_pad, n_pad))
        in_specs.append(pl.BlockSpec((bm, bn), lambda i, j, kk: (i, j)))

    out = pl.pallas_call(
        functools.partial(_linear_ktiled_kernel, activation=activation,
                          has_residual=residual is not None),
        out_shape=jax.ShapeDtypeStruct((m_pad, n_pad), jnp.float32),
        grid_spec=pltpu.PrefetchScalarGridSpec(
            num_scalar_prefetch=0,
            grid=(m_pad // bm, n_pad // bn, k_pad // bk),
            in_specs=in_specs,
            out_specs=pl.BlockSpec((bm, bn), lambda i, j, kk: (i, j)),
            scratch_shapes=[pltpu.VMEM((bm, bn), jnp.float32)],
        ),
        compiler_params=pltpu.CompilerParams(
            dimension_semantics=("parallel", "parallel", "arbitrary")),
        cost_estimate=pl.CostEstimate(
            flops=2 * m_pad * n_pad * k_pad, transcendentals=0,
            bytes_accessed=4 * (m_pad * k_pad + k_pad * n_pad + m_pad * n_pad)),
    )(*inputs)
    if m_pad != m or n_pad != n:
        out = out[:m, :n]
    return out


# ----------------------------------------------------------------------------
# 4. Multi-head attention: one batch row per grid step, all heads in-kernel,
#    (S, 3D) qkv input block, (S, D) lane-dense output block (no transposes).
# ----------------------------------------------------------------------------
def _attention_kernel(qkv_ref, mask_ref, o_ref, *, num_heads, scale):
    qkv = qkv_ref[...]                               # (S, 3D)
    s_len = qkv.shape[0]
    d = qkv.shape[1] // 3
    dh = d // num_heads
    mask = mask_ref[...].reshape(1, s_len)           # key mask, broadcast over queries
    ctx = []
    for h in range(num_heads):                       # static unroll over heads
        q = qkv[:, h * dh:(h + 1) * dh] * scale
        k = qkv[:, d + h * dh:d + (h + 1) * dh]
        v = qkv[:, 2 * d + h * dh:2 * d + (h + 1) * dh]
        s = jax.lax.dot_general(q.astype(jnp.bfloat16), k.astype(jnp.bfloat16),
                                (((1,), (1,)), ((), ())),
                                preferred_element_type=jnp.float32)   # (S, S)
        s = jnp.where(mask == 0, -1e9, s)
        s = s - jnp.max(s, axis=-1, keepdims=True)
        p = jnp.exp(s)
        p = p * pl.reciprocal(jnp.sum(p, axis=-1, keepdims=True), approx=True)
        ctx.append(jnp.dot(p.astype(jnp.bfloat16), v.astype(jnp.bfloat16),
                           preferred_element_type=jnp.float32))       # (S, dh)
    o_ref[...] = jnp.concatenate(ctx, axis=-1).astype(o_ref.dtype)    # (S, D)


def attention(qkv, mask, *, num_heads, batch, seq):
    """qkv: f32 [B*S, 3D]; mask: int32 [B, 1, S] -> context f32 [B*S, D]."""
    # TODO(synk): for long sequences (S >~ 1K, esp. v7x 64 MiB VMEM) switch to
    # a KV-tiled online-softmax (flash) variant so VMEM stays O(tile), not O(S^2).
    n, three_d = qkv.shape
    d = three_d // 3
    scale = 1.0 / math.sqrt(d // num_heads)
    return pl.pallas_call(
        functools.partial(_attention_kernel, num_heads=num_heads, scale=scale),
        out_shape=jax.ShapeDtypeStruct((n, d), jnp.float32),
        grid_spec=pltpu.PrefetchScalarGridSpec(
            num_scalar_prefetch=0,
            grid=(batch,),
            in_specs=[
                pl.BlockSpec((seq, three_d), lambda bi: (bi, 0)),
                pl.BlockSpec((1, 1, seq), lambda bi: (bi, 0, 0)),
            ],
            out_specs=pl.BlockSpec((seq, d), lambda bi: (bi, 0)),
        ),
        compiler_params=pltpu.CompilerParams(dimension_semantics=("parallel",)),
    )(qkv, mask)


# ----------------------------------------------------------------------------
# 5. Standalone LayerNorm (only used for the final norm)
# ----------------------------------------------------------------------------
def _layernorm_kernel(x_ref, g_ref, b_ref, o_ref, *, eps):
    x = x_ref[...].astype(jnp.float32)
    mu = jnp.mean(x, axis=-1, keepdims=True)
    xc = x - mu
    var = jnp.mean(xc * xc, axis=-1, keepdims=True)
    o_ref[...] = (xc * jax.lax.rsqrt(var + eps) * g_ref[...]
                  + b_ref[...]).astype(o_ref.dtype)


def layer_norm(x, gamma, beta, *, eps=1e-5, bm=256):
    m, d = x.shape
    bm = min(bm, _round_up(m, 8))
    m_pad = _round_up(m, bm)
    x_p = _pad2(x, m_pad, d)
    out = pl.pallas_call(
        functools.partial(_layernorm_kernel, eps=eps),
        out_shape=jax.ShapeDtypeStruct((m_pad, d), jnp.float32),
        grid_spec=pltpu.PrefetchScalarGridSpec(
            num_scalar_prefetch=0,
            grid=(m_pad // bm,),
            in_specs=[pl.BlockSpec((bm, d), lambda i: (i, 0)),
                      pl.BlockSpec((1, d), lambda i: (0, 0)),
                      pl.BlockSpec((1, d), lambda i: (0, 0))],
            out_specs=pl.BlockSpec((bm, d), lambda i: (i, 0)),
        ),
        compiler_params=pltpu.CompilerParams(dimension_semantics=("parallel",)),
    )(x_p, gamma.reshape(1, d), beta.reshape(1, d))
    return out[:m] if m_pad != m else out


# ----------------------------------------------------------------------------
# Full Encoder forward
# ----------------------------------------------------------------------------
@functools.partial(jax.jit, static_argnames=("num_heads",))
def encoder_forward(params, source, source_mask, *, num_heads):
    b, s = source.shape
    d = params["embed"].shape[1]

    # Pad the sequence to a sublane multiple; padded key positions get mask=0.
    s_pad = _round_up(s, 8)
    if s_pad != s:
        source = jnp.pad(source, ((0, 0), (0, s_pad - s)))
        source_mask = jnp.pad(source_mask, ((0, 0), (0, 0), (0, s_pad - s)))

    x = embed_positional(source, params["embed"], params["pe"])      # (B*S, D)
    # TODO(synk): dropout layers are identity here (eval-mode forward, no RNG).
    for layer in params["layers"]:
        # norm1 fused into a single QKV projection (D -> 3D).
        qkv = fused_linear(x, layer["wqkv"], layer["bqkv"],
                           gamma=layer["ln1_g"], beta=layer["ln1_b"], bn=128)
        ctx = attention(qkv, source_mask, num_heads=num_heads,
                        batch=b, seq=s_pad)                          # (B*S, D)
        x = fused_linear(ctx, layer["wo"], layer["bo"], residual=x, bn=128)
        # norm2 + first FFN matmul + ReLU fused.
        hid = fused_linear(x, layer["w1"], layer["b1"],
                           gamma=layer["ln2_g"], beta=layer["ln2_b"],
                           activation="relu", bn=512)
        x = linear_ktiled(hid, layer["w2"], layer["b2"], residual=x,
                          bn=128, bk=512)
    x = layer_norm(x, params["lnf_g"], params["lnf_b"])
    x = x.reshape(b, s_pad, d)
    return x[:, :s, :] if s_pad != s else x


# ----------------------------------------------------------------------------
# Parameters, pure-JAX reference, and test harness
# ----------------------------------------------------------------------------
def make_positional_encoding(max_seq_len, d_model):
    pos = jnp.arange(max_seq_len, dtype=jnp.float32)[:, None]
    div = jnp.exp(jnp.arange(0, d_model, 2, dtype=jnp.float32)
                  * (-math.log(10000.0) / d_model))
    ang = pos * div
    return jnp.stack([jnp.sin(ang), jnp.cos(ang)], axis=-1).reshape(
        max_seq_len, d_model)


def init_params(key, vocab_size, d, max_seq_len, num_layers, ff_dim):
    def dense(k, fan_in, fan_out):
        kw, kb = jax.random.split(k)
        w = jax.random.normal(kw, (fan_in, fan_out), jnp.float32) / math.sqrt(fan_in)
        bias = 0.01 * jax.random.normal(kb, (fan_out,), jnp.float32)
        return w, bias

    keys = jax.random.split(key, num_layers + 1)
    params = {
        "embed": jax.random.normal(keys[0], (vocab_size, d), jnp.float32),
        "pe": make_positional_encoding(max_seq_len, d),
        "lnf_g": jnp.ones((d,), jnp.float32),
        "lnf_b": jnp.zeros((d,), jnp.float32),
        "layers": [],
    }
    for li in range(num_layers):
        lk = jax.random.split(keys[li + 1], 6)
        wq, bq = dense(lk[0], d, d)
        wk, bk = dense(lk[1], d, d)
        wv, bv = dense(lk[2], d, d)
        wo, bo = dense(lk[3], d, d)
        w1, b1 = dense(lk[4], d, ff_dim)
        w2, b2 = dense(lk[5], ff_dim, d)
        params["layers"].append({
            # Q/K/V weights pre-concatenated along N for the fused projection.
            "wqkv": jnp.concatenate([wq, wk, wv], axis=1),
            "bqkv": jnp.concatenate([bq, bk, bv]),
            "wo": wo, "bo": bo, "w1": w1, "b1": b1, "w2": w2, "b2": b2,
            "ln1_g": jnp.ones((d,), jnp.float32),
            "ln1_b": jnp.zeros((d,), jnp.float32),
            "ln2_g": jnp.ones((d,), jnp.float32),
            "ln2_b": jnp.zeros((d,), jnp.float32),
        })
    return params


def _layer_norm_ref(x, g, bta, eps=1e-5):
    mu = jnp.mean(x, axis=-1, keepdims=True)
    var = jnp.mean((x - mu) ** 2, axis=-1, keepdims=True)
    return (x - mu) * jax.lax.rsqrt(var + eps) * g + bta


def encoder_reference(params, source, source_mask, num_heads):
    hp = jax.lax.Precision.HIGHEST
    b, s = source.shape
    d = params["embed"].shape[1]
    h = num_heads
    dh = d // h

    def lin(z, w, bias):
        return jnp.dot(z, w, precision=hp) + bias

    x = params["embed"][source] + params["pe"][:s][None, :, :]
    for layer in params["layers"]:
        wq, wk, wv = (layer["wqkv"][:, :d], layer["wqkv"][:, d:2 * d],
                      layer["wqkv"][:, 2 * d:])
        bq, bk, bv = layer["bqkv"][:d], layer["bqkv"][d:2 * d], layer["bqkv"][2 * d:]
        x2 = _layer_norm_ref(x, layer["ln1_g"], layer["ln1_b"])
        q = lin(x2, wq, bq).reshape(b, s, h, dh).transpose(0, 2, 1, 3)
        k = lin(x2, wk, bk).reshape(b, s, h, dh).transpose(0, 2, 1, 3)
        v = lin(x2, wv, bv).reshape(b, s, h, dh).transpose(0, 2, 1, 3)
        scores = jnp.einsum("bhqe,bhke->bhqk", q / math.sqrt(dh), k, precision=hp)
        mask = source_mask[:, None, :, :]
        scores = jnp.where(mask == 0, -1e9, scores)
        attn = jax.nn.softmax(scores, axis=-1)
        ctx = jnp.einsum("bhqk,bhke->bhqe", attn, v, precision=hp)
        ctx = ctx.transpose(0, 2, 1, 3).reshape(b, s, d)
        x = x + lin(ctx, layer["wo"], layer["bo"])
        x2 = _layer_norm_ref(x, layer["ln2_g"], layer["ln2_b"])
        hid = jnp.maximum(lin(x2, layer["w1"], layer["b1"]), 0.0)
        x = x + lin(hid, layer["w2"], layer["b2"])
    return _layer_norm_ref(x, params["lnf_g"], params["lnf_b"])


if __name__ == "__main__":
    vocab_size = 64
    embedding_dim = 128
    max_seq_len = 32
    num_heads = 4
    num_layers = 2
    ff_dim = 2048          # matches the hard-coded ff_dim in EncoderLayer
    batch, seq = 2, 8

    root = jax.random.PRNGKey(0)
    k_param, k_src = jax.random.split(root)
    params = init_params(k_param, vocab_size, embedding_dim, max_seq_len,
                         num_layers, ff_dim)
    source = jax.random.randint(k_src, (batch, seq), 0, vocab_size, dtype=jnp.int32)
    # Padding mask [B, 1, S]: mask out the last two key positions of batch 1.
    source_mask = jnp.ones((batch, 1, seq), dtype=jnp.int32)
    source_mask = source_mask.at[1, 0, seq - 2:].set(0)

    out = encoder_forward(params, source, source_mask, num_heads=num_heads)
    out = jax.block_until_ready(out)

    ref = encoder_reference(params, source, source_mask, num_heads)
    assert out.shape == (batch, seq, embedding_dim), out.shape
    max_err = float(jnp.max(jnp.abs(out - ref)))
    # bf16 MXU operands (f32 accumulation) -> compare at a bf16-level tolerance.
    assert jnp.allclose(out, ref, atol=3e-2, rtol=3e-2), f"max abs err {max_err}"

    print("KERNEL_OK")
</pallas_src>

<mosaic_0001>
module attributes {stable_mosaic.version = 11 : i64} {
  func.func @_embed_pe_kernel(%arg0: i32, %arg1: memref<16xi32, #tpu.memory_space<smem>>, %arg2: memref<8x128xf32, #tpu.memory_space<vmem>>, %arg3: memref<64x128xf32, #tpu.memory_space<any>>, %arg4: memref<8x128xf32, #tpu.memory_space<vmem>>, %arg5: memref<8x128xf32, #tpu.memory_space<vmem>>, %arg6: memref<8x!tpu.dma_semaphore, #tpu.memory_space<semaphore_mem>>) attributes {dimension_semantics = [#tpu.dimension_semantics<parallel>], iteration_bounds = array<i64: 2>, scalar_prefetch = 1 : i64, scratch_operands = 2 : i64, tpu.core_type = #tpu.core_type<tc>, window_params = [{transform_indices = @transform_0, window_bounds = array<i64: 8, 128>}, {}, {transform_indices = @transform_2, window_bounds = array<i64: 8, 128>}]} {
    %c8_i32 = arith.constant 8 : i32
    %0 = arith.muli %arg0, %c8_i32 : i32
    %c0_i32 = arith.constant 0 : i32
    %1 = arith.addi %0, %c0_i32 : i32
    %2 = arith.index_cast %1 : i32 to index
    %3 = memref.load %arg1[%2] : memref<16xi32, #tpu.memory_space<smem>>
    %c0_i32_0 = arith.constant 0 : i32
    %c0_i32_1 = arith.constant 0 : i32
    %c0_i32_2 = arith.constant 0 : i32
    %4 = tpu.memref_slice %arg3[%3, %c0_i32_2] : memref<64x128xf32, #tpu.memory_space<any>> -> memref<1x128xf32, #tpu.memory_space<any>>
    %5 = tpu.memref_squeeze %4 : memref<1x128xf32, #tpu.memory_space<any>> -> memref<128xf32, #tpu.memory_space<any>>
    %c0_i32_3 = arith.constant 0 : i32
    %6 = tpu.memref_slice %arg5[%c0_i32_0, %c0_i32_3] : memref<8x128xf32, #tpu.memory_space<vmem>> -> memref<1x128xf32, #tpu.memory_space<vmem>>
    %7 = tpu.memref_squeeze %6 : memref<1x128xf32, #tpu.memory_space<vmem>> -> memref<128xf32, #tpu.memory_space<vmem>>
    %8 = tpu.memref_slice %arg6[%c0_i32_1] : memref<8x!tpu.dma_semaphore, #tpu.memory_space<semaphore_mem>> -> memref<1x!tpu.dma_semaphore, #tpu.memory_space<semaphore_mem>>
    %9 = tpu.memref_squeeze %8 : memref<1x!tpu.dma_semaphore, #tpu.memory_space<semaphore_mem>> -> memref<!tpu.dma_semaphore, #tpu.memory_space<semaphore_mem>>
    tpu.enqueue_dma source(%5 : memref<128xf32, #tpu.memory_space<any>>) target(%7 : memref<128xf32, #tpu.memory_space<vmem>>) target_semaphore(%9 : memref<!tpu.dma_semaphore, #tpu.memory_space<semaphore_mem>>)
    %c1_i32 = arith.constant 1 : i32
    %10 = arith.addi %0, %c1_i32 : i32
    %11 = arith.index_cast %10 : i32 to index
    %12 = memref.load %arg1[%11] : memref<16xi32, #tpu.memory_space<smem>>
    %c1_i32_4 = arith.constant 1 : i32
    %c1_i32_5 = arith.constant 1 : i32
    %c0_i32_6 = arith.constant 0 : i32
    %13 = tpu.memref_slice %arg3[%12, %c0_i32_6] : memref<64x128xf32, #tpu.memory_space<any>> -> memref<1x128xf32, #tpu.memory_space<any>>
    %14 = tpu.memref_squeeze %13 : memref<1x128xf32, #tpu.memory_space<any>> -> memref<128xf32, #tpu.memory_space<any>>
    %c0_i32_7 = arith.constant 0 : i32
    %15 = tpu.memref_slice %arg5[%c1_i32_4, %c0_i32_7] : memref<8x128xf32, #tpu.memory_space<vmem>> -> memref<1x128xf32, #tpu.memory_space<vmem>>
    %16 = tpu.memref_squeeze %15 : memref<1x128xf32, #tpu.memory_space<vmem>> -> memref<128xf32, #tpu.memory_space<vmem>>
    %17 = tpu.memref_slice %arg6[%c1_i32_5] : memref<8x!tpu.dma_semaphore, #tpu.memory_space<semaphore_mem>> -> memref<1x!tpu.dma_semaphore, #tpu.memory_space<semaphore_mem>>
    %18 = tpu.memref_squeeze %17 : memref<1x!tpu.dma_semaphore, #tpu.memory_space<semaphore_mem>> -> memref<!tpu.dma_semaphore, #tpu.memory_space<semaphore_mem>>
    tpu.enqueue_dma source(%14 : memref<128xf32, #tpu.memory_space<any>>) target(%16 : memref<128xf32, #tpu.memory_space<vmem>>) target_semaphore(%18 : memref<!tpu.dma_semaphore, #tpu.memory_space<semaphore_mem>>)
    %c2_i32 = arith.constant 2 : i32
    %19 = arith.addi %0, %c2_i32 : i32
    %20 = arith.index_cast %19 : i32 to index
    %21 = memref.load %arg1[%20] : memref<16xi32, #tpu.memory_space<smem>>
    %c2_i32_8 = arith.constant 2 : i32
    %c2_i32_9 = arith.constant 2 : i32
    %c0_i32_10 = arith.constant 0 : i32
    %22 = tpu.memref_slice %arg3[%21, %c0_i32_10] : memref<64x128xf32, #tpu.memory_space<any>> -> memref<1x128xf32, #tpu.memory_space<any>>
    %23 = tpu.memref_squeeze %22 : memref<1x128xf32, #tpu.memory_space<any>> -> memref<128xf32, #tpu.memory_space<any>>
    %c0_i32_11 = arith.constant 0 : i32
    %24 = tpu.memref_slice %arg5[%c2_i32_8, %c0_i32_11] : memref<8x128xf32, #tpu.memory_space<vmem>> -> memref<1x128xf32, #tpu.memory_space<vmem>>
    %25 = tpu.memref_squeeze %24 : memref<1x128xf32, #tpu.memory_space<vmem>> -> memref<128xf32, #tpu.memory_space<vmem>>
    %26 = tpu.memref_slice %arg6[%c2_i32_9] : memref<8x!tpu.dma_semaphore, #tpu.memory_space<semaphore_mem>> -> memref<1x!tpu.dma_semaphore, #tpu.memory_space<semaphore_mem>>
    %27 = tpu.memref_squeeze %26 : memref<1x!tpu.dma_semaphore, #tpu.memory_space<semaphore_mem>> -> memref<!tpu.dma_semaphore, #tpu.memory_space<semaphore_mem>>
    tpu.enqueue_dma source(%23 : memref<128xf32, #tpu.memory_space<any>>) target(%25 : memref<128xf32, #tpu.memory_space<vmem>>) target_semaphore(%27 : memref<!tpu.dma_semaphore, #tpu.memory_space<semaphore_mem>>)
    %c3_i32 = arith.constant 3 : i32
    %28 = arith.addi %0, %c3_i32 : i32
    %29 = arith.index_cast %28 : i32 to index
    %30 = memref.load %arg1[%29] : memref<16xi32, #tpu.memory_space<smem>>
    %c3_i32_12 = arith.constant 3 : i32
    %c3_i32_13 = arith.constant 3 : i32
    %c0_i32_14 = arith.constant 0 : i32
    %31 = tpu.memref_slice %arg3[%30, %c0_i32_14] : memref<64x128xf32, #tpu.memory_space<any>> -> memref<1x128xf32, #tpu.memory_space<any>>
    %32 = tpu.memref_squeeze %31 : memref<1x128xf32, #tpu.memory_space<any>> -> memref<128xf32, #tpu.memory_space<any>>
    %c0_i32_15 = arith.constant 0 : i32
    %33 = tpu.memref_slice %arg5[%c3_i32_12, %c0_i32_15] : memref<8x128xf32, #tpu.memory_space<vmem>> -> memref<1x128xf32, #tpu.memory_space<vmem>>
    %34 = tpu.memref_squeeze %33 : memref<1x128xf32, #tpu.memory_space<vmem>> -> memref<128xf32, #tpu.memory_space<vmem>>
    %35 = tpu.memref_slice %arg6[%c3_i32_13] : memref<8x!tpu.dma_semaphore, #tpu.memory_space<semaphore_mem>> -> memref<1x!tpu.dma_semaphore, #tpu.memory_space<semaphore_mem>>
    %36 = tpu.memref_squeeze %35 : memref<1x!tpu.dma_semaphore, #tpu.memory_space<semaphore_mem>> -> memref<!tpu.dma_semaphore, #tpu.memory_space<semaphore_mem>>
    tpu.enqueue_dma source(%32 : memref<128xf32, #tpu.memory_space<any>>) target(%34 : memref<128xf32, #tpu.memory_space<vmem>>) target_semaphore(%36 : memref<!tpu.dma_semaphore, #tpu.memory_space<semaphore_mem>>)
    %c4_i32 = arith.constant 4 : i32
    %37 = arith.addi %0, %c4_i32 : i32
    %38 = arith.index_cast %37 : i32 to index
    %39 = memref.load %arg1[%38] : memref<16xi32, #tpu.memory_space<smem>>
    %c4_i32_16 = arith.constant 4 : i32
    %c4_i32_17 = arith.constant 4 : i32
    %c0_i32_18 = arith.constant 0 : i32
    %40 = tpu.memref_slice %arg3[%39, %c0_i32_18] : memref<64x128xf32, #tpu.memory_space<any>> -> memref<1x128xf32, #tpu.memory_space<any>>
    %41 = tpu.memref_squeeze %40 : memref<1x128xf32, #tpu.memory_space<any>> -> memref<128xf32, #tpu.memory_space<any>>
    %c0_i32_19 = arith.constant 0 : i32
    %42 = tpu.memref_slice %arg5[%c4_i32_16, %c0_i32_19] : memref<8x128xf32, #tpu.memory_space<vmem>> -> memref<1x128xf32, #tpu.memory_space<vmem>>
    %43 = tpu.memref_squeeze %42 : memref<1x128xf32, #tpu.memory_space<vmem>> -> memref<128xf32, #tpu.memory_space<vmem>>
    %44 = tpu.memref_slice %arg6[%c4_i32_17] : memref<8x!tpu.dma_semaphore, #tpu.memory_space<semaphore_mem>> -> memref<1x!tpu.dma_semaphore, #tpu.memory_space<semaphore_mem>>
    %45 = tpu.memref_squeeze %44 : memref<1x!tpu.dma_semaphore, #tpu.memory_space<semaphore_mem>> -> memref<!tpu.dma_semaphore, #tpu.memory_space<semaphore_mem>>
    tpu.enqueue_dma source(%41 : memref<128xf32, #tpu.memory_space<any>>) target(%43 : memref<128xf32, #tpu.memory_space<vmem>>) target_semaphore(%45 : memref<!tpu.dma_semaphore, #tpu.memory_space<semaphore_mem>>)
    %c5_i32 = arith.constant 5 : i32
    %46 = arith.addi %0, %c5_i32 : i32
    %47 = arith.index_cast %46 : i32 to index
    %48 = memref.load %arg1[%47] : memref<16xi32, #tpu.memory_space<smem>>
    %c5_i32_20 = arith.constant 5 : i32
    %c5_i32_21 = arith.constant 5 : i32
    %c0_i32_22 = arith.constant 0 : i32
    %49 = tpu.memref_slice %arg3[%48, %c0_i32_22] : memref<64x128xf32, #tpu.memory_space<any>> -> memref<1x128xf32, #tpu.memory_space<any>>
    %50 = tpu.memref_squeeze %49 : memref<1x128xf32, #tpu.memory_space<any>> -> memref<128xf32, #tpu.memory_space<any>>
    %c0_i32_23 = arith.constant 0 : i32
    %51 = tpu.memref_slice %arg5[%c5_i32_20, %c0_i32_23] : memref<8x128xf32, #tpu.memory_space<vmem>> -> memref<1x128xf32, #tpu.memory_space<vmem>>
    %52 = tpu.memref_squeeze %51 : memref<1x128xf32, #tpu.memory_space<vmem>> -> memref<128xf32, #tpu.memory_space<vmem>>
    %53 = tpu.memref_slice %arg6[%c5_i32_21] : memref<8x!tpu.dma_semaphore, #tpu.memory_space<semaphore_mem>> -> memref<1x!tpu.dma_semaphore, #tpu.memory_space<semaphore_mem>>
    %54 = tpu.memref_squeeze %53 : memref<1x!tpu.dma_semaphore, #tpu.memory_space<semaphore_mem>> -> memref<!tpu.dma_semaphore, #tpu.memory_space<semaphore_mem>>
    tpu.enqueue_dma source(%50 : memref<128xf32, #tpu.memory_space<any>>) target(%52 : memref<128xf32, #tpu.memory_space<vmem>>) target_semaphore(%54 : memref<!tpu.dma_semaphore, #tpu.memory_space<semaphore_mem>>)
    %c6_i32 = arith.constant 6 : i32
    %55 = arith.addi %0, %c6_i32 : i32
    %56 = arith.index_cast %55 : i32 to index
    %57 = memref.load %arg1[%56] : memref<16xi32, #tpu.memory_space<smem>>
    %c6_i32_24 = arith.constant 6 : i32
    %c6_i32_25 = arith.constant 6 : i32
    %c0_i32_26 = arith.constant 0 : i32
    %58 = tpu.memref_slice %arg3[%57, %c0_i32_26] : memref<64x128xf32, #tpu.memory_space<any>> -> memref<1x128xf32, #tpu.memory_space<any>>
    %59 = tpu.memref_squeeze %58 : memref<1x128xf32, #tpu.memory_space<any>> -> memref<128xf32, #tpu.memory_space<any>>
    %c0_i32_27 = arith.constant 0 : i32
    %60 = tpu.memref_slice %arg5[%c6_i32_24, %c0_i32_27] : memref<8x128xf32, #tpu.memory_space<vmem>> -> memref<1x128xf32, #tpu.memory_space<vmem>>
    %61 = tpu.memref_squeeze %60 : memref<1x128xf32, #tpu.memory_space<vmem>> -> memref<128xf32, #tpu.memory_space<vmem>>
    %62 = tpu.memref_slice %arg6[%c6_i32_25] : memref<8x!tpu.dma_semaphore, #tpu.memory_space<semaphore_mem>> -> memref<1x!tpu.dma_semaphore, #tpu.memory_space<semaphore_mem>>
    %63 = tpu.memref_squeeze %62 : memref<1x!tpu.dma_semaphore, #tpu.memory_space<semaphore_mem>> -> memref<!tpu.dma_semaphore, #tpu.memory_space<semaphore_mem>>
    tpu.enqueue_dma source(%59 : memref<128xf32, #tpu.memory_space<any>>) target(%61 : memref<128xf32, #tpu.memory_space<vmem>>) target_semaphore(%63 : memref<!tpu.dma_semaphore, #tpu.memory_space<semaphore_mem>>)
    %c7_i32 = arith.constant 7 : i32
    %64 = arith.addi %0, %c7_i32 : i32
    %65 = arith.index_cast %64 : i32 to index
    %66 = memref.load %arg1[%65] : memref<16xi32, #tpu.memory_space<smem>>
    %c7_i32_28 = arith.constant 7 : i32
    %c7_i32_29 = arith.constant 7 : i32
    %c0_i32_30 = arith.constant 0 : i32
    %67 = tpu.memref_slice %arg3[%66, %c0_i32_30] : memref<64x128xf32, #tpu.memory_space<any>> -> memref<1x128xf32, #tpu.memory_space<any>>
    %68 = tpu.memref_squeeze %67 : memref<1x128xf32, #tpu.memory_space<any>> -> memref<128xf32, #tpu.memory_space<any>>
    %c0_i32_31 = arith.constant 0 : i32
    %69 = tpu.memref_slice %arg5[%c7_i32_28, %c0_i32_31] : memref<8x128xf32, #tpu.memory_space<vmem>> -> memref<1x128xf32, #tpu.memory_space<vmem>>
    %70 = tpu.memref_squeeze %69 : memref<1x128xf32, #tpu.memory_space<vmem>> -> memref<128xf32, #tpu.memory_space<vmem>>
    %71 = tpu.memref_slice %arg6[%c7_i32_29] : memref<8x!tpu.dma_semaphore, #tpu.memory_space<semaphore_mem>> -> memref<1x!tpu.dma_semaphore, #tpu.memory_space<semaphore_mem>>
    %72 = tpu.memref_squeeze %71 : memref<1x!tpu.dma_semaphore, #tpu.memory_space<semaphore_mem>> -> memref<!tpu.dma_semaphore, #tpu.memory_space<semaphore_mem>>
    tpu.enqueue_dma source(%68 : memref<128xf32, #tpu.memory_space<any>>) target(%70 : memref<128xf32, #tpu.memory_space<vmem>>) target_semaphore(%72 : memref<!tpu.dma_semaphore, #tpu.memory_space<semaphore_mem>>)
    %c0_i32_32 = arith.constant 0 : i32
    %73 = arith.addi %0, %c0_i32_32 : i32
    %74 = arith.index_cast %73 : i32 to index
    %75 = memref.load %arg1[%74] : memref<16xi32, #tpu.memory_space<smem>>
    %c0_i32_33 = arith.constant 0 : i32
    %c0_i32_34 = arith.constant 0 : i32
    %c0_i32_35 = arith.constant 0 : i32
    %76 = tpu.memref_slice %arg3[%75, %c0_i32_35] : memref<64x128xf32, #tpu.memory_space<any>> -> memref<1x128xf32, #tpu.memory_space<any>>
    %77 = tpu.memref_squeeze %76 : memref<1x128xf32, #tpu.memory_space<any>> -> memref<128xf32, #tpu.memory_space<any>>
    %c0_i32_36 = arith.constant 0 : i32
    %78 = tpu.memref_slice %arg5[%c0_i32_33, %c0_i32_36] : memref<8x128xf32, #tpu.memory_space<vmem>> -> memref<1x128xf32, #tpu.memory_space<vmem>>
    %79 = tpu.memref_squeeze %78 : memref<1x128xf32, #tpu.memory_space<vmem>> -> memref<128xf32, #tpu.memory_space<vmem>>
    %80 = tpu.memref_slice %arg6[%c0_i32_34] : memref<8x!tpu.dma_semaphore, #tpu.memory_space<semaphore_mem>> -> memref<1x!tpu.dma_semaphore, #tpu.memory_space<semaphore_mem>>
    %81 = tpu.memref_squeeze %80 : memref<1x!tpu.dma_semaphore, #tpu.memory_space<semaphore_mem>> -> memref<!tpu.dma_semaphore, #tpu.memory_space<semaphore_mem>>
    tpu.wait_dma2 semaphore(%81 : memref<!tpu.dma_semaphore, #tpu.memory_space<semaphore_mem>>) src(%77 : memref<128xf32, #tpu.memory_space<any>>) dst(%79 : memref<128xf32, #tpu.memory_space<vmem>>)
    %c1_i32_37 = arith.constant 1 : i32
    %82 = arith.addi %0, %c1_i32_37 : i32
    %83 = arith.index_cast %82 : i32 to index
    %84 = memref.load %arg1[%83] : memref<16xi32, #tpu.memory_space<smem>>
    %c1_i32_38 = arith.constant 1 : i32
    %c1_i32_39 = arith.constant 1 : i32
    %c0_i32_40 = arith.constant 0 : i32
    %85 = tpu.memref_slice %arg3[%84, %c0_i32_40] : memref<64x128xf32, #tpu.memory_space<any>> -> memref<1x128xf32, #tpu.memory_space<any>>
    %86 = tpu.memref_squeeze %85 : memref<1x128xf32, #tpu.memory_space<any>> -> memref<128xf32, #tpu.memory_space<any>>
    %c0_i32_41 = arith.constant 0 : i32
    %87 = tpu.memref_slice %arg5[%c1_i32_38, %c0_i32_41] : memref<8x128xf32, #tpu.memory_space<vmem>> -> memref<1x128xf32, #tpu.memory_space<vmem>>
    %88 = tpu.memref_squeeze %87 : memref<1x128xf32, #tpu.memory_space<vmem>> -> memref<128xf32, #tpu.memory_space<vmem>>
    %89 = tpu.memref_slice %arg6[%c1_i32_39] : memref<8x!tpu.dma_semaphore, #tpu.memory_space<semaphore_mem>> -> memref<1x!tpu.dma_semaphore, #tpu.memory_space<semaphore_mem>>
    %90 = tpu.memref_squeeze %89 : memref<1x!tpu.dma_semaphore, #tpu.memory_space<semaphore_mem>> -> memref<!tpu.dma_semaphore, #tpu.memory_space<semaphore_mem>>
    tpu.wait_dma2 semaphore(%90 : memref<!tpu.dma_semaphore, #tpu.memory_space<semaphore_mem>>) src(%86 : memref<128xf32, #tpu.memory_space<any>>) dst(%88 : memref<128xf32, #tpu.memory_space<vmem>>)
    %c2_i32_42 = arith.constant 2 : i32
    %91 = arith.addi %0, %c2_i32_42 : i32
    %92 = arith.index_cast %91 : i32 to index
    %93 = memref.load %arg1[%92] : memref<16xi32, #tpu.memory_space<smem>>
    %c2_i32_43 = arith.constant 2 : i32
    %c2_i32_44 = arith.constant 2 : i32
    %c0_i32_45 = arith.constant 0 : i32
    %94 = tpu.memref_slice %arg3[%93, %c0_i32_45] : memref<64x128xf32, #tpu.memory_space<any>> -> memref<1x128xf32, #tpu.memory_space<any>>
    %95 = tpu.memref_squeeze %94 : memref<1x128xf32, #tpu.memory_space<any>> -> memref<128xf32, #tpu.memory_space<any>>
    %c0_i32_46 = arith.constant 0 : i32
    %96 = tpu.memref_slice %arg5[%c2_i32_43, %c0_i32_46] : memref<8x128xf32, #tpu.memory_space<vmem>> -> memref<1x128xf32, #tpu.memory_space<vmem>>
    %97 = tpu.memref_squeeze %96 : memref<1x128xf32, #tpu.memory_space<vmem>> -> memref<128xf32, #tpu.memory_space<vmem>>
    %98 = tpu.memref_slice %arg6[%c2_i32_44] : memref<8x!tpu.dma_semaphore, #tpu.memory_space<semaphore_mem>> -> memref<1x!tpu.dma_semaphore, #tpu.memory_space<semaphore_mem>>
    %99 = tpu.memref_squeeze %98 : memref<1x!tpu.dma_semaphore, #tpu.memory_space<semaphore_mem>> -> memref<!tpu.dma_semaphore, #tpu.memory_space<semaphore_mem>>
    tpu.wait_dma2 semaphore(%99 : memref<!tpu.dma_semaphore, #tpu.memory_space<semaphore_mem>>) src(%95 : memref<128xf32, #tpu.memory_space<any>>) dst(%97 : memref<128xf32, #tpu.memory_space<vmem>>)
    %c3_i32_47 = arith.constant 3 : i32
    %100 = arith.addi %0, %c3_i32_47 : i32
    %101 = arith.index_cast %100 : i32 to index
    %102 = memref.load %arg1[%101] : memref<16xi32, #tpu.memory_space<smem>>
    %c3_i32_48 = arith.constant 3 : i32
    %c3_i32_49 = arith.constant 3 : i32
    %c0_i32_50 = arith.constant 0 : i32
    %103 = tpu.memref_slice %arg3[%102, %c0_i32_50] : memref<64x128xf32, #tpu.memory_space<any>> -> memref<1x128xf32, #tpu.memory_space<any>>
    %104 = tpu.memref_squeeze %103 : memref<1x128xf32, #tpu.memory_space<any>> -> memref<128xf32, #tpu.memory_space<any>>
    %c0_i32_51 = arith.constant 0 : i32
    %105 = tpu.memref_slice %arg5[%c3_i32_48, %c0_i32_51] : memref<8x128xf32, #tpu.memory_space<vmem>> -> memref<1x128xf32, #tpu.memory_space<vmem>>
    %106 = tpu.memref_squeeze %105 : memref<1x128xf32, #tpu.memory_space<vmem>> -> memref<128xf32, #tpu.memory_space<vmem>>
    %107 = tpu.memref_slice %arg6[%c3_i32_49] : memref<8x!tpu.dma_semaphore, #tpu.memory_space<semaphore_mem>> -> memref<1x!tpu.dma_semaphore, #tpu.memory_space<semaphore_mem>>
    %108 = tpu.memref_squeeze %107 : memref<1x!tpu.dma_semaphore, #tpu.memory_space<semaphore_mem>> -> memref<!tpu.dma_semaphore, #tpu.memory_space<semaphore_mem>>
    tpu.wait_dma2 semaphore(%108 : memref<!tpu.dma_semaphore, #tpu.memory_space<semaphore_mem>>) src(%104 : memref<128xf32, #tpu.memory_space<any>>) dst(%106 : memref<128xf32, #tpu.memory_space<vmem>>)
    %c4_i32_52 = arith.constant 4 : i32
    %109 = arith.addi %0, %c4_i32_52 : i32
    %110 = arith.index_cast %109 : i32 to index
    %111 = memref.load %arg1[%110] : memref<16xi32, #tpu.memory_space<smem>>
    %c4_i32_53 = arith.constant 4 : i32
    %c4_i32_54 = arith.constant 4 : i32
    %c0_i32_55 = arith.constant 0 : i32
    %112 = tpu.memref_slice %arg3[%111, %c0_i32_55] : memref<64x128xf32, #tpu.memory_space<any>> -> memref<1x128xf32, #tpu.memory_space<any>>
    %113 = tpu.memref_squeeze %112 : memref<1x128xf32, #tpu.memory_space<any>> -> memref<128xf32, #tpu.memory_space<any>>
    %c0_i32_56 = arith.constant 0 : i32
    %114 = tpu.memref_slice %arg5[%c4_i32_53, %c0_i32_56] : memref<8x128xf32, #tpu.memory_space<vmem>> -> memref<1x128xf32, #tpu.memory_space<vmem>>
    %115 = tpu.memref_squeeze %114 : memref<1x128xf32, #tpu.memory_space<vmem>> -> memref<128xf32, #tpu.memory_space<vmem>>
    %116 = tpu.memref_slice %arg6[%c4_i32_54] : memref<8x!tpu.dma_semaphore, #tpu.memory_space<semaphore_mem>> -> memref<1x!tpu.dma_semaphore, #tpu.memory_space<semaphore_mem>>
    %117 = tpu.memref_squeeze %116 : memref<1x!tpu.dma_semaphore, #tpu.memory_space<semaphore_mem>> -> memref<!tpu.dma_semaphore, #tpu.memory_space<semaphore_mem>>
    tpu.wait_dma2 semaphore(%117 : memref<!tpu.dma_semaphore, #tpu.memory_space<semaphore_mem>>) src(%113 : memref<128xf32, #tpu.memory_space<any>>) dst(%115 : memref<128xf32, #tpu.memory_space<vmem>>)
    %c5_i32_57 = arith.constant 5 : i32
    %118 = arith.addi %0, %c5_i32_57 : i32
    %119 = arith.index_cast %118 : i32 to index
    %120 = memref.load %arg1[%119] : memref<16xi32, #tpu.memory_space<smem>>
    %c5_i32_58 = arith.constant 5 : i32
    %c5_i32_59 = arith.constant 5 : i32
    %c0_i32_60 = arith.constant 0 : i32
    %121 = tpu.memref_slice %arg3[%120, %c0_i32_60] : memref<64x128xf32, #tpu.memory_space<any>> -> memref<1x128xf32, #tpu.memory_space<any>>
    %122 = tpu.memref_squeeze %121 : memref<1x128xf32, #tpu.memory_space<any>> -> memref<128xf32, #tpu.memory_space<any>>
    %c0_i32_61 = arith.constant 0 : i32
    %123 = tpu.memref_slice %arg5[%c5_i32_58, %c0_i32_61] : memref<8x128xf32, #tpu.memory_space<vmem>> -> memref<1x128xf32, #tpu.memory_space<vmem>>
    %124 = tpu.memref_squeeze %123 : memref<1x128xf32, #tpu.memory_space<vmem>> -> memref<128xf32, #tpu.memory_space<vmem>>
    %125 = tpu.memref_slice %arg6[%c5_i32_59] : memref<8x!tpu.dma_semaphore, #tpu.memory_space<semaphore_mem>> -> memref<1x!tpu.dma_semaphore, #tpu.memory_space<semaphore_mem>>
    %126 = tpu.memref_squeeze %125 : memref<1x!tpu.dma_semaphore, #tpu.memory_space<semaphore_mem>> -> memref<!tpu.dma_semaphore, #tpu.memory_space<semaphore_mem>>
    tpu.wait_dma2 semaphore(%126 : memref<!tpu.dma_semaphore, #tpu.memory_space<semaphore_mem>>) src(%122 : memref<128xf32, #tpu.memory_space<any>>) dst(%124 : memref<128xf32, #tpu.memory_space<vmem>>)
    %c6_i32_62 = arith.constant 6 : i32
    %127 = arith.addi %0, %c6_i32_62 : i32
    %128 = arith.index_cast %127 : i32 to index
    %129 = memref.load %arg1[%128] : memref<16xi32, #tpu.memory_space<smem>>
    %c6_i32_63 = arith.constant 6 : i32
    %c6_i32_64 = arith.constant 6 : i32
    %c0_i32_65 = arith.constant 0 : i32
    %130 = tpu.memref_slice %arg3[%129, %c0_i32_65] : memref<64x128xf32, #tpu.memory_space<any>> -> memref<1x128xf32, #tpu.memory_space<any>>
    %131 = tpu.memref_squeeze %130 : memref<1x128xf32, #tpu.memory_space<any>> -> memref<128xf32, #tpu.memory_space<any>>
    %c0_i32_66 = arith.constant 0 : i32
    %132 = tpu.memref_slice %arg5[%c6_i32_63, %c0_i32_66] : memref<8x128xf32, #tpu.memory_space<vmem>> -> memref<1x128xf32, #tpu.memory_space<vmem>>
    %133 = tpu.memref_squeeze %132 : memref<1x128xf32, #tpu.memory_space<vmem>> -> memref<128xf32, #tpu.memory_space<vmem>>
    %134 = tpu.memref_slice %arg6[%c6_i32_64] : memref<8x!tpu.dma_semaphore, #tpu.memory_space<semaphore_mem>> -> memref<1x!tpu.dma_semaphore, #tpu.memory_space<semaphore_mem>>
    %135 = tpu.memref_squeeze %134 : memref<1x!tpu.dma_semaphore, #tpu.memory_space<semaphore_mem>> -> memref<!tpu.dma_semaphore, #tpu.memory_space<semaphore_mem>>
    tpu.wait_dma2 semaphore(%135 : memref<!tpu.dma_semaphore, #tpu.memory_space<semaphore_mem>>) src(%131 : memref<128xf32, #tpu.memory_space<any>>) dst(%133 : memref<128xf32, #tpu.memory_space<vmem>>)
    %c7_i32_67 = arith.constant 7 : i32
    %136 = arith.addi %0, %c7_i32_67 : i32
    %137 = arith.index_cast %136 : i32 to index
    %138 = memref.load %arg1[%137] : memref<16xi32, #tpu.memory_space<smem>>
    %c7_i32_68 = arith.constant 7 : i32
    %c7_i32_69 = arith.constant 7 : i32
    %c0_i32_70 = arith.constant 0 : i32
    %139 = tpu.memref_slice %arg3[%138, %c0_i32_70] : memref<64x128xf32, #tpu.memory_space<any>> -> memref<1x128xf32, #tpu.memory_space<any>>
    %140 = tpu.memref_squeeze %139 : memref<1x128xf32, #tpu.memory_space<any>> -> memref<128xf32, #tpu.memory_space<any>>
    %c0_i32_71 = arith.constant 0 : i32
    %141 = tpu.memref_slice %arg5[%c7_i32_68, %c0_i32_71] : memref<8x128xf32, #tpu.memory_space<vmem>> -> memref<1x128xf32, #tpu.memory_space<vmem>>
    %142 = tpu.memref_squeeze %141 : memref<1x128xf32, #tpu.memory_space<vmem>> -> memref<128xf32, #tpu.memory_space<vmem>>
    %143 = tpu.memref_slice %arg6[%c7_i32_69] : memref<8x!tpu.dma_semaphore, #tpu.memory_space<semaphore_mem>> -> memref<1x!tpu.dma_semaphore, #tpu.memory_space<semaphore_mem>>
    %144 = tpu.memref_squeeze %143 : memref<1x!tpu.dma_semaphore, #tpu.memory_space<semaphore_mem>> -> memref<!tpu.dma_semaphore, #tpu.memory_space<semaphore_mem>>
    tpu.wait_dma2 semaphore(%144 : memref<!tpu.dma_semaphore, #tpu.memory_space<semaphore_mem>>) src(%140 : memref<128xf32, #tpu.memory_space<any>>) dst(%142 : memref<128xf32, #tpu.memory_space<vmem>>)
    %c0 = arith.constant 0 : index
    %c0_72 = arith.constant 0 : index
    %145 = vector.load %arg5[%c0, %c0_72] : memref<8x128xf32, #tpu.memory_space<vmem>>, vector<8x128xf32>
    %c0_73 = arith.constant 0 : index
    %c0_74 = arith.constant 0 : index
    %146 = vector.load %arg2[%c0_73, %c0_74] : memref<8x128xf32, #tpu.memory_space<vmem>>, vector<8x128xf32>
    %147 = arith.addf %145, %146 : vector<8x128xf32>
    %c0_75 = arith.constant 0 : index
    %c0_76 = arith.constant 0 : index
    %148 = vector.load %arg4[%c0_75, %c0_76] : memref<8x128xf32, #tpu.memory_space<vmem>>, vector<8x128xf32>
    tpu.vector_store %arg4[%c0_75, %c0_76], %147 {strides = array<i32>} : memref<8x128xf32, #tpu.memory_space<vmem>>, vector<8x128xf32>,
    return
  }
  func.func @transform_0(%arg0: i32, %arg1: memref<16xi32, #tpu.memory_space<smem>>) -> (i32, i32) {
    %c1_i32 = arith.constant 1 : i32
    %c0_i32 = arith.constant 0 : i32
    %0 = arith.cmpi eq, %c1_i32, %c0_i32 : i32
    %c1_i32_0 = arith.constant 1 : i32
    %1 = arith.select %0, %c1_i32_0, %c1_i32 : i32
    %2 = arith.remsi %arg0, %1 : i32
    %c0_i32_1 = arith.constant 0 : i32
    %3 = arith.cmpi ne, %2, %c0_i32_1 : i32
    %c0_i32_2 = arith.constant 0 : i32
    %4 = arith.cmpi slt, %2, %c0_i32_2 : i32
    %c0_i32_3 = arith.constant 0 : i32
    %5 = arith.cmpi slt, %1, %c0_i32_3 : i32
    %6 = arith.xori %4, %5 : i1
    %7 = arith.andi %6, %3 : i1
    %8 = arith.addi %2, %1 : i32
    %9 = arith.select %7, %8, %2 : i32
    %c0_i32_4 = arith.constant 0 : i32
    %c0_i32_5 = arith.constant 0 : i32
    return %9, %c0_i32_4 : i32, i32
  }
  func.func @transform_2(%arg0: i32, %arg1: memref<16xi32, #tpu.memory_space<smem>>) -> (i32, i32) {
    %c0_i32 = arith.constant 0 : i32
    %c0_i32_0 = arith.constant 0 : i32
    return %arg0, %c0_i32 : i32, i32
  }
}

module attributes {stable_mosaic.version = 11 : i64} {
  func.func @_fused_linear_kernel(%arg0: i32, %arg1: i32, %arg2: memref<16x128xf32, #tpu.memory_space<vmem>>, %arg3: memref<128x128xf32, #tpu.memory_space<vmem>>, %arg4: memref<1x128xf32, #tpu.memory_space<vmem>>, %arg5: memref<16x128xf32, #tpu.memory_space<vmem>>, %arg6: memref<16x128xf32, #tpu.memory_space<vmem>>) attributes {dimension_semantics = [#tpu.dimension_semantics<parallel>, #tpu.dimension_semantics<parallel>], iteration_bounds = array<i64: 1, 1>, scalar_prefetch = 0 : i64, scratch_operands = 0 : i64, tpu.core_type = #tpu.core_type<tc>, window_params = [{transform_indices = @transform_0, window_bounds = array<i64: 16, 128>}, {transform_indices = @transform_1, window_bounds = array<i64: 128, 128>}, {transform_indices = @transform_2, window_bounds = array<i64: 1, 128>}, {transform_indices = @transform_3, window_bounds = array<i64: 16, 128>}, {transform_indices = @transform_4, window_bounds = array<i64: 16, 128>}]} {
    %c0 = arith.constant 0 : index
    %c0_0 = arith.constant 0 : index
    %0 = vector.load %arg2[%c0, %c0_0] : memref<16x128xf32, #tpu.memory_space<vmem>>, vector<16x128xf32>
    %1 = arith.truncf %0 : vector<16x128xf32> to vector<16x128xbf16>
    %c0_1 = arith.constant 0 : index
    %c0_2 = arith.constant 0 : index
    %2 = vector.load %arg3[%c0_1, %c0_2] : memref<128x128xf32, #tpu.memory_space<vmem>>, vector<128x128xf32>
    %3 = arith.truncf %2 : vector<128x128xf32> to vector<128x128xbf16>
    %cst = arith.constant dense<0.000000e+00> : vector<16x128xf32>
    %4 = tpu.matmul %1, %3, %cst {dimension_numbers = #tpu.dot_dimension_numbers<[1], [0], [0], [1], [0, 0, 1, 1], [], []>} : vector<16x128xbf16>, vector<128x128xbf16>, vector<16x128xf32> -> vector<16x128xf32>
    %c0_3 = arith.constant 0 : index
    %c0_4 = arith.constant 0 : index
    %5 = vector.load %arg4[%c0_3, %c0_4] : memref<1x128xf32, #tpu.memory_space<vmem>>, vector<1x128xf32>
    %6 = vector.broadcast %5 : vector<1x128xf32> to vector<16x128xf32>
    %7 = arith.addf %4, %6 : vector<16x128xf32>
    %c0_5 = arith.constant 0 : index
    %c0_6 = arith.constant 0 : index
    %8 = vector.load %arg5[%c0_5, %c0_6] : memref<16x128xf32, #tpu.memory_space<vmem>>, vector<16x128xf32>
    %9 = arith.addf %7, %8 : vector<16x128xf32>
    %c0_7 = arith.constant 0 : index
    %c0_8 = arith.constant 0 : index
    %10 = vector.load %arg6[%c0_7, %c0_8] : memref<16x128xf32, #tpu.memory_space<vmem>>, vector<16x128xf32>
    tpu.vector_store %arg6[%c0_7, %c0_8], %9 {strides = array<i32>} : memref<16x128xf32, #tpu.memory_space<vmem>>, vector<16x128xf32>,
    return
  }
  func.func @transform_0(%arg0: i32, %arg1: i32) -> (i32, i32) {
    %c0_i32 = arith.constant 0 : i32
    %c0_i32_0 = arith.constant 0 : i32
    return %arg0, %c0_i32 : i32, i32
  }
  func.func @transform_1(%arg0: i32, %arg1: i32) -> (i32, i32) {
    %c0_i32 = arith.constant 0 : i32
    %c0_i32_0 = arith.constant 0 : i32
    return %c0_i32, %arg1 : i32, i32
  }
  func.func @transform_2(%arg0: i32, %arg1: i32) -> (i32, i32) {
    %c0_i32 = arith.constant 0 : i32
    %c0_i32_0 = arith.constant 0 : i32
    return %c0_i32, %arg1 : i32, i32
  }
  func.func @transform_3(%arg0: i32, %arg1: i32) -> (i32, i32) {
    %c0_i32 = arith.constant 0 : i32
    return %arg0, %arg1 : i32, i32
  }
  func.func @transform_4(%arg0: i32, %arg1: i32) -> (i32, i32) {
    %c0_i32 = arith.constant 0 : i32
    return %arg0, %arg1 : i32, i32
  }
}

module attributes {stable_mosaic.version = 11 : i64} {
  func.func @_fused_linear_kernel(%arg0: i32, %arg1: i32, %arg2: memref<16x128xf32, #tpu.memory_space<vmem>>, %arg3: memref<128x128xf32, #tpu.memory_space<vmem>>, %arg4: memref<1x128xf32, #tpu.memory_space<vmem>>, %arg5: memref<1x128xf32, #tpu.memory_space<vmem>>, %arg6: memref<1x128xf32, #tpu.memory_space<vmem>>, %arg7: memref<16x128xf32, #tpu.memory_space<vmem>>) attributes {dimension_semantics = [#tpu.dimension_semantics<parallel>, #tpu.dimension_semantics<parallel>], iteration_bounds = array<i64: 1, 3>, scalar_prefetch = 0 : i64, scratch_operands = 0 : i64, tpu.core_type = #tpu.core_type<tc>, window_params = [{transform_indices = @transform_0, window_bounds = array<i64: 16, 128>}, {transform_indices = @transform_1, window_bounds = array<i64: 128, 128>}, {transform_indices = @transform_2, window_bounds = array<i64: 1, 128>}, {pipeline_mode = #tpu.pipeline_mode<synchronous>, transform_indices = @transform_3, window_bounds = array<i64: 1, 128>}, {pipeline_mode = #tpu.pipeline_mode<synchronous>, transform_indices = @transform_4, window_bounds = array<i64: 1, 128>}, {transform_indices = @transform_5, window_bounds = array<i64: 16, 128>}]} {
    %c0 = arith.constant 0 : index
    %c0_0 = arith.constant 0 : index
    %0 = vector.load %arg2[%c0, %c0_0] : memref<16x128xf32, #tpu.memory_space<vmem>>, vector<16x128xf32>
    %cst = arith.constant dense<0.000000e+00> : vector<16xf32>
    %1 = vector.multi_reduction <add>, %0, %cst [1] : vector<16x128xf32> to vector<16xf32>
    %2 = vector.shape_cast %1 : vector<16xf32> to vector<16x1xf32>
    %cst_1 = arith.constant 1.280000e+02 : f32
    %3 = vector.broadcast %cst_1 : f32 to vector<16x1xf32>
    %4 = arith.divf %2, %3 : vector<16x1xf32>
    %5 = vector.broadcast %4 : vector<16x1xf32> to vector<16x128xf32>
    %6 = arith.subf %0, %5 : vector<16x128xf32>
    %7 = arith.mulf %6, %6 : vector<16x128xf32>
    %cst_2 = arith.constant dense<0.000000e+00> : vector<16xf32>
    %8 = vector.multi_reduction <add>, %7, %cst_2 [1] : vector<16x128xf32> to vector<16xf32>
    %9 = vector.shape_cast %8 : vector<16xf32> to vector<16x1xf32>
    %cst_3 = arith.constant 1.280000e+02 : f32
    %10 = vector.broadcast %cst_3 : f32 to vector<16x1xf32>
    %11 = arith.divf %9, %10 : vector<16x1xf32>
    %cst_4 = arith.constant 9.99999974E-6 : f32
    %12 = vector.broadcast %cst_4 : f32 to vector<16x1xf32>
    %13 = arith.addf %11, %12 : vector<16x1xf32>
    %14 = math.rsqrt %13 : vector<16x1xf32>
    %15 = vector.broadcast %14 : vector<16x1xf32> to vector<16x128xf32>
    %16 = arith.mulf %6, %15 : vector<16x128xf32>
    %c0_5 = arith.constant 0 : index
    %c0_6 = arith.constant 0 : index
    %17 = vector.load %arg5[%c0_5, %c0_6] : memref<1x128xf32, #tpu.memory_space<vmem>>, vector<1x128xf32>
    %18 = vector.broadcast %17 : vector<1x128xf32> to vector<16x128xf32>
    %19 = arith.mulf %16, %18 : vector<16x128xf32>
    %c0_7 = arith.constant 0 : index
    %c0_8 = arith.constant 0 : index
    %20 = vector.load %arg6[%c0_7, %c0_8] : memref<1x128xf32, #tpu.memory_space<vmem>>, vector<1x128xf32>
    %21 = vector.broadcast %20 : vector<1x128xf32> to vector<16x128xf32>
    %22 = arith.addf %19, %21 : vector<16x128xf32>
    %23 = arith.truncf %22 : vector<16x128xf32> to vector<16x128xbf16>
    %c0_9 = arith.constant 0 : index
    %c0_10 = arith.constant 0 : index
    %24 = vector.load %arg3[%c0_9, %c0_10] : memref<128x128xf32, #tpu.memory_space<vmem>>, vector<128x128xf32>
    %25 = arith.truncf %24 : vector<128x128xf32> to vector<128x128xbf16>
    %cst_11 = arith.constant dense<0.000000e+00> : vector<16x128xf32>
    %26 = tpu.matmul %23, %25, %cst_11 {dimension_numbers = #tpu.dot_dimension_numbers<[1], [0], [0], [1], [0, 0, 1, 1], [], []>} : vector<16x128xbf16>, vector<128x128xbf16>, vector<16x128xf32> -> vector<16x128xf32>
    %c0_12 = arith.constant 0 : index
    %c0_13 = arith.constant 0 : index
    %27 = vector.load %arg4[%c0_12, %c0_13] : memref<1x128xf32, #tpu.memory_space<vmem>>, vector<1x128xf32>
    %28 = vector.broadcast %27 : vector<1x128xf32> to vector<16x128xf32>
    %29 = arith.addf %26, %28 : vector<16x128xf32>
    %c0_14 = arith.constant 0 : index
    %c0_15 = arith.constant 0 : index
    %30 = vector.load %arg7[%c0_14, %c0_15] : memref<16x128xf32, #tpu.memory_space<vmem>>, vector<16x128xf32>
    tpu.vector_store %arg7[%c0_14, %c0_15], %29 {strides = array<i32>} : memref<16x128xf32, #tpu.memory_space<vmem>>, vector<16x128xf32>,
    return
  }
  func.func @transform_0(%arg0: i32, %arg1: i32) -> (i32, i32) {
    %c0_i32 = arith.constant 0 : i32
    %c0_i32_0 = arith.constant 0 : i32
    return %arg0, %c0_i32 : i32, i32
  }
  func.func @transform_1(%arg0: i32, %arg1: i32) -> (i32, i32) {
    %c0_i32 = arith.constant 0 : i32
    %c0_i32_0 = arith.constant 0 : i32
    return %c0_i32, %arg1 : i32, i32
  }
  func.func @transform_2(%arg0: i32, %arg1: i32) -> (i32, i32) {
    %c0_i32 = arith.constant 0 : i32
    %c0_i32_0 = arith.constant 0 : i32
    return %c0_i32, %arg1 : i32, i32
  }
  func.func @transform_3(%arg0: i32, %arg1: i32) -> (i32, i32) {
    %c0_i32 = arith.constant 0 : i32
    %c0_i32_0 = arith.constant 0 : i32
    %c0_i32_1 = arith.constant 0 : i32
    return %c0_i32, %c0_i32_0 : i32, i32
  }
  func.func @transform_4(%arg0: i32, %arg1: i32) -> (i32, i32) {
    %c0_i32 = arith.constant 0 : i32
    %c0_i32_0 = arith.constant 0 : i32
    %c0_i32_1 = arith.constant 0 : i32
    return %c0_i32, %c0_i32_0 : i32, i32
  }
  func.func @transform_5(%arg0: i32, %arg1: i32) -> (i32, i32) {
    %c0_i32 = arith.constant 0 : i32
    return %arg0, %arg1 : i32, i32
  }
}

module attributes {stable_mosaic.version = 11 : i64} {
  func.func @_attention_kernel(%arg0: i32, %arg1: memref<8x384xf32, #tpu.memory_space<vmem>>, %arg2: memref<1x1x8xi32, #tpu.memory_space<vmem>>, %arg3: memref<8x128xf32, #tpu.memory_space<vmem>>) attributes {dimension_semantics = [#tpu.dimension_semantics<parallel>], iteration_bounds = array<i64: 2>, scalar_prefetch = 0 : i64, scratch_operands = 0 : i64, tpu.core_type = #tpu.core_type<tc>, window_params = [{transform_indices = @transform_0, window_bounds = array<i64: 8, 384>}, {transform_indices = @transform_1, window_bounds = array<i64: 1, 1, 8>}, {transform_indices = @transform_2, window_bounds = array<i64: 8, 128>}]} {
    %c0 = arith.constant 0 : index
    %c0_0 = arith.constant 0 : index
    %0 = vector.load %arg1[%c0, %c0_0] : memref<8x384xf32, #tpu.memory_space<vmem>>, vector<8x384xf32>
    %c0_1 = arith.constant 0 : index
    %c0_2 = arith.constant 0 : index
    %c0_3 = arith.constant 0 : index
    %1 = vector.load %arg2[%c0_1, %c0_2, %c0_3] : memref<1x1x8xi32, #tpu.memory_space<vmem>>, vector<1x1x8xi32>
    %2 = vector.shape_cast %1 : vector<1x1x8xi32> to vector<1x8xi32>
    %3 = vector.extract_strided_slice %0 {offsets = [0, 0], sizes = [8, 32], strides = [1, 1]} : vector<8x384xf32> to vector<8x32xf32>
    %cst = arith.constant 0.176776692 : f32
    %4 = vector.broadcast %cst : f32 to vector<8x32xf32>
    %5 = arith.mulf %3, %4 : vector<8x32xf32>
    %6 = vector.extract_strided_slice %0 {offsets = [0, 128], sizes = [8, 32], strides = [1, 1]} : vector<8x384xf32> to vector<8x32xf32>
    %7 = vector.extract_strided_slice %0 {offsets = [0, 256], sizes = [8, 32], strides = [1, 1]} : vector<8x384xf32> to vector<8x32xf32>
    %8 = arith.truncf %5 : vector<8x32xf32> to vector<8x32xbf16>
    %9 = arith.truncf %6 : vector<8x32xf32> to vector<8x32xbf16>
    %cst_4 = arith.constant dense<0.000000e+00> : vector<8x8xf32>
    %10 = tpu.matmul %8, %9, %cst_4 {dimension_numbers = #tpu.dot_dimension_numbers<[1], [1], [0], [0], [0, 0, 1, 0], [], []>} : vector<8x32xbf16>, vector<8x32xbf16>, vector<8x8xf32> -> vector<8x8xf32>
    %c0_i32 = arith.constant 0 : i32
    %11 = vector.broadcast %c0_i32 : i32 to vector<1x8xi32>
    %12 = arith.cmpi eq, %2, %11 : vector<1x8xi32>
    %cst_5 = arith.constant -1.000000e+09 : f32
    %13 = vector.shape_cast %12 : vector<1x8xi1> to vector<1x8xi1>
    %14 = vector.broadcast %13 : vector<1x8xi1> to vector<8x8xi1>
    %15 = vector.broadcast %cst_5 : f32 to vector<8x8xf32>
    %16 = arith.select %14, %15, %10 : vector<8x8xi1>, vector<8x8xf32>
    %cst_6 = arith.constant dense<0xFF800000> : vector<8xf32>
    %17 = vector.multi_reduction <maximumf>, %16, %cst_6 [1] : vector<8x8xf32> to vector<8xf32>
    %18 = vector.shape_cast %17 : vector<8xf32> to vector<8x1xf32>
    %19 = vector.broadcast %18 : vector<8x1xf32> to vector<8x8xf32>
    %20 = arith.subf %16, %19 : vector<8x8xf32>
    %21 = math.exp %20 : vector<8x8xf32>
    %cst_7 = arith.constant dense<0.000000e+00> : vector<8xf32>
    %22 = vector.multi_reduction <add>, %21, %cst_7 [1] : vector<8x8xf32> to vector<8xf32>
    %23 = vector.shape_cast %22 : vector<8xf32> to vector<8x1xf32>
    %24 = tpu.reciprocal %23 {approx = true} : vector<8x1xf32> -> vector<8x1xf32>
    %25 = vector.broadcast %24 : vector<8x1xf32> to vector<8x8xf32>
    %26 = arith.mulf %21, %25 : vector<8x8xf32>
    %27 = arith.truncf %26 : vector<8x8xf32> to vector<8x8xbf16>
    %28 = arith.truncf %7 : vector<8x32xf32> to vector<8x32xbf16>
    %cst_8 = arith.constant dense<0.000000e+00> : vector<8x32xf32>
    %29 = tpu.matmul %27, %28, %cst_8 {dimension_numbers = #tpu.dot_dimension_numbers<[1], [0], [0], [1], [0, 0, 1, 1], [], []>} : vector<8x8xbf16>, vector<8x32xbf16>, vector<8x32xf32> -> vector<8x32xf32>
    %30 = vector.extract_strided_slice %0 {offsets = [0, 32], sizes = [8, 32], strides = [1, 1]} : vector<8x384xf32> to vector<8x32xf32>
    %cst_9 = arith.constant 0.176776692 : f32
    %31 = vector.broadcast %cst_9 : f32 to vector<8x32xf32>
    %32 = arith.mulf %30, %31 : vector<8x32xf32>
    %33 = vector.extract_strided_slice %0 {offsets = [0, 160], sizes = [8, 32], strides = [1, 1]} : vector<8x384xf32> to vector<8x32xf32>
    %34 = vector.extract_strided_slice %0 {offsets = [0, 288], sizes = [8, 32], strides = [1, 1]} : vector<8x384xf32> to vector<8x32xf32>
    %35 = arith.truncf %32 : vector<8x32xf32> to vector<8x32xbf16>
    %36 = arith.truncf %33 : vector<8x32xf32> to vector<8x32xbf16>
    %cst_10 = arith.constant dense<0.000000e+00> : vector<8x8xf32>
    %37 = tpu.matmul %35, %36, %cst_10 {dimension_numbers = #tpu.dot_dimension_numbers<[1], [1], [0], [0], [0, 0, 1, 0], [], []>} : vector<8x32xbf16>, vector<8x32xbf16>, vector<8x8xf32> -> vector<8x8xf32>
    %c0_i32_11 = arith.constant 0 : i32
    %38 = vector.broadcast %c0_i32_11 : i32 to vector<1x8xi32>
    %39 = arith.cmpi eq, %2, %38 : vector<1x8xi32>
    %cst_12 = arith.constant -1.000000e+09 : f32
    %40 = vector.shape_cast %39 : vector<1x8xi1> to vector<1x8xi1>
    %41 = vector.broadcast %40 : vector<1x8xi1> to vector<8x8xi1>
    %42 = vector.broadcast %cst_12 : f32 to vector<8x8xf32>
    %43 = arith.select %41, %42, %37 : vector<8x8xi1>, vector<8x8xf32>
    %cst_13 = arith.constant dense<0xFF800000> : vector<8xf32>
    %44 = vector.multi_reduction <maximumf>, %43, %cst_13 [1] : vector<8x8xf32> to vector<8xf32>
    %45 = vector.shape_cast %44 : vector<8xf32> to vector<8x1xf32>
    %46 = vector.broadcast %45 : vector<8x1xf32> to vector<8x8xf32>
    %47 = arith.subf %43, %46 : vector<8x8xf32>
    %48 = math.exp %47 : vector<8x8xf32>
    %cst_14 = arith.constant dense<0.000000e+00> : vector<8xf32>
    %49 = vector.multi_reduction <add>, %48, %cst_14 [1] : vector<8x8xf32> to vector<8xf32>
    %50 = vector.shape_cast %49 : vector<8xf32> to vector<8x1xf32>
    %51 = tpu.reciprocal %50 {approx = true} : vector<8x1xf32> -> vector<8x1xf32>
    %52 = vector.broadcast %51 : vector<8x1xf32> to vector<8x8xf32>
    %53 = arith.mulf %48, %52 : vector<8x8xf32>
    %54 = arith.truncf %53 : vector<8x8xf32> to vector<8x8xbf16>
    %55 = arith.truncf %34 : vector<8x32xf32> to vector<8x32xbf16>
    %cst_15 = arith.constant dense<0.000000e+00> : vector<8x32xf32>
    %56 = tpu.matmul %54, %55, %cst_15 {dimension_numbers = #tpu.dot_dimension_numbers<[1], [0], [0], [1], [0, 0, 1, 1], [], []>} : vector<8x8xbf16>, vector<8x32xbf16>, vector<8x32xf32> -> vector<8x32xf32>
    %57 = vector.extract_strided_slice %0 {offsets = [0, 64], sizes = [8, 32], strides = [1, 1]} : vector<8x384xf32> to vector<8x32xf32>
    %cst_16 = arith.constant 0.176776692 : f32
    %58 = vector.broadcast %cst_16 : f32 to vector<8x32xf32>
    %59 = arith.mulf %57, %58 : vector<8x32xf32>
    %60 = vector.extract_strided_slice %0 {offsets = [0, 192], sizes = [8, 32], strides = [1, 1]} : vector<8x384xf32> to vector<8x32xf32>
    %61 = vector.extract_strided_slice %0 {offsets = [0, 320], sizes = [8, 32], strides = [1, 1]} : vector<8x384xf32> to vector<8x32xf32>
    %62 = arith.truncf %59 : vector<8x32xf32> to vector<8x32xbf16>
    %63 = arith.truncf %60 : vector<8x32xf32> to vector<8x32xbf16>
    %cst_17 = arith.constant dense<0.000000e+00> : vector<8x8xf32>
    %64 = tpu.matmul %62, %63, %cst_17 {dimension_numbers = #tpu.dot_dimension_numbers<[1], [1], [0], [0], [0, 0, 1, 0], [], []>} : vector<8x32xbf16>, vector<8x32xbf16>, vector<8x8xf32> -> vector<8x8xf32>
    %c0_i32_18 = arith.constant 0 : i32
    %65 = vector.broadcast %c0_i32_18 : i32 to vector<1x8xi32>
    %66 = arith.cmpi eq, %2, %65 : vector<1x8xi32>
    %cst_19 = arith.constant -1.000000e+09 : f32
    %67 = vector.shape_cast %66 : vector<1x8xi1> to vector<1x8xi1>
    %68 = vector.broadcast %67 : vector<1x8xi1> to vector<8x8xi1>
    %69 = vector.broadcast %cst_19 : f32 to vector<8x8xf32>
    %70 = arith.select %68, %69, %64 : vector<8x8xi1>, vector<8x8xf32>
    %cst_20 = arith.constant dense<0xFF800000> : vector<8xf32>
    %71 = vector.multi_reduction <maximumf>, %70, %cst_20 [1] : vector<8x8xf32> to vector<8xf32>
    %72 = vector.shape_cast %71 : vector<8xf32> to vector<8x1xf32>
    %73 = vector.broadcast %72 : vector<8x1xf32> to vector<8x8xf32>
    %74 = arith.subf %70, %73 : vector<8x8xf32>
    %75 = math.exp %74 : vector<8x8xf32>
    %cst_21 = arith.constant dense<0.000000e+00> : vector<8xf32>
    %76 = vector.multi_reduction <add>, %75, %cst_21 [1] : vector<8x8xf32> to vector<8xf32>
    %77 = vector.shape_cast %76 : vector<8xf32> to vector<8x1xf32>
    %78 = tpu.reciprocal %77 {approx = true} : vector<8x1xf32> -> vector<8x1xf32>
    %79 = vector.broadcast %78 : vector<8x1xf32> to vector<8x8xf32>
    %80 = arith.mulf %75, %79 : vector<8x8xf32>
    %81 = arith.truncf %80 : vector<8x8xf32> to vector<8x8xbf16>
    %82 = arith.truncf %61 : vector<8x32xf32> to vector<8x32xbf16>
    %cst_22 = arith.constant dense<0.000000e+00> : vector<8x32xf32>
    %83 = tpu.matmul %81, %82, %cst_22 {dimension_numbers = #tpu.dot_dimension_numbers<[1], [0], [0], [1], [0, 0, 1, 1], [], []>} : vector<8x8xbf16>, vector<8x32xbf16>, vector<8x32xf32> -> vector<8x32xf32>
    %84 = vector.extract_strided_slice %0 {offsets = [0, 96], sizes = [8, 32], strides = [1, 1]} : vector<8x384xf32> to vector<8x32xf32>
    %cst_23 = arith.constant 0.176776692 : f32
    %85 = vector.broadcast %cst_23 : f32 to vector<8x32xf32>
    %86 = arith.mulf %84, %85 : vector<8x32xf32>
    %87 = vector.extract_strided_slice %0 {offsets = [0, 224], sizes = [8, 32], strides = [1, 1]} : vector<8x384xf32> to vector<8x32xf32>
    %88 = vector.extract_strided_slice %0 {offsets = [0, 352], sizes = [8, 32], strides = [1, 1]} : vector<8x384xf32> to vector<8x32xf32>
    %89 = arith.truncf %86 : vector<8x32xf32> to vector<8x32xbf16>
    %90 = arith.truncf %87 : vector<8x32xf32> to vector<8x32xbf16>
    %cst_24 = arith.constant dense<0.000000e+00> : vector<8x8xf32>
    %91 = tpu.matmul %89, %90, %cst_24 {dimension_numbers = #tpu.dot_dimension_numbers<[1], [1], [0], [0], [0, 0, 1, 0], [], []>} : vector<8x32xbf16>, vector<8x32xbf16>, vector<8x8xf32> -> vector<8x8xf32>
    %c0_i32_25 = arith.constant 0 : i32
    %92 = vector.broadcast %c0_i32_25 : i32 to vector<1x8xi32>
    %93 = arith.cmpi eq, %2, %92 : vector<1x8xi32>
    %cst_26 = arith.constant -1.000000e+09 : f32
    %94 = vector.shape_cast %93 : vector<1x8xi1> to vector<1x8xi1>
    %95 = vector.broadcast %94 : vector<1x8xi1> to vector<8x8xi1>
    %96 = vector.broadcast %cst_26 : f32 to vector<8x8xf32>
    %97 = arith.select %95, %96, %91 : vector<8x8xi1>, vector<8x8xf32>
    %cst_27 = arith.constant dense<0xFF800000> : vector<8xf32>
    %98 = vector.multi_reduction <maximumf>, %97, %cst_27 [1] : vector<8x8xf32> to vector<8xf32>
    %99 = vector.shape_cast %98 : vector<8xf32> to vector<8x1xf32>
    %100 = vector.broadcast %99 : vector<8x1xf32> to vector<8x8xf32>
    %101 = arith.subf %97, %100 : vector<8x8xf32>
    %102 = math.exp %101 : vector<8x8xf32>
    %cst_28 = arith.constant dense<0.000000e+00> : vector<8xf32>
    %103 = vector.multi_reduction <add>, %102, %cst_28 [1] : vector<8x8xf32> to vector<8xf32>
    %104 = vector.shape_cast %103 : vector<8xf32> to vector<8x1xf32>
    %105 = tpu.reciprocal %104 {approx = true} : vector<8x1xf32> -> vector<8x1xf32>
    %106 = vector.broadcast %105 : vector<8x1xf32> to vector<8x8xf32>
    %107 = arith.mulf %102, %106 : vector<8x8xf32>
    %108 = arith.truncf %107 : vector<8x8xf32> to vector<8x8xbf16>
    %109 = arith.truncf %88 : vector<8x32xf32> to vector<8x32xbf16>
    %cst_29 = arith.constant dense<0.000000e+00> : vector<8x32xf32>
    %110 = tpu.matmul %108, %109, %cst_29 {dimension_numbers = #tpu.dot_dimension_numbers<[1], [0], [0], [1], [0, 0, 1, 1], [], []>} : vector<8x8xbf16>, vector<8x32xbf16>, vector<8x32xf32> -> vector<8x32xf32>
    %111 = tpu.concatenate %29, %56, %83, %110 in 1 : vector<8x32xf32>, vector<8x32xf32>, vector<8x32xf32>, vector<8x32xf32> -> vector<8x128xf32>
    %c0_30 = arith.constant 0 : index
    %c0_31 = arith.constant 0 : index
    %112 = vector.load %arg3[%c0_30, %c0_31] : memref<8x128xf32, #tpu.memory_space<vmem>>, vector<8x128xf32>
    tpu.vector_store %arg3[%c0_30, %c0_31], %111 {strides = array<i32>} : memref<8x128xf32, #tpu.memory_space<vmem>>, vector<8x128xf32>,
    return
  }
  func.func @transform_0(%arg0: i32) -> (i32, i32) {
    %c0_i32 = arith.constant 0 : i32
    %c0_i32_0 = arith.constant 0 : i32
    return %arg0, %c0_i32 : i32, i32
  }
  func.func @transform_1(%arg0: i32) -> (i32, i32, i32) {
    %c0_i32 = arith.constant 0 : i32
    %c0_i32_0 = arith.constant 0 : i32
    %c0_i32_1 = arith.constant 0 : i32
    return %arg0, %c0_i32, %c0_i32_0 : i32, i32, i32
  }
  func.func @transform_2(%arg0: i32) -> (i32, i32) {
    %c0_i32 = arith.constant 0 : i32
    %c0_i32_0 = arith.constant 0 : i32
    return %arg0, %c0_i32 : i32, i32
  }
}

module attributes {stable_mosaic.version = 11 : i64} {
  func.func @_linear_ktiled_kernel(%arg0: i32, %arg1: i32, %arg2: i32, %arg3: memref<16x512xf32, #tpu.memory_space<vmem>>, %arg4: memref<512x128xf32, #tpu.memory_space<vmem>>, %arg5: memref<1x128xf32, #tpu.memory_space<vmem>>, %arg6: memref<16x128xf32, #tpu.memory_space<vmem>>, %arg7: memref<16x128xf32, #tpu.memory_space<vmem>>, %arg8: memref<16x128xf32, #tpu.memory_space<vmem>>) attributes {dimension_semantics = [#tpu.dimension_semantics<parallel>, #tpu.dimension_semantics<parallel>, #tpu.dimension_semantics<arbitrary>], iteration_bounds = array<i64: 1, 1, 4>, scalar_prefetch = 0 : i64, scratch_operands = 1 : i64, tpu.core_type = #tpu.core_type<tc>, window_params = [{transform_indices = @transform_0, window_bounds = array<i64: 16, 512>}, {transform_indices = @transform_1, window_bounds = array<i64: 512, 128>}, {transform_indices = @transform_2, window_bounds = array<i64: 1, 128>}, {transform_indices = @transform_3, window_bounds = array<i64: 16, 128>}, {transform_indices = @transform_4, window_bounds = array<i64: 16, 128>}]} {
    %c0_i32 = arith.constant 0 : i32
    %0 = arith.cmpi eq, %arg2, %c0_i32 : i32
    %1 = arith.extui %0 : i1 to i32
    %c0_i32_0 = arith.constant 0 : i32
    %2 = arith.cmpi ne, %1, %c0_i32_0 : i32
    scf.if %2 {
      %cst_9 = arith.constant 0.000000e+00 : f32
      %14 = vector.broadcast %cst_9 : f32 to vector<16x128xf32>
      %c0_10 = arith.constant 0 : index
      %c0_11 = arith.constant 0 : index
      %15 = vector.load %arg8[%c0_10, %c0_11] : memref<16x128xf32, #tpu.memory_space<vmem>>, vector<16x128xf32>
      tpu.vector_store %arg8[%c0_10, %c0_11], %14 {strides = array<i32>} : memref<16x128xf32, #tpu.memory_space<vmem>>, vector<16x128xf32>,
    } else {
    }
    %c0 = arith.constant 0 : index
    %c0_1 = arith.constant 0 : index
    %3 = vector.load %arg8[%c0, %c0_1] : memref<16x128xf32, #tpu.memory_space<vmem>>, vector<16x128xf32>
    %c0_2 = arith.constant 0 : index
    %c0_3 = arith.constant 0 : index
    %4 = vector.load %arg3[%c0_2, %c0_3] : memref<16x512xf32, #tpu.memory_space<vmem>>, vector<16x512xf32>
    %5 = arith.truncf %4 : vector<16x512xf32> to vector<16x512xbf16>
    %c0_4 = arith.constant 0 : index
    %c0_5 = arith.constant 0 : index
    %6 = vector.load %arg4[%c0_4, %c0_5] : memref<512x128xf32, #tpu.memory_space<vmem>>, vector<512x128xf32>
    %7 = arith.truncf %6 : vector<512x128xf32> to vector<512x128xbf16>
    %cst = arith.constant dense<0.000000e+00> : vector<16x128xf32>
    %8 = tpu.matmul %5, %7, %cst {dimension_numbers = #tpu.dot_dimension_numbers<[1], [0], [0], [1], [0, 0, 1, 1], [], []>} : vector<16x512xbf16>, vector<512x128xbf16>, vector<16x128xf32> -> vector<16x128xf32>
    %9 = arith.addf %3, %8 : vector<16x128xf32>
    %c0_6 = arith.constant 0 : index
    %c0_7 = arith.constant 0 : index
    %10 = vector.load %arg8[%c0_6, %c0_7] : memref<16x128xf32, #tpu.memory_space<vmem>>, vector<16x128xf32>
    tpu.vector_store %arg8[%c0_6, %c0_7], %9 {strides = array<i32>} : memref<16x128xf32, #tpu.memory_space<vmem>>, vector<16x128xf32>,
    %c3_i32 = arith.constant 3 : i32
    %11 = arith.cmpi eq, %arg2, %c3_i32 : i32
    %12 = arith.extui %11 : i1 to i32
    %c0_i32_8 = arith.constant 0 : i32
    %13 = arith.cmpi ne, %12, %c0_i32_8 : i32
    scf.if %13 {
      %c0_9 = arith.constant 0 : index
      %c0_10 = arith.constant 0 : index
      %14 = vector.load %arg8[%c0_9, %c0_10] : memref<16x128xf32, #tpu.memory_space<vmem>>, vector<16x128xf32>
      %c0_11 = arith.constant 0 : index
      %c0_12 = arith.constant 0 : index
      %15 = vector.load %arg5[%c0_11, %c0_12] : memref<1x128xf32, #tpu.memory_space<vmem>>, vector<1x128xf32>
      %16 = vector.broadcast %15 : vector<1x128xf32> to vector<16x128xf32>
      %17 = arith.addf %14, %16 : vector<16x128xf32>
      %c0_13 = arith.constant 0 : index
      %c0_14 = arith.constant 0 : index
      %18 = vector.load %arg6[%c0_13, %c0_14] : memref<16x128xf32, #tpu.memory_space<vmem>>, vector<16x128xf32>
      %19 = arith.addf %17, %18 : vector<16x128xf32>
      %c0_15 = arith.constant 0 : index
      %c0_16 = arith.constant 0 : index
      %20 = vector.load %arg7[%c0_15, %c0_16] : memref<16x128xf32, #tpu.memory_space<vmem>>, vector<16x128xf32>
      tpu.vector_store %arg7[%c0_15, %c0_16], %19 {strides = array<i32>} : memref<16x128xf32, #tpu.memory_space<vmem>>, vector<16x128xf32>,
    } else {
    }
    return
  }
  func.func @transform_0(%arg0: i32, %arg1: i32, %arg2: i32) -> (i32, i32) {
    %c0_i32 = arith.constant 0 : i32
    return %arg0, %arg2 : i32, i32
  }
  func.func @transform_1(%arg0: i32, %arg1: i32, %arg2: i32) -> (i32, i32) {
    %c0_i32 = arith.constant 0 : i32
    return %arg2, %arg1 : i32, i32
  }
  func.func @transform_2(%arg0: i32, %arg1: i32, %arg2: i32) -> (i32, i32) {
    %c0_i32 = arith.constant 0 : i32
    %c0_i32_0 = arith.constant 0 : i32
    return %c0_i32, %arg1 : i32, i32
  }
  func.func @transform_3(%arg0: i32, %arg1: i32, %arg2: i32) -> (i32, i32) {
    %c0_i32 = arith.constant 0 : i32
    return %arg0, %arg1 : i32, i32
  }
  func.func @transform_4(%arg0: i32, %arg1: i32, %arg2: i32) -> (i32, i32) {
    %c0_i32 = arith.constant 0 : i32
    return %arg0, %arg1 : i32, i32
  }
}

module attributes {stable_mosaic.version = 11 : i64} {
  func.func @_fused_linear_kernel(%arg0: i32, %arg1: i32, %arg2: memref<16x128xf32, #tpu.memory_space<vmem>>, %arg3: memref<128x512xf32, #tpu.memory_space<vmem>>, %arg4: memref<1x512xf32, #tpu.memory_space<vmem>>, %arg5: memref<1x128xf32, #tpu.memory_space<vmem>>, %arg6: memref<1x128xf32, #tpu.memory_space<vmem>>, %arg7: memref<16x512xf32, #tpu.memory_space<vmem>>) attributes {dimension_semantics = [#tpu.dimension_semantics<parallel>, #tpu.dimension_semantics<parallel>], iteration_bounds = array<i64: 1, 4>, scalar_prefetch = 0 : i64, scratch_operands = 0 : i64, tpu.core_type = #tpu.core_type<tc>, window_params = [{transform_indices = @transform_0, window_bounds = array<i64: 16, 128>}, {transform_indices = @transform_1, window_bounds = array<i64: 128, 512>}, {transform_indices = @transform_2, window_bounds = array<i64: 1, 512>}, {pipeline_mode = #tpu.pipeline_mode<synchronous>, transform_indices = @transform_3, window_bounds = array<i64: 1, 128>}, {pipeline_mode = #tpu.pipeline_mode<synchronous>, transform_indices = @transform_4, window_bounds = array<i64: 1, 128>}, {transform_indices = @transform_5, window_bounds = array<i64: 16, 512>}]} {
    %c0 = arith.constant 0 : index
    %c0_0 = arith.constant 0 : index
    %0 = vector.load %arg2[%c0, %c0_0] : memref<16x128xf32, #tpu.memory_space<vmem>>, vector<16x128xf32>
    %cst = arith.constant dense<0.000000e+00> : vector<16xf32>
    %1 = vector.multi_reduction <add>, %0, %cst [1] : vector<16x128xf32> to vector<16xf32>
    %2 = vector.shape_cast %1 : vector<16xf32> to vector<16x1xf32>
    %cst_1 = arith.constant 1.280000e+02 : f32
    %3 = vector.broadcast %cst_1 : f32 to vector<16x1xf32>
    %4 = arith.divf %2, %3 : vector<16x1xf32>
    %5 = vector.broadcast %4 : vector<16x1xf32> to vector<16x128xf32>
    %6 = arith.subf %0, %5 : vector<16x128xf32>
    %7 = arith.mulf %6, %6 : vector<16x128xf32>
    %cst_2 = arith.constant dense<0.000000e+00> : vector<16xf32>
    %8 = vector.multi_reduction <add>, %7, %cst_2 [1] : vector<16x128xf32> to vector<16xf32>
    %9 = vector.shape_cast %8 : vector<16xf32> to vector<16x1xf32>
    %cst_3 = arith.constant 1.280000e+02 : f32
    %10 = vector.broadcast %cst_3 : f32 to vector<16x1xf32>
    %11 = arith.divf %9, %10 : vector<16x1xf32>
    %cst_4 = arith.constant 9.99999974E-6 : f32
    %12 = vector.broadcast %cst_4 : f32 to vector<16x1xf32>
    %13 = arith.addf %11, %12 : vector<16x1xf32>
    %14 = math.rsqrt %13 : vector<16x1xf32>
    %15 = vector.broadcast %14 : vector<16x1xf32> to vector<16x128xf32>
    %16 = arith.mulf %6, %15 : vector<16x128xf32>
    %c0_5 = arith.constant 0 : index
    %c0_6 = arith.constant 0 : index
    %17 = vector.load %arg5[%c0_5, %c0_6] : memref<1x128xf32, #tpu.memory_space<vmem>>, vector<1x128xf32>
    %18 = vector.broadcast %17 : vector<1x128xf32> to vector<16x128xf32>
    %19 = arith.mulf %16, %18 : vector<16x128xf32>
    %c0_7 = arith.constant 0 : index
    %c0_8 = arith.constant 0 : index
    %20 = vector.load %arg6[%c0_7, %c0_8] : memref<1x128xf32, #tpu.memory_space<vmem>>, vector<1x128xf32>
    %21 = vector.broadcast %20 : vector<1x128xf32> to vector<16x128xf32>
    %22 = arith.addf %19, %21 : vector<16x128xf32>
    %23 = arith.truncf %22 : vector<16x128xf32> to vector<16x128xbf16>
    %c0_9 = arith.constant 0 : index
    %c0_10 = arith.constant 0 : index
    %24 = vector.load %arg3[%c0_9, %c0_10] : memref<128x512xf32, #tpu.memory_space<vmem>>, vector<128x512xf32>
    %25 = arith.truncf %24 : vector<128x512xf32> to vector<128x512xbf16>
    %cst_11 = arith.constant dense<0.000000e+00> : vector<16x512xf32>
    %26 = tpu.matmul %23, %25, %cst_11 {dimension_numbers = #tpu.dot_dimension_numbers<[1], [0], [0], [1], [0, 0, 1, 1], [], []>} : vector<16x128xbf16>, vector<128x512xbf16>, vector<16x512xf32> -> vector<16x512xf32>
    %c0_12 = arith.constant 0 : index
    %c0_13 = arith.constant 0 : index
    %27 = vector.load %arg4[%c0_12, %c0_13] : memref<1x512xf32, #tpu.memory_space<vmem>>, vector<1x512xf32>
    %28 = vector.broadcast %27 : vector<1x512xf32> to vector<16x512xf32>
    %29 = arith.addf %26, %28 : vector<16x512xf32>
    %cst_14 = arith.constant 0.000000e+00 : f32
    %30 = vector.broadcast %cst_14 : f32 to vector<16x512xf32>
    %31 = arith.maximumf %29, %30 : vector<16x512xf32>
    %c0_15 = arith.constant 0 : index
    %c0_16 = arith.constant 0 : index
    %32 = vector.load %arg7[%c0_15, %c0_16] : memref<16x512xf32, #tpu.memory_space<vmem>>, vector<16x512xf32>
    tpu.vector_store %arg7[%c0_15, %c0_16], %31 {strides = array<i32>} : memref<16x512xf32, #tpu.memory_space<vmem>>, vector<16x512xf32>,
    return
  }
  func.func @transform_0(%arg0: i32, %arg1: i32) -> (i32, i32) {
    %c0_i32 = arith.constant 0 : i32
    %c0_i32_0 = arith.constant 0 : i32
    return %arg0, %c0_i32 : i32, i32
  }
  func.func @transform_1(%arg0: i32, %arg1: i32) -> (i32, i32) {
    %c0_i32 = arith.constant 0 : i32
    %c0_i32_0 = arith.constant 0 : i32
    return %c0_i32, %arg1 : i32, i32
  }
  func.func @transform_2(%arg0: i32, %arg1: i32) -> (i32, i32) {
    %c0_i32 = arith.constant 0 : i32
    %c0_i32_0 = arith.constant 0 : i32
    return %c0_i32, %arg1 : i32, i32
  }
  func.func @transform_3(%arg0: i32, %arg1: i32) -> (i32, i32) {
    %c0_i32 = arith.constant 0 : i32
    %c0_i32_0 = arith.constant 0 : i32
    %c0_i32_1 = arith.constant 0 : i32
    return %c0_i32, %c0_i32_0 : i32, i32
  }
  func.func @transform_4(%arg0: i32, %arg1: i32) -> (i32, i32) {
    %c0_i32 = arith.constant 0 : i32
    %c0_i32_0 = arith.constant 0 : i32
    %c0_i32_1 = arith.constant 0 : i32
    return %c0_i32, %c0_i32_0 : i32, i32
  }
  func.func @transform_5(%arg0: i32, %arg1: i32) -> (i32, i32) {
    %c0_i32 = arith.constant 0 : i32
    return %arg0, %arg1 : i32, i32
  }
}

module attributes {stable_mosaic.version = 11 : i64} {
  func.func @_fused_linear_kernel(%arg0: i32, %arg1: i32, %arg2: memref<16x128xf32, #tpu.memory_space<vmem>>, %arg3: memref<128x128xf32, #tpu.memory_space<vmem>>, %arg4: memref<1x128xf32, #tpu.memory_space<vmem>>, %arg5: memref<1x128xf32, #tpu.memory_space<vmem>>, %arg6: memref<1x128xf32, #tpu.memory_space<vmem>>, %arg7: memref<16x128xf32, #tpu.memory_space<vmem>>) attributes {dimension_semantics = [#tpu.dimension_semantics<parallel>, #tpu.dimension_semantics<parallel>], iteration_bounds = array<i64: 1, 3>, scalar_prefetch = 0 : i64, scratch_operands = 0 : i64, tpu.core_type = #tpu.core_type<tc>, window_params = [{transform_indices = @transform_0, window_bounds = array<i64: 16, 128>}, {transform_indices = @transform_1, window_bounds = array<i64: 128, 128>}, {transform_indices = @transform_2, window_bounds = array<i64: 1, 128>}, {pipeline_mode = #tpu.pipeline_mode<synchronous>, transform_indices = @transform_3, window_bounds = array<i64: 1, 128>}, {pipeline_mode = #tpu.pipeline_mode<synchronous>, transform_indices = @transform_4, window_bounds = array<i64: 1, 128>}, {transform_indices = @transform_5, window_bounds = array<i64: 16, 128>}]} {
    %c0 = arith.constant 0 : index
    %c0_0 = arith.constant 0 : index
    %0 = vector.load %arg2[%c0, %c0_0] : memref<16x128xf32, #tpu.memory_space<vmem>>, vector<16x128xf32>
    %cst = arith.constant dense<0.000000e+00> : vector<16xf32>
    %1 = vector.multi_reduction <add>, %0, %cst [1] : vector<16x128xf32> to vector<16xf32>
    %2 = vector.shape_cast %1 : vector<16xf32> to vector<16x1xf32>
    %cst_1 = arith.constant 1.280000e+02 : f32
    %3 = vector.broadcast %cst_1 : f32 to vector<16x1xf32>
    %4 = arith.divf %2, %3 : vector<16x1xf32>
    %5 = vector.broadcast %4 : vector<16x1xf32> to vector<16x128xf32>
    %6 = arith.subf %0, %5 : vector<16x128xf32>
    %7 = arith.mulf %6, %6 : vector<16x128xf32>
    %cst_2 = arith.constant dense<0.000000e+00> : vector<16xf32>
    %8 = vector.multi_reduction <add>, %7, %cst_2 [1] : vector<16x128xf32> to vector<16xf32>
    %9 = vector.shape_cast %8 : vector<16xf32> to vector<16x1xf32>
    %cst_3 = arith.constant 1.280000e+02 : f32
    %10 = vector.broadcast %cst_3 : f32 to vector<16x1xf32>
    %11 = arith.divf %9, %10 : vector<16x1xf32>
    %cst_4 = arith.constant 9.99999974E-6 : f32
    %12 = vector.broadcast %cst_4 : f32 to vector<16x1xf32>
    %13 = arith.addf %11, %12 : vector<16x1xf32>
    %14 = math.rsqrt %13 : vector<16x1xf32>
    %15 = vector.broadcast %14 : vector<16x1xf32> to vector<16x128xf32>
    %16 = arith.mulf %6, %15 : vector<16x128xf32>
    %c0_5 = arith.constant 0 : index
    %c0_6 = arith.constant 0 : index
    %17 = vector.load %arg5[%c0_5, %c0_6] : memref<1x128xf32, #tpu.memory_space<vmem>>, vector<1x128xf32>
    %18 = vector.broadcast %17 : vector<1x128xf32> to vector<16x128xf32>
    %19 = arith.mulf %16, %18 : vector<16x128xf32>
    %c0_7 = arith.constant 0 : index
    %c0_8 = arith.constant 0 : index
    %20 = vector.load %arg6[%c0_7, %c0_8] : memref<1x128xf32, #tpu.memory_space<vmem>>, vector<1x128xf32>
    %21 = vector.broadcast %20 : vector<1x128xf32> to vector<16x128xf32>
    %22 = arith.addf %19, %21 : vector<16x128xf32>
    %23 = arith.truncf %22 : vector<16x128xf32> to vector<16x128xbf16>
    %c0_9 = arith.constant 0 : index
    %c0_10 = arith.constant 0 : index
    %24 = vector.load %arg3[%c0_9, %c0_10] : memref<128x128xf32, #tpu.memory_space<vmem>>, vector<128x128xf32>
    %25 = arith.truncf %24 : vector<128x128xf32> to vector<128x128xbf16>
    %cst_11 = arith.constant dense<0.000000e+00> : vector<16x128xf32>
    %26 = tpu.matmul %23, %25, %cst_11 {dimension_numbers = #tpu.dot_dimension_numbers<[1], [0], [0], [1], [0, 0, 1, 1], [], []>} : vector<16x128xbf16>, vector<128x128xbf16>, vector<16x128xf32> -> vector<16x128xf32>
    %c0_12 = arith.constant 0 : index
    %c0_13 = arith.constant 0 : index
    %27 = vector.load %arg4[%c0_12, %c0_13] : memref<1x128xf32, #tpu.memory_space<vmem>>, vector<1x128xf32>
    %28 = vector.broadcast %27 : vector<1x128xf32> to vector<16x128xf32>
    %29 = arith.addf %26, %28 : vector<16x128xf32>
    %c0_14 = arith.constant 0 : index
    %c0_15 = arith.constant 0 : index
    %30 = vector.load %arg7[%c0_14, %c0_15] : memref<16x128xf32, #tpu.memory_space<vmem>>, vector<16x128xf32>
    tpu.vector_store %arg7[%c0_14, %c0_15], %29 {strides = array<i32>} : memref<16x128xf32, #tpu.memory_space<vmem>>, vector<16x128xf32>,
    return
  }
  func.func @transform_0(%arg0: i32, %arg1: i32) -> (i32, i32) {
    %c0_i32 = arith.constant 0 : i32
    %c0_i32_0 = arith.constant 0 : i32
    return %arg0, %c0_i32 : i32, i32
  }
  func.func @transform_1(%arg0: i32, %arg1: i32) -> (i32, i32) {
    %c0_i32 = arith.constant 0 : i32
    %c0_i32_0 = arith.constant 0 : i32
    return %c0_i32, %arg1 : i32, i32
  }
  func.func @transform_2(%arg0: i32, %arg1: i32) -> (i32, i32) {
    %c0_i32 = arith.constant 0 : i32
    %c0_i32_0 = arith.constant 0 : i32
    return %c0_i32, %arg1 : i32, i32
  }
  func.func @transform_3(%arg0: i32, %arg1: i32) -> (i32, i32) {
    %c0_i32 = arith.constant 0 : i32
    %c0_i32_0 = arith.constant 0 : i32
    %c0_i32_1 = arith.constant 0 : i32
    return %c0_i32, %c0_i32_0 : i32, i32
  }
  func.func @transform_4(%arg0: i32, %arg1: i32) -> (i32, i32) {
    %c0_i32 = arith.constant 0 : i32
    %c0_i32_0 = arith.constant 0 : i32
    %c0_i32_1 = arith.constant 0 : i32
    return %c0_i32, %c0_i32_0 : i32, i32
  }
  func.func @transform_5(%arg0: i32, %arg1: i32) -> (i32, i32) {
    %c0_i32 = arith.constant 0 : i32
    return %arg0, %arg1 : i32, i32
  }
}

module attributes {stable_mosaic.version = 11 : i64} {
  func.func @_layernorm_kernel(%arg0: i32, %arg1: memref<16x128xf32, #tpu.memory_space<vmem>>, %arg2: memref<1x128xf32, #tpu.memory_space<vmem>>, %arg3: memref<1x128xf32, #tpu.memory_space<vmem>>, %arg4: memref<16x128xf32, #tpu.memory_space<vmem>>) attributes {dimension_semantics = [#tpu.dimension_semantics<parallel>], iteration_bounds = array<i64: 1>, scalar_prefetch = 0 : i64, scratch_operands = 0 : i64, tpu.core_type = #tpu.core_type<tc>, window_params = [{transform_indices = @transform_0, window_bounds = array<i64: 16, 128>}, {pipeline_mode = #tpu.pipeline_mode<synchronous>, transform_indices = @transform_1, window_bounds = array<i64: 1, 128>}, {pipeline_mode = #tpu.pipeline_mode<synchronous>, transform_indices = @transform_2, window_bounds = array<i64: 1, 128>}, {transform_indices = @transform_3, window_bounds = array<i64: 16, 128>}]} {
    %c0 = arith.constant 0 : index
    %c0_0 = arith.constant 0 : index
    %0 = vector.load %arg1[%c0, %c0_0] : memref<16x128xf32, #tpu.memory_space<vmem>>, vector<16x128xf32>
    %cst = arith.constant dense<0.000000e+00> : vector<16xf32>
    %1 = vector.multi_reduction <add>, %0, %cst [1] : vector<16x128xf32> to vector<16xf32>
    %2 = vector.shape_cast %1 : vector<16xf32> to vector<16x1xf32>
    %cst_1 = arith.constant 1.280000e+02 : f32
    %3 = vector.broadcast %cst_1 : f32 to vector<16x1xf32>
    %4 = arith.divf %2, %3 : vector<16x1xf32>
    %5 = vector.broadcast %4 : vector<16x1xf32> to vector<16x128xf32>
    %6 = arith.subf %0, %5 : vector<16x128xf32>
    %7 = arith.mulf %6, %6 : vector<16x128xf32>
    %cst_2 = arith.constant dense<0.000000e+00> : vector<16xf32>
    %8 = vector.multi_reduction <add>, %7, %cst_2 [1] : vector<16x128xf32> to vector<16xf32>
    %9 = vector.shape_cast %8 : vector<16xf32> to vector<16x1xf32>
    %cst_3 = arith.constant 1.280000e+02 : f32
    %10 = vector.broadcast %cst_3 : f32 to vector<16x1xf32>
    %11 = arith.divf %9, %10 : vector<16x1xf32>
    %cst_4 = arith.constant 9.99999974E-6 : f32
    %12 = vector.broadcast %cst_4 : f32 to vector<16x1xf32>
    %13 = arith.addf %11, %12 : vector<16x1xf32>
    %14 = math.rsqrt %13 : vector<16x1xf32>
    %15 = vector.broadcast %14 : vector<16x1xf32> to vector<16x128xf32>
    %16 = arith.mulf %6, %15 : vector<16x128xf32>
    %c0_5 = arith.constant 0 : index
    %c0_6 = arith.constant 0 : index
    %17 = vector.load %arg2[%c0_5, %c0_6] : memref<1x128xf32, #tpu.memory_space<vmem>>, vector<1x128xf32>
    %18 = vector.broadcast %17 : vector<1x128xf32> to vector<16x128xf32>
    %19 = arith.mulf %16, %18 : vector<16x128xf32>
    %c0_7 = arith.constant 0 : index
    %c0_8 = arith.constant 0 : index
    %20 = vector.load %arg3[%c0_7, %c0_8] : memref<1x128xf32, #tpu.memory_space<vmem>>, vector<1x128xf32>
    %21 = vector.broadcast %20 : vector<1x128xf32> to vector<16x128xf32>
    %22 = arith.addf %19, %21 : vector<16x128xf32>
    %c0_9 = arith.constant 0 : index
    %c0_10 = arith.constant 0 : index
    %23 = vector.load %arg4[%c0_9, %c0_10] : memref<16x128xf32, #tpu.memory_space<vmem>>, vector<16x128xf32>
    tpu.vector_store %arg4[%c0_9, %c0_10], %22 {strides = array<i32>} : memref<16x128xf32, #tpu.memory_space<vmem>>, vector<16x128xf32>,
    return
  }
  func.func @transform_0(%arg0: i32) -> (i32, i32) {
    %c0_i32 = arith.constant 0 : i32
    %c0_i32_0 = arith.constant 0 : i32
    return %arg0, %c0_i32 : i32, i32
  }
  func.func @transform_1(%arg0: i32) -> (i32, i32) {
    %c0_i32 = arith.constant 0 : i32
    %c0_i32_0 = arith.constant 0 : i32
    %c0_i32_1 = arith.constant 0 : i32
    return %c0_i32, %c0_i32_0 : i32, i32
  }
  func.func @transform_2(%arg0: i32) -> (i32, i32) {
    %c0_i32 = arith.constant 0 : i32
    %c0_i32_0 = arith.constant 0 : i32
    %c0_i32_1 = arith.constant 0 : i32
    return %c0_i32, %c0_i32_0 : i32, i32
  }
  func.func @transform_3(%arg0: i32) -> (i32, i32) {
    %c0_i32 = arith.constant 0 : i32
    %c0_i32_0 = arith.constant 0 : i32
    return %arg0, %c0_i32 : i32, i32
  }
}

module attributes {stable_mosaic.version = 11 : i64} {
  func.func @_fused_linear_kernel(%arg0: i32, %arg1: i32, %arg2: memref<16x128xf32, #tpu.memory_space<vmem>>, %arg3: memref<128x512xf32, #tpu.memory_space<vmem>>, %arg4: memref<1x512xf32, #tpu.memory_space<vmem>>, %arg5: memref<1x128xf32, #tpu.memory_space<vmem>>, %arg6: memref<1x128xf32, #tpu.memory_space<vmem>>, %arg7: memref<16x512xf32, #tpu.memory_space<vmem>>) attributes {dimension_semantics = [#tpu.dimension_semantics<parallel>, #tpu.dimension_semantics<parallel>], iteration_bounds = array<i64: 1, 4>, scalar_prefetch = 0 : i64, scratch_operands = 0 : i64, tpu.core_type = #tpu.core_type<tc>, window_params = [{transform_indices = @transform_0, window_bounds = array<i64: 16, 128>}, {transform_indices = @transform_1, window_bounds = array<i64: 128, 512>}, {transform_indices = @transform_2, window_bounds = array<i64: 1, 512>}, {pipeline_mode = #tpu.pipeline_mode<synchronous>, transform_indices = @transform_3, window_bounds = array<i64: 1, 128>}, {pipeline_mode = #tpu.pipeline_mode<synchronous>, transform_indices = @transform_4, window_bounds = array<i64: 1, 128>}, {transform_indices = @transform_5, window_bounds = array<i64: 16, 512>}]} {
    %c0 = arith.constant 0 : index
    %c0_0 = arith.constant 0 : index
    %0 = vector.load %arg2[%c0, %c0_0] : memref<16x128xf32, #tpu.memory_space<vmem>>, vector<16x128xf32>
    %cst = arith.constant dense<0.000000e+00> : vector<16xf32>
    %1 = vector.multi_reduction <add>, %0, %cst [1] : vector<16x128xf32> to vector<16xf32>
    %2 = vector.shape_cast %1 : vector<16xf32> to vector<16x1xf32>
    %cst_1 = arith.constant 1.280000e+02 : f32
    %3 = vector.broadcast %cst_1 : f32 to vector<16x1xf32>
    %4 = arith.divf %2, %3 : vector<16x1xf32>
    %5 = vector.broadcast %4 : vector<16x1xf32> to vector<16x128xf32>
    %6 = arith.subf %0, %5 : vector<16x128xf32>
    %7 = arith.mulf %6, %6 : vector<16x128xf32>
    %cst_2 = arith.constant dense<0.000000e+00> : vector<16xf32>
    %8 = vector.multi_reduction <add>, %7, %cst_2 [1] : vector<16x128xf32> to vector<16xf32>
    %9 = vector.shape_cast %8 : vector<16xf32> to vector<16x1xf32>
    %cst_3 = arith.constant 1.280000e+02 : f32
    %10 = vector.broadcast %cst_3 : f32 to vector<16x1xf32>
    %11 = arith.divf %9, %10 : vector<16x1xf32>
    %cst_4 = arith.constant 9.99999974E-6 : f32
    %12 = vector.broadcast %cst_4 : f32 to vector<16x1xf32>
    %13 = arith.addf %11, %12 : vector<16x1xf32>
    %14 = math.rsqrt %13 : vector<16x1xf32>
    %15 = vector.broadcast %14 : vector<16x1xf32> to vector<16x128xf32>
    %16 = arith.mulf %6, %15 : vector<16x128xf32>
    %c0_5 = arith.constant 0 : index
    %c0_6 = arith.constant 0 : index
    %17 = vector.load %arg5[%c0_5, %c0_6] : memref<1x128xf32, #tpu.memory_space<vmem>>, vector<1x128xf32>
    %18 = vector.broadcast %17 : vector<1x128xf32> to vector<16x128xf32>
    %19 = arith.mulf %16, %18 : vector<16x128xf32>
    %c0_7 = arith.constant 0 : index
    %c0_8 = arith.constant 0 : index
    %20 = vector.load %arg6[%c0_7, %c0_8] : memref<1x128xf32, #tpu.memory_space<vmem>>, vector<1x128xf32>
    %21 = vector.broadcast %20 : vector<1x128xf32> to vector<16x128xf32>
    %22 = arith.addf %19, %21 : vector<16x128xf32>
    %23 = arith.truncf %22 : vector<16x128xf32> to vector<16x128xbf16>
    %c0_9 = arith.constant 0 : index
    %c0_10 = arith.constant 0 : index
    %24 = vector.load %arg3[%c0_9, %c0_10] : memref<128x512xf32, #tpu.memory_space<vmem>>, vector<128x512xf32>
    %25 = arith.truncf %24 : vector<128x512xf32> to vector<128x512xbf16>
    %cst_11 = arith.constant dense<0.000000e+00> : vector<16x512xf32>
    %26 = tpu.matmul %23, %25, %cst_11 {dimension_numbers = #tpu.dot_dimension_numbers<[1], [0], [0], [1], [0, 0, 1, 1], [], []>} : vector<16x128xbf16>, vector<128x512xbf16>, vector<16x512xf32> -> vector<16x512xf32>
    %c0_12 = arith.constant 0 : index
    %c0_13 = arith.constant 0 : index
    %27 = vector.load %arg4[%c0_12, %c0_13] : memref<1x512xf32, #tpu.memory_space<vmem>>, vector<1x512xf32>
    %28 = vector.broadcast %27 : vector<1x512xf32> to vector<16x512xf32>
    %29 = arith.addf %26, %28 : vector<16x512xf32>
    %cst_14 = arith.constant 0.000000e+00 : f32
    %30 = vector.broadcast %cst_14 : f32 to vector<16x512xf32>
    %31 = arith.maximumf %29, %30 : vector<16x512xf32>
    %c0_15 = arith.constant 0 : index
    %c0_16 = arith.constant 0 : index
    %32 = vector.load %arg7[%c0_15, %c0_16] : memref<16x512xf32, #tpu.memory_space<vmem>>, vector<16x512xf32>
    tpu.vector_store %arg7[%c0_15, %c0_16], %31 {strides = array<i32>} : memref<16x512xf32, #tpu.memory_space<vmem>>, vector<16x512xf32>,
    return
  }
  func.func @transform_0(%arg0: i32, %arg1: i32) -> (i32, i32) {
    %c0_i32 = arith.constant 0 : i32
    %c0_i32_0 = arith.constant 0 : i32
    return %arg0, %c0_i32 : i32, i32
  }
  func.func @transform_1(%arg0: i32, %arg1: i32) -> (i32, i32) {
    %c0_i32 = arith.constant 0 : i32
    %c0_i32_0 = arith.constant 0 : i32
    return %c0_i32, %arg1 : i32, i32
  }
  func.func @transform_2(%arg0: i32, %arg1: i32) -> (i32, i32) {
    %c0_i32 = arith.constant 0 : i32
    %c0_i32_0 = arith.constant 0 : i32
    return %c0_i32, %arg1 : i32, i32
  }
  func.func @transform_3(%arg0: i32, %arg1: i32) -> (i32, i32) {
    %c0_i32 = arith.constant 0 : i32
    %c0_i32_0 = arith.constant 0 : i32
    %c0_i32_1 = arith.constant 0 : i32
    return %c0_i32, %c0_i32_0 : i32, i32
  }
  func.func @transform_4(%arg0: i32, %arg1: i32) -> (i32, i32) {
    %c0_i32 = arith.constant 0 : i32
    %c0_i32_0 = arith.constant 0 : i32
    %c0_i32_1 = arith.constant 0 : i32
    return %c0_i32, %c0_i32_0 : i32, i32
  }
  func.func @transform_5(%arg0: i32, %arg1: i32) -> (i32, i32) {
    %c0_i32 = arith.constant 0 : i32
    return %arg0, %arg1 : i32, i32
  }
}

</mosaic_0001>

<bundles_post_ra>
// kernel: encoder_forward.12
= control target key start
LH: loop header
LB: loop body
LE: loop exit
PB: predicated region body
PF: predicated region fallthrough
CT: control target
= control target key end

     0   :  { %s716_s15 = smov [#allocation5]   ;;  %s854_s0 = inlined_call_operand.vmem [shape: s32[16], index: 0, kind: input, shape index: {}]   ;;  %s855_s1 = inlined_call_operand.hbm [shape: f32[32,128], index: 1, kind: input, shape index: {}]   ;;  %s856_s2 = inlined_call_operand.hbm [shape: f32[64,128], index: 2, kind: input, shape index: {}]   ;;  %s857_s3 = inlined_call_operand.vmem [shape: f32[16,128], index: 3, kind: output, shape index: {}]  }
   0x1   :  { %s9_s14 = sshll.u32 %s854_s0, 4  ;;  %s10_s14 = int_to_ptr.vmem [resolvable:$true] %s9_s14 }
   0x2   :  { %12 = dma.vmem_to_smem %s10_s14, 16, %s716_s15, [#allocation4] }
   0x3   :  { %690 = dma.done.wait [#allocation4], 16 }
   0x4   :  { %691 = vsyncadd [#allocation4], 4294967280 }
   0x5   :  { %15 = sfence }
   0x6   :  { %16 = vsyncpa [#allocation7], 0  ;;  %s749_s16 = smov 0  }
   0x7 LB: > { %s406_s17 = sadd.s32 4294967295, %s714_s16   ;;  %p408_p0 = scmp.ge.s32.totalorder %s714_s16, 1  ;;  %s714_s16 = sphi %s749_s16, %s22_s16  }
   0x8   : > { %p74_p1 = scmp.lt.s32.totalorder %s714_s16, 3  ;;  %s86_s19 = sshll.u32 %s855_s1, 4  ;;  %s87_s19 = int_to_ptr.hbm [resolvable:$true] %s86_s19 }
   0x9   : > { %p432_p3 = scmp.eq.s32.totalorder %s406_s17, 0  ;;  %s717_s20 = smov [#allocation6]  }
   0xa   : > { %p75_p2 = pnand %p408_p0, %p74_p1  ;;  %s88_s21 = sshll.u32 %s717_s20, 4  ;;  %s89_s21 = int_to_ptr.vmem [resolvable:$true] %s88_s21 }
   0xc   : > { %p428_p4 = pneg %p75_p2  ;;  %101 = sbr.rel (%p75_p2) target bundleno = 145 (0x91), region = 24 }
   0xe   : > { %p429_p5 = pnand %p432_p3, %p428_p4 }
  0x10   : > { %431 = dma.hbm_to_vmem [thread:$0]  (!%p429_p5), %s87_s19, 128, %s89_s21, [#allocation7]  }
  0x11   : > { %693 = dma.done.wait (%p432_p3), [#allocation7], 128  }
  0x12   : > { %695 = vsyncadd (%p432_p3), [#allocation7], 4294967168  ;;  %p116_p6 = scmp.lt.s32.totalorder %s406_s17, 1  ;;  %s760_s22 = sshll.u32 %s406_s17, 3 }
  0x13   : > { %s121_s23 = sld [smem:[#allocation5 + %s760_s22]]  ;;  %s718_s24 = smov [#allocation2]  }
  0x14   : > { %s859_s17 = smov (!%p116_p6, %s406_s17), 1  ;;  %s132_s25 = sshll.u32 %s718_s24, 4  ;;  %s133_s25 = int_to_ptr.vmem [resolvable:$true] %s132_s25 }
  0x15   : > { %s136_s26 = sadd.s32 1, %s760_s22  ;;  %s412_s27 = sshll.u32 %s859_s17, 3 }
  0x16   : > { %s767_s30 = scalar_lea.vmem %s857_s3, %s412_s27  ;;  %s137_s4 = sld [smem:[#allocation5 + %s136_s26]] }
  0x17   : > { %s154_s5 = sadd.s32 2, %s760_s22  ;;  %s719_s9 = smov [#allocation2 + $0x1]  }
  0x18   : > { %s773_s10 = sshll.u32 %s719_s9, 4  ;;  %s776_s12 = sld [smem:[#allocation5 + %s154_s5]]  ;;  %s151_s10 = int_to_ptr.vmem [resolvable:$true] %s773_s10 }
  0x19   : > { %s122_s8 = scalar_lea.hbm %s856_s2, %s121_s23  ;;  %s781_s0 = scalar_lea.hbm %s856_s2, 64 }
  0x1a   : > { %s130_s11 = sshll.u32 %s122_s8, 4  ;;  %s131_s11 = int_to_ptr.hbm [resolvable:$true] %s130_s11 }
  0x1b   : > { %s494_s13 = sshra.s32 %s131_s11, 4  ;;  %s495_s13 = int_to_ptr.hbm [resolvable:$true] %s494_s13 }
  0x1c   : > { %s496_s14 = scalar_lea.hbm %s495_s13, 1  ;;  %p499_p8 = scmp.lt.s32.totalorder %s495_s13, %s856_s2 }
  0x1d   : > { %p497_p7 = scmp.ne.s32.totalorder %s495_s13, %s496_s14  ;;  %p500_p9 = scmp.lt.s32.totalorder %s781_s0, %s496_s14 }
  0x1f   : > { %p501_p10 = por %p500_p9, %p499_p8 }
  0x21   : > { %p502_p11 = pnand %p501_p10, %p497_p7 }
  0x23   : > { %505 = shalt.err (!%p502_p11)  }
  0x24   : > { %135 = dma.hbm_to_vmem [thread:$0]  %s131_s11, 16, %s133_s25, [#allocation3] }
  0x25   : > { %s138_s23 = scalar_lea.hbm %s856_s2, %s137_s4  ;;  %s720_s26 = smov [#allocation2 + $0x2]  }
  0x26   : > { %s148_s24 = sshll.u32 %s138_s23, 4  ;;  %s168_s27 = sshll.u32 %s720_s26, 4  ;;  %s149_s24 = int_to_ptr.hbm [resolvable:$true] %s148_s24  ;;  %s169_s27 = int_to_ptr.vmem [resolvable:$true] %s168_s27 }
  0x27   : > { %s518_s28 = sshra.s32 %s149_s24, 4  ;;  %s519_s28 = int_to_ptr.hbm [resolvable:$true] %s518_s28 }
  0x28   : > { %s520_s29 = scalar_lea.hbm %s519_s28, 1  ;;  %p523_p13 = scmp.lt.s32.totalorder %s519_s28, %s856_s2 }
  0x29   : > { %p521_p12 = scmp.ne.s32.totalorder %s519_s28, %s520_s29  ;;  %p524_p0 = scmp.lt.s32.totalorder %s781_s0, %s520_s29 }
  0x2b   : > { %p525_p1 = por %p524_p0, %p523_p13 }
  0x2d   : > { %p526_p2 = pnand %p525_p1, %p521_p12 }
  0x2f   : > { %529 = shalt.err (!%p526_p2)  }
  0x30   : > { %153 = dma.hbm_to_vmem [thread:$0]  %s149_s24, 16, %s151_s10, [#allocation3 + $0x1] }
  0x31   : > { %s156_s7 = scalar_lea.hbm %s856_s2, %s776_s12  ;;  %s172_s8 = sadd.s32 3, %s760_s22 }
  0x32   : > { %s166_s9 = sshll.u32 %s156_s7, 4  ;;  %s173_s11 = sld [smem:[#allocation5 + %s172_s8]]  ;;  %s167_s9 = int_to_ptr.hbm [resolvable:$true] %s166_s9 }
  0x33   : > { %s542_s13 = sshra.s32 %s167_s9, 4  ;;  %s543_s13 = int_to_ptr.hbm [resolvable:$true] %s542_s13 }
  0x34   : > { %s544_s14 = scalar_lea.hbm %s543_s13, 1  ;;  %p547_p4 = scmp.lt.s32.totalorder %s543_s13, %s856_s2 }
  0x35   : > { %p545_p3 = scmp.ne.s32.totalorder %s543_s13, %s544_s14  ;;  %p548_p5 = scmp.lt.s32.totalorder %s781_s0, %s544_s14 }
  0x37   : > { %p549_p6 = por %p548_p5, %p547_p4 }
  0x39   : > { %p550_p7 = pnand %p549_p6, %p545_p3 }
  0x3b   : > { %553 = shalt.err (!%p550_p7)  }
  0x3c   : > { %171 = dma.hbm_to_vmem [thread:$0]  %s167_s9, 16, %s169_s27, [#allocation3 + $0x2] }
  0x3d   : > { %s721_s10 = smov [#allocation2 + $0x3]   ;;  %s190_s18 = sadd.s32 4, %s760_s22 }
  0x3e   : > { %s186_s12 = sshll.u32 %s721_s10, 4  ;;  %s191_s19 = sld [smem:[#allocation5 + %s190_s18]]  ;;  %s187_s12 = int_to_ptr.vmem [resolvable:$true] %s186_s12 }
  0x3f   : > { %s208_s20 = sadd.s32 5, %s760_s22  ;;  %s174_s24 = scalar_lea.hbm %s856_s2, %s173_s11 }
  0x40   : > { %s722_s26 = smov [#allocation2 + $0x4]   ;;  %s184_s29 = sshll.u32 %s174_s24, 4  ;;  %s185_s29 = int_to_ptr.hbm [resolvable:$true] %s184_s29 }
  0x41   : > { %s810_s28 = sshll.u32 %s722_s26, 4  ;;  %s813_s27 = sld [smem:[#allocation5 + %s208_s20]]  ;;  %s205_s28 = int_to_ptr.vmem [resolvable:$true] %s810_s28 }
  0x42   : > { %s566_s5 = sshra.s32 %s185_s29, 4  ;;  %s567_s5 = int_to_ptr.hbm [resolvable:$true] %s566_s5 }
  0x43   : > { %s568_s6 = scalar_lea.hbm %s567_s5, 1  ;;  %p571_p9 = scmp.lt.s32.totalorder %s567_s5, %s856_s2 }
  0x44   : > { %p569_p8 = scmp.ne.s32.totalorder %s567_s5, %s568_s6  ;;  %p572_p10 = scmp.lt.s32.totalorder %s781_s0, %s568_s6 }
  0x46   : > { %p573_p11 = por %p572_p10, %p571_p9 }
  0x48   : > { %p574_p12 = pnand %p573_p11, %p569_p8 }
  0x4a   : > { %577 = shalt.err (!%p574_p12)  }
  0x4b   : > { %189 = dma.hbm_to_vmem [thread:$0]  %s185_s29, 16, %s187_s12, [#allocation3 + $0x3] }
  0x4c   : > { %s192_s9 = scalar_lea.hbm %s856_s2, %s191_s19  ;;  %s723_s13 = smov [#allocation2 + $0x5]  }
  0x4d   : > { %s202_s11 = sshll.u32 %s192_s9, 4  ;;  %s222_s14 = sshll.u32 %s723_s13, 4  ;;  %s203_s11 = int_to_ptr.hbm [resolvable:$true] %s202_s11  ;;  %s223_s14 = int_to_ptr.vmem [resolvable:$true] %s222_s14 }
  0x4e   : > { %s590_s15 = sshra.s32 %s203_s11, 4  ;;  %s591_s15 = int_to_ptr.hbm [resolvable:$true] %s590_s15 }
  0x4f   : > { %s592_s17 = scalar_lea.hbm %s591_s15, 1  ;;  %p595_p0 = scmp.lt.s32.totalorder %s591_s15, %s856_s2 }
  0x50   : > { %p593_p13 = scmp.ne.s32.totalorder %s591_s15, %s592_s17  ;;  %p596_p1 = scmp.lt.s32.totalorder %s781_s0, %s592_s17 }
  0x52   : > { %p597_p2 = por %p596_p1, %p595_p0 }
  0x54   : > { %p598_p3 = pnand %p597_p2, %p593_p13 }
  0x56   : > { %601 = shalt.err (!%p598_p3)  }
  0x57   : > { %207 = dma.hbm_to_vmem [thread:$0]  %s203_s11, 16, %s205_s28, [#allocation3 + $0x4] }
  0x58   : > { %s210_s20 = scalar_lea.hbm %s856_s2, %s813_s27  ;;  %s226_s21 = sadd.s32 6, %s760_s22 }
  0x59   : > { %s220_s23 = sshll.u32 %s210_s20, 4  ;;  %s227_s24 = sld [smem:[#allocation5 + %s226_s21]]  ;;  %s221_s23 = int_to_ptr.hbm [resolvable:$true] %s220_s23 }
  0x5a   : > { %s614_s26 = sshra.s32 %s221_s23, 4  ;;  %s615_s26 = int_to_ptr.hbm [resolvable:$true] %s614_s26 }
  0x5b   : > { %s616_s29 = scalar_lea.hbm %s615_s26, 1  ;;  %p619_p5 = scmp.lt.s32.totalorder %s615_s26, %s856_s2 }
  0x5c   : > { %p617_p4 = scmp.ne.s32.totalorder %s615_s26, %s616_s29  ;;  %p620_p6 = scmp.lt.s32.totalorder %s781_s0, %s616_s29 }
  0x5e   : > { %p621_p7 = por %p620_p6, %p619_p5 }
  0x60   : > { %p622_p8 = pnand %p621_p7, %p617_p4 }
  0x62   : > { %625 = shalt.err (!%p622_p8)  }
  0x63   : > { %225 = dma.hbm_to_vmem [thread:$0]  %s221_s23, 16, %s223_s14, [#allocation3 + $0x5] }
  0x64   : > { %s724_s28 = smov [#allocation2 + $0x6]   ;;  %s244_s25 = sadd.s32 7, %s760_s22 }
  0x65   : > { %s240_s27 = sshll.u32 %s724_s28, 4  ;;  %s245_s4 = sld [smem:[#allocation5 + %s244_s25]]  ;;  %s241_s27 = int_to_ptr.vmem [resolvable:$true] %s240_s27 }
  0x66   : > { %s228_s9 = scalar_lea.hbm %s856_s2, %s227_s24  ;;  %s725_s13 = smov [#allocation2 + $0x7]  }
  0x67   : > { %s238_s11 = sshll.u32 %s228_s9, 4  ;;  %s258_s15 = sshll.u32 %s725_s13, 4  ;;  %s239_s11 = int_to_ptr.hbm [resolvable:$true] %s238_s11  ;;  %s259_s15 = int_to_ptr.vmem [resolvable:$true] %s258_s15 }
  0x68   : > { %s638_s17 = sshra.s32 %s239_s11, 4  ;;  %s639_s17 = int_to_ptr.hbm [resolvable:$true] %s638_s17 }
  0x69   : > { %s640_s10 = scalar_lea.hbm %s639_s17, 1  ;;  %p643_p10 = scmp.lt.s32.totalorder %s639_s17, %s856_s2 }
  0x6a   : > { %p641_p9 = scmp.ne.s32.totalorder %s639_s17, %s640_s10  ;;  %p644_p11 = scmp.lt.s32.totalorder %s781_s0, %s640_s10 }
  0x6c   : > { %p645_p12 = por %p644_p11, %p643_p10 }
  0x6e   : > { %p646_p13 = pnand %p645_p12, %p641_p9 }
  0x70   : > { %649 = shalt.err (!%p646_p13)  }
  0x71   : > { %243 = dma.hbm_to_vmem [thread:$0]  %s239_s11, 16, %s241_s27, [#allocation3 + $0x6] }
  0x72   : > { %s246_s19 = scalar_lea.hbm %s856_s2, %s245_s4 }
  0x73   : > { %s256_s20 = sshll.u32 %s246_s19, 4  ;;  %s257_s20 = int_to_ptr.hbm [resolvable:$true] %s256_s20 }
  0x74   : > { %s662_s21 = sshra.s32 %s257_s20, 4  ;;  %s663_s21 = int_to_ptr.hbm [resolvable:$true] %s662_s21 }
  0x75   : > { %s664_s23 = scalar_lea.hbm %s663_s21, 1  ;;  %p667_p1 = scmp.lt.s32.totalorder %s663_s21, %s856_s2 }
  0x76   : > { %p665_p0 = scmp.ne.s32.totalorder %s663_s21, %s664_s23  ;;  %p668_p2 = scmp.lt.s32.totalorder %s781_s0, %s664_s23 }
  0x78   : > { %p669_p3 = por %p668_p2, %p667_p1 }
  0x7a   : > { %p670_p4 = pnand %p669_p3, %p665_p0 }
  0x7c   : > { %673 = shalt.err (!%p670_p4)  }
  0x7d   : > { %261 = dma.hbm_to_vmem [thread:$0]  %s257_s20, 16, %s259_s15, [#allocation3 + $0x7] }
  0x7e   : > { %696 = dma.done.wait [#allocation3], 16 }
  0x7f   : > { %697 = vsyncadd [#allocation3], 4294967280 }
  0x80   : > { %698 = dma.done.wait [#allocation3 + $0x1], 16 }
  0x81   : > { %699 = vsyncadd [#allocation3 + $0x1], 4294967280 }
  0x82   : > { %700 = dma.done.wait [#allocation3 + $0x2], 16 }
  0x83   : > { %701 = vsyncadd [#allocation3 + $0x2], 4294967280 }
  0x84   : > { %702 = dma.done.wait [#allocation3 + $0x3], 16 }
  0x85   : > { %703 = vsyncadd [#allocation3 + $0x3], 4294967280 }
  0x86   : > { %704 = dma.done.wait [#allocation3 + $0x4], 16 }
  0x87   : > { %705 = vsyncadd [#allocation3 + $0x4], 4294967280 }
  0x88   : > { %706 = dma.done.wait [#allocation3 + $0x5], 16 }
  0x89   : > { %707 = vsyncadd [#allocation3 + $0x5], 4294967280 }
  0x8a   : > { %708 = dma.done.wait [#allocation3 + $0x6], 16 }
  0x8b   : > { %709 = vsyncadd [#allocation3 + $0x6], 4294967280 }
  0x8c   : > { %710 = dma.done.wait [#allocation3 + $0x7], 16 }
  0x8d   : > { %711 = vsyncadd [#allocation3 + $0x7], 4294967280  ;;  %v286_v0 = vld [vmem:[#allocation2] sm:$0xff]  ;;  %v287_v1 = vld [vmem:[#allocation6] sm:$0xff] }
  0x8e   : > { %v288_v2 = vadd.f32 %v287_v1, %v286_v0 }
  0x90   : > { %289 = vst [vmem:[%s767_s30] sm:$0xff] %v288_v2 }
  0x91 PF: > { %s22_s16 = sadd.s32 1, %s714_s16  }
  0x92   : > { %p19_p5 = scmp.ge.s32.totalorder %s22_s16, 4  }
  0x94   :  { %21 = sbr.rel (!%p19_p5) target bundleno = 7 (0x7), region = 117 }
  0x99   :  { %309 = vsyncpa [#allocation7], 1 }
  0x9a   :  { %311 = vsyncpa [#allocation7 + $0x1], 1 }
  0x9b   :  { %312 = vsyncmov [#allocation3] }
  0x9e   :  { %s313_s0 = vpop.sfrf %312 }
  0x9f   :  { %p416_p6 = scmp.ne.s32.totalorder %s313_s0, 0 }
  0xa1   :  { %317 = shalt.err (%p416_p6)  }
  0xa2   :  { %319 = vsyncmov [#allocation3 + $0x1] }
  0xa5   :  { %s320_s29 = vpop.sfrf %319 }
  0xa6   :  { %p417_p7 = scmp.ne.s32.totalorder %s320_s29, 0 }
  0xa8   :  { %324 = shalt.err (%p417_p7)  }
  0xa9   :  { %326 = vsyncmov [#allocation3 + $0x2] }
  0xac   :  { %s327_s5 = vpop.sfrf %326 }
  0xad   :  { %p418_p8 = scmp.ne.s32.totalorder %s327_s5, 0 }
  0xaf   :  { %331 = shalt.err (%p418_p8)  }
  0xb0   :  { %333 = vsyncmov [#allocation3 + $0x3] }
  0xb3   :  { %s334_s30 = vpop.sfrf %333 }
  0xb4   :  { %p419_p9 = scmp.ne.s32.totalorder %s334_s30, 0 }
  0xb6   :  { %338 = shalt.err (%p419_p9)  }
  0xb7   :  { %340 = vsyncmov [#allocation3 + $0x4] }
  0xba   :  { %s341_s16 = vpop.sfrf %340 }
  0xbb   :  { %p420_p10 = scmp.ne.s32.totalorder %s341_s16, 0 }
  0xbd   :  { %345 = shalt.err (%p420_p10)  }
  0xbe   :  { %347 = vsyncmov [#allocation3 + $0x5] }
  0xc1   :  { %s348_s1 = vpop.sfrf %347 }
  0xc2   :  { %p421_p11 = scmp.ne.s32.totalorder %s348_s1, 0 }
  0xc4   :  { %352 = shalt.err (%p421_p11)  }
  0xc5   :  { %354 = vsyncmov [#allocation3 + $0x6] }
  0xc8   :  { %s355_s2 = vpop.sfrf %354 }
  0xc9   :  { %p422_p12 = scmp.ne.s32.totalorder %s355_s2, 0 }
  0xcb   :  { %359 = shalt.err (%p422_p12)  }
  0xcc   :  { %361 = vsyncmov [#allocation3 + $0x7] }
  0xcf   :  { %s362_s3 = vpop.sfrf %361 }
  0xd0   :  { %p423_p13 = scmp.ne.s32.totalorder %s362_s3, 0 }
  0xd2   :  { %366 = shalt.err (%p423_p13)  }

// kernel: encoder_forward.15
= control target key start
LH: loop header
LB: loop body
LE: loop exit
PB: predicated region body
PF: predicated region fallthrough
CT: control target
= control target key end

     0   :  { %s167_s1 = inlined_call_operand.vmem [shape: f32[128,128], index: 1, kind: input, shape index: {}]   ;;  %s168_s2 = inlined_call_operand.vmem [shape: f32[1,128], index: 2, kind: input, shape index: {}]   ;;  %s169_s0 = inlined_call_operand.vmem [shape: f32[16,128], index: 0, kind: input, shape index: {}]   ;;  %s170_s3 = inlined_call_operand.vmem [shape: f32[16,128], index: 3, kind: input, shape index: {}]   ;;  %s171_s4 = inlined_call_operand.vmem [shape: f32[16,128], index: 4, kind: output, shape index: {}]  }
   0x1   :  { %v34_v0 = vld [vmem:[%s167_s1 + $0x70] sm:$0xff]  ;;  %v35_v1 = vld [vmem:[%s167_s1 + $0x78] sm:$0xff]  ;;  %v32_v2 = vld [vmem:[%s167_s1 + $0x60] sm:$0xff] }
   0x2   :  { %v43_v3 = vpack.c.bf16 %v35_v1, %v34_v0  ;;  %v33_v4 = vld [vmem:[%s167_s1 + $0x68] sm:$0xff]  ;;  %v30_v6 = vld [vmem:[%s167_s1 + $0x50] sm:$0xff]  ;;  %v31_v7 = vld [vmem:[%s167_s1 + $0x58] sm:$0xff] }
   0x3   :  { %v42_v5 = vpack.c.bf16 %v33_v4, %v32_v2  ;;  %v41_v8 = vpack.c.bf16 %v31_v7, %v30_v6  ;;  %v28_v9 = vld [vmem:[%s167_s1 + $0x40] sm:$0xff]  ;;  %v29_v10 = vld [vmem:[%s167_s1 + $0x48] sm:$0xff]  ;;  %v26_v12 = vld [vmem:[%s167_s1 + $0x30] sm:$0xff] }
   0x4   :  { %48 = vmatpush.bf16.msra.mxu0 %v43_v3  ;;  %v40_v11 = vpack.c.bf16 %v29_v10, %v28_v9  ;;  %v27_v13 = vld [vmem:[%s167_s1 + $0x38] sm:$0xff]  ;;  %v24_v15 = vld [vmem:[%s167_s1 + $0x20] sm:$0xff]  ;;  %v25_v16 = vld [vmem:[%s167_s1 + $0x28] sm:$0xff] }
   0x5   :  { %v39_v14 = vpack.c.bf16 %v27_v13, %v26_v12  ;;  %v38_v17 = vpack.c.bf16 %v25_v16, %v24_v15  ;;  %v22_v18 = vld [vmem:[%s167_s1 + $0x10] sm:$0xff]  ;;  %v23_v19 = vld [vmem:[%s167_s1 + $0x18] sm:$0xff]  ;;  %v20_v21 = vld [vmem:[%s167_s1] sm:$0xff] }
   0x6   :  { %v37_v20 = vpack.c.bf16 %v23_v19, %v22_v18  ;;  %v21_v22 = vld [vmem:[%s167_s1 + $0x8] sm:$0xff]  ;;  %v17_v24 = vld [vmem:[%s169_s0] sm:$0xff] }
   0x7   :  { %v36_v23 = vpack.c.bf16 %v21_v22, %v20_v21  ;;  %v18_v25 = vld [vmem:[%s169_s0 + $0x8] sm:$0xff]  ;;  %v72_v27 = vld [vmem:[%s168_s2] ss:$0 sm:$0xff] }
   0x8   :  { %49 = vmatpush.bf16.msra.mxu0 %v42_v5  ;;  %v19_v26 = vpack.c.bf16 %v18_v25, %v17_v24  ;;  %v62_v29 = vld [vmem:[%s170_s3] sm:$0xff]  ;;  %v63_v33 = vld [vmem:[%s170_s3 + $0x8] sm:$0xff] }
   0xc   :  { %50 = vmatpush.bf16.msra.mxu0 %v41_v8 }
  0x10   :  { %51 = vmatpush.bf16.msra.mxu0 %v40_v11 }
  0x14   :  { %52 = vmatpush.bf16.msra.mxu0 %v39_v14 }
  0x18   :  { %53 = vmatpush.bf16.msra.mxu0 %v38_v17 }
  0x1c   :  { %54 = vmatpush.bf16.msra.mxu0 %v37_v20 }
  0x20   :  { %55 = vmatpush.bf16.msra.mxu0 %v36_v23 }
  0x23   :  { %56 = vmatmul.bf16.vlgmr.msra.gmra.mxu0 %v19_v26 }
  0xa0   :  { %v57_v28 = vpop.f32.mrf.mxu0 }
  0xa1   :  { %v58_v30 = vadd.f32 %v72_v27, %v57_v28 }
  0xa3   :  { %v64_v31 = vadd.f32 %v62_v29, %v58_v30 }
  0xa5   :  { %66 = vst [vmem:[%s171_s4] sm:$0xff] %v64_v31 }
  0xa8   :  { %v59_v32 = vpop.f32.mrf.mxu0 }
  0xa9   :  { %v60_v34 = vadd.f32 %v72_v27, %v59_v32 }
  0xab   :  { %v65_v35 = vadd.f32 %v63_v33, %v60_v34 }
  0xad   :  { %67 = vst [vmem:[%s171_s4 + $0x8] sm:$0xff] %v65_v35 }

// kernel: encoder_forward.13
= control target key start
LH: loop header
LB: loop body
LE: loop exit
PB: predicated region body
PF: predicated region fallthrough
CT: control target
= control target key end

     0   :  { %10 = vsyncpa [#allocation3], 0  ;;  %s891_s0 = inlined_call_operand.vmem [shape: f32[16,128], index: 0, kind: input, shape index: {}]   ;;  %s892_s1 = inlined_call_operand.hbm [shape: f32[128,384], index: 1, kind: input, shape index: {}]   ;;  %s893_s2 = inlined_call_operand.vmem [shape: f32[1,384], index: 2, kind: input, shape index: {}]   ;;  %s894_s3 = inlined_call_operand.vmem [shape: f32[1,128], index: 3, kind: input, shape index: {}]   ;;  %s895_s4 = inlined_call_operand.vmem [shape: f32[1,128], index: 4, kind: input, shape index: {}]   ;;  %s896_s5 = inlined_call_operand.vmem [shape: f32[16,384], index: 5, kind: output, shape index: {}]  }
   0x1   :  { %12 = vsyncpa [#allocation3 + $0x1], 0  ;;  %s740_s18 = smov 0   ;;  %s742_s19 = smov 0  }
   0x2   :  { %s744_s20 = smov 0   ;;  %s746_s21 = smov 0  }
   0x3   :  { %s748_s22 = smov 0   ;;  %s750_s23 = smov 0  }
   0x4 LB: > { %s542_s24 = sadd.s32 4294967295, %s704_s23   ;;  %s27_s25 = sadd.s32 1, %s700_s22  ;;  %s704_s23 = sphi %s750_s23, %s18_s23   ;;  %s700_s22 = sphi %s748_s22, %s904_s22   ;;  %s696_s21 = sphi %s746_s21, %s903_s21   ;;  %s692_s20 = sphi %s744_s20, %s902_s20   ;;  %s688_s19 = sphi %s742_s19, %s901_s19   ;;  %s684_s18 = sphi %s740_s18, %s900_s18  }
   0x5   : > { %p28_p0 = scmp.ge.s32.totalorder %s27_s25, 3  ;;  %s63_s26 = sadd.s32 1, %s692_s20 }
   0x6   : > { %p70_p1 = scmp.ne.s32.totalorder %s692_s20, %s688_s19  ;;  %p71_p2 = scmp.eq.s32.totalorder %s704_s23, 0 }
   0x7   : > { %s906_s25 = smov (%p28_p0, %s27_s25), 0  ;;  %p76_p4 = scmp.ne.s32.totalorder %s688_s19, %s684_s18 }
   0x8   : > { %p776_p3 = por %p71_p2, %p70_p1  ;;  %s60_s28 = ssub.s32 %s700_s22, %s906_s25 }
   0x9   : > { %p77_p5 = scmp.eq.s32.totalorder %s542_s24, 0  ;;  %p61_p6 = scmp.eq.s32.totalorder %s60_s28, 0 }
   0xa   : > { %p170_p7 = scmp.eq.s32.totalorder %s542_s24, 2  ;;  %p562_p10 = scmp.lt.s32.totalorder %s704_s23, 3 }
   0xb   : > { %p783_p8 = por %p77_p5, %p76_p4  ;;  %s211_s7 = sand.u32 1, %s692_s20  }
   0xc   : > { %s788_s30 = scalar_select %p61_p6, %s692_s20, %s63_s26  }
   0xd   : > { %p790_p9 = por %p170_p7, %p70_p1  ;;  %s548_s8 = sshll.u32 %s700_s22, 3 }
   0xe   : > { %s547_s9 = sshll.u32 %s211_s7, 7  ;;  %s219_s12 = scalar_lea.hbm %s892_s1, %s548_s8 }
   0xf   : > { %s220_s13 = sshll.u32 %s219_s12, 4  ;;  %s215_s14 = scalar_lea.vmem [#allocation2], %s547_s9  ;;  %s221_s13 = int_to_ptr.hbm [resolvable:$true] %s220_s13 }
  0x10   : > { %s222_s15 = sshll.u32 %s215_s14, 4  ;;  %p559_p11 = pnand %p562_p10, %p776_p3  ;;  %s223_s15 = int_to_ptr.vmem [resolvable:$true] %s222_s15 }
  0x11   : > { %p549_p12 = scmp.ge.s32.totalorder %s704_s23, 1  ;;  %s212_s16 = scalar_lea.sflag [#allocation3], %s211_s7 }
  0x12   : > { %s706_s17 = smov 384   ;;  %s707_s18 = smov 128  }
  0x13   : > { %s708_s24 = smov 8   ;;  %p236_p13 = scmp.lt.s32.totalorder %s704_s23, 4 }
  0x14   : > { %561 = dma.hbm_to_vmem [thread:$0]  (!%p559_p11), %s221_s13, 2048, %s223_s15, %s212_s16, %s706_s17, %s707_s18, %s708_s24  }
  0x15   : > { %p237_p0 = pnand %p549_p12, %p236_p13 }
  0x16   : > { %s805_s26 = sand.u32 (!%p237_p0), 1, %s688_s19  }
  0x17   : > { %240 = sbr.rel (%p237_p0) target bundleno = 451 (0x1c3), region = 40  ;;  %s550_s28 = sshll.u32 (!%p237_p0), %s805_s26, 7 }
  0x18   : > { %s243_s8 = scalar_lea.sflag (!%p237_p0), [#allocation3], %s805_s26  ;;  %s809_s9 = scalar_lea.vmem (!%p237_p0), [#allocation2], %s550_s28 }
  0x1c   : > { %679 = dma.done.wait (%p783_p8), %s243_s8, 2048  }
  0x1d   : > { %681 = vsyncadd (%p783_p8), %s243_s8, 4294965248  ;;  %v291_v0 = vld [vmem:[%s891_s0] sm:$0xff]  ;;  %v292_v1 = vld [vmem:[%s891_s0 + $0x8] sm:$0xff]  ;;  %v709_v2 = vmov 128.0   ;;  %p287_p1 = scmp.lt.s32.totalorder %s696_s21, 2  ;;  %s551_s24 = sshll.u32 %s805_s26, 4 }
  0x1e   : > { %293 = vadd.xlane.f32.xlu0 %v291_v0  ;;  %618 = vrcp.f32 %v709_v2  ;;  %v367_v17 = vld [vmem:[%s809_s9 + $0x70] sm:$0xff]  ;;  %v368_v18 = vld [vmem:[%s809_s9 + $0x78] sm:$0xff]  ;;  %v365_v20 = vld [vmem:[%s809_s9 + $0x60] sm:$0xff]  ;;  %s553_s27 = sshll.u32 (%p790_p9), %s696_s21, 3 }
  0x1f   : > { %s831_s29 = scalar_select %p287_p1, %s696_s21, 2  ;;  %v376_v19 = vpack.c.bf16 %v368_v18, %v367_v17  ;;  %v366_v21 = vld [vmem:[%s809_s9 + $0x68] sm:$0xff]  ;;  %v363_v23 = vld [vmem:[%s809_s9 + $0x50] sm:$0xff]  ;;  %v364_v24 = vld [vmem:[%s809_s9 + $0x58] sm:$0xff] }
  0x20   : > { %v375_v22 = vpack.c.bf16 %v366_v21, %v365_v20  ;;  %v374_v25 = vpack.c.bf16 %v364_v24, %v363_v23  ;;  %v361_v26 = vld [vmem:[%s809_s9 + $0x40] sm:$0xff]  ;;  %v362_v27 = vld [vmem:[%s809_s9 + $0x48] sm:$0xff]  ;;  %v359_v29 = vld [vmem:[%s809_s9 + $0x30] sm:$0xff]  ;;  %s408_s10 = scalar_lea.vmem (%p790_p9), %s896_s5, %s553_s27 }
  0x21   : > { %s289_s14 = scalar_lea.vmem %s893_s2, %s831_s29  ;;  %381 = vmatpush.bf16.msra.mxu0 %v376_v19  ;;  %v373_v28 = vpack.c.bf16 %v362_v27, %v361_v26  ;;  %v360_v30 = vld [vmem:[%s809_s9 + $0x38] sm:$0xff]  ;;  %v357_v32 = vld [vmem:[%s809_s9 + $0x20] sm:$0xff]  ;;  %v358_v33 = vld [vmem:[%s809_s9 + $0x28] sm:$0xff] }
  0x22   : > { %v372_v31 = vpack.c.bf16 %v360_v30, %v359_v29  ;;  %v371_v34 = vpack.c.bf16 %v358_v33, %v357_v32  ;;  %v355_v35 = vld [vmem:[%s809_s9 + $0x10] sm:$0xff]  ;;  %v356_v36 = vld [vmem:[%s809_s9 + $0x18] sm:$0xff]  ;;  %v353_v38 = vld [vmem:[%s809_s9] sm:$0xff] }
  0x23   : > { %v370_v37 = vpack.c.bf16 %v356_v36, %v355_v35  ;;  %v354_v39 = vld [vmem:[%s809_s9 + $0x8] sm:$0xff]  ;;  %v615_v60 = vld [vmem:[%s894_s3] ss:$0 sm:$0xff]  ;;  %s280_s9 = scalar_lea.vmem [#allocation4], %s551_s24 }
  0x24   : > { %v619_v3 = vpop.eup %618  ;;  %v369_v41 = vpack.c.bf16 %v354_v39, %v353_v38 }
  0x25   : > { %v298_v4 = vmul.f32 128.0, %v619_v3  ;;  %vm302_vm0 = vweird.f32 %v619_v3  ;;  %382 = vmatpush.bf16.msra.mxu0 %v375_v22 }
  0x26   : > { %295 = vadd.xlane.f32.xlu0 %v292_v1 }
  0x27   : > { %v299_v5 = vsub.f32 1.0, %v298_v4 }
  0x29   : > { %v300_v6 = vmul.f32 %v619_v3, %v299_v5  ;;  %383 = vmatpush.bf16.msra.mxu0 %v374_v25 }
  0x2b   : > { %v301_v7 = vadd.f32 %v619_v3, %v300_v6  ;;  %v617_v6 = vld [vmem:[%s289_s14] ss:$0 sm:$0xff] }
  0x2d   : > { %v303_v8 = vsel %vm302_vm0, %v619_v3, %v301_v7  ;;  %384 = vmatpush.bf16.msra.mxu0 %v373_v28 }
  0x31   : > { %385 = vmatpush.bf16.msra.mxu0 %v372_v31 }
  0x35   : > { %386 = vmatpush.bf16.msra.mxu0 %v371_v34 }
  0x39   : > { %387 = vmatpush.bf16.msra.mxu0 %v370_v37 }
  0x3d   : > { %388 = vmatpush.bf16.msra.mxu0 %v369_v41 }
  0x91   : > { %v294_v9 = vpop.xlane.xlu0 %293 }
  0x92   : > { %v304_v10 = vmul.f32 %v303_v8, %v294_v9 }
  0x94   : > { %v821_v11 = vsub.f32 %v291_v0, %v304_v10 }
  0x96   : > { %v308_v12 = vmul.f32 %v821_v11, %v821_v11 }
  0x98   : > { %310 = vadd.xlane.f32.xlu1 %v308_v12 }
  0x99   : > { %v296_v13 = vpop.xlane.xlu0 %295 }
  0x9a   : > { %v305_v14 = vmul.f32 %v303_v8, %v296_v13 }
  0x9c   : > { %v825_v15 = vsub.f32 %v292_v1, %v305_v14  ;;  %v616_v1 = vld [vmem:[%s895_s4] ss:$0 sm:$0xff] }
  0x9e   : > { %v309_v16 = vmul.f32 %v825_v15, %v825_v15 }
  0xa0   : > { %312 = vadd.xlane.f32.xlu1 %v309_v16 }
 0x10b   : > { %v311_v40 = vpop.xlane.xlu1 %310 }
 0x10c   : > { %v314_v42 = vmul.f32 %v311_v40, %v303_v8 }
 0x10e   : > { %v316_v43 = vadd.f32 1e-05, %v314_v42 }
 0x110   : > { %620 = vrsqrt.f32 %v316_v43  ;;  %vm324_vm2 = vweird.f32 %v316_v43 }
 0x113   : > { %v313_v44 = vpop.xlane.xlu1 %312 }
 0x114   : > { %v315_v45 = vmul.f32 %v313_v44, %v303_v8 }
 0x116   : > { %v621_v46 = vpop.eup %620  ;;  %v317_v47 = vadd.f32 1e-05, %v315_v45 }
 0x117   : > { %v319_v48 = vmul.f32 %v621_v46, %v316_v43  ;;  %vm325_vm1 = vweird.f32 %v621_v46 }
 0x118   : > { %622 = vrsqrt.f32 %v317_v47  ;;  %vm326_vm3 = vmor %vm324_vm2, %vm325_vm1  ;;  %vm334_vm5 = vweird.f32 %v317_v47 }
 0x119   : > { %v320_v49 = vmul.f32 %v621_v46, %v319_v48 }
 0x11b   : > { %v321_v50 = vmul.f32 0.5, %v320_v49 }
 0x11d   : > { %v322_v51 = vsub.f32 1.5, %v321_v50 }
 0x11e   : > { %v623_v52 = vpop.eup %622 }
 0x11f   : > { %v323_v53 = vmul.f32 %v621_v46, %v322_v51  ;;  %v329_v54 = vmul.f32 %v623_v52, %v317_v47  ;;  %vm335_vm4 = vweird.f32 %v623_v52 }
 0x120   : > { %vm336_vm6 = vmor %vm334_vm5, %vm335_vm4 }
 0x121   : > { %v330_v55 = vmul.f32 %v623_v52, %v329_v54  ;;  %v327_v57 = vsel %vm326_vm3, %v621_v46, %v323_v53 }
 0x122   : > { %v338_v59 = vmul.f32 %v327_v57, %v821_v11 }
 0x123   : > { %v331_v56 = vmul.f32 0.5, %v330_v55 }
 0x124   : > { %v344_v0 = vmul.f32 %v615_v60, %v338_v59 }
 0x125   : > { %v332_v58 = vsub.f32 1.5, %v331_v56 }
 0x126   : > { %v350_v3 = vadd.f32 %v616_v1, %v344_v0 }
 0x127   : > { %v333_v61 = vmul.f32 %v623_v52, %v332_v58 }
 0x129   : > { %v337_v62 = vsel %vm336_vm6, %v623_v52, %v333_v61 }
 0x12a   : > { %v339_v63 = vmul.f32 %v337_v62, %v825_v15 }
 0x12c   : > { %v345_v2 = vmul.f32 %v615_v60, %v339_v63 }
 0x12e   : > { %v351_v4 = vadd.f32 %v616_v1, %v345_v2 }
 0x130   : > { %v352_v5 = vpack.c.bf16 %v351_v4, %v350_v3 }
 0x132   : > { %389 = vmatmul.bf16.vlgmr.msra.gmra.mxu0 %v352_v5 }
 0x1af   : > { %v390_v7 = vpop.f32.mrf.mxu0 }
 0x1b0   : > { %v391_v8 = vadd.f32 %v617_v6, %v390_v7 }
 0x1b2   : > { %395 = vst [vmem:[%s280_s9] sm:$0xff] %v391_v8 }
 0x1b6   : > { %403 = sbr.rel (!%p790_p9) target bundleno = 451 (0x1c3), region = 48 }
 0x1b7   : > { %v392_v9 = vpop.f32.mrf.mxu0 }
 0x1b8   : > { %v393_v10 = vadd.f32 %v617_v6, %v392_v9 }
 0x1b9   : > { %v439_v11 = vld [vmem:[%s280_s9] sm:$0xff] (%p790_p9) }
 0x1ba   : > { %396 = vst [vmem:[%s280_s9 + $0x8] sm:$0xff] %v393_v10 }
 0x1bb   : > { %440 = vst [vmem:[%s408_s10] sm:$0xff] %v439_v11 }
 0x1c1   : > { %v441_v12 = vld [vmem:[%s280_s9 + $0x8] sm:$0xff] }
 0x1c2   : > { %442 = vst [vmem:[%s408_s10 + $0x18] sm:$0xff] %v441_v12 }
 0x1c3 PF: > { %s18_s23 = sadd.s32 1, %s704_s23   ;;  %s900_s18 = smov %s688_s19 }
 0x1c4   : > { %p15_p2 = scmp.ge.s32.totalorder %s18_s23, 5   ;;  %s901_s19 = smov %s692_s20 }
 0x1c5   : > { %s902_s20 = smov %s788_s30  ;;  %s903_s21 = smov %s700_s22 }
 0x1c6   : > { %s904_s22 = smov %s906_s25  ;;  %17 = sbr.rel (!%p15_p2) target bundleno = 4 (0x4), region = 124 }
 0x1cb   :  { %458 = vsyncpa [#allocation3], 1 }
 0x1cc   :  { %460 = vsyncpa [#allocation3 + $0x1], 1 }

// kernel: encoder_forward.14
= control target key start
LH: loop header
LB: loop body
LE: loop exit
PB: predicated region body
PF: predicated region fallthrough
CT: control target
= control target key end

     0   :  { %s550_s9 = smov 0   ;;  %s632_s0 = inlined_call_operand.vmem [shape: f32[16,384], index: 0, kind: input, shape index: {}]   ;;  %s633_s1 = inlined_call_operand.vmem [shape: s32[2,1,8], index: 1, kind: input, shape index: {}]   ;;  %s634_s2 = inlined_call_operand.vmem [shape: f32[16,128], index: 2, kind: output, shape index: {}]  }
   0x1 LB: > { %s477_s10 = sadd.s32 4294967295, %s529_s9   ;;  %p481_p0 = scmp.ge.s32.totalorder %s529_s9, 1  ;;  %s529_s9 = sphi %s550_s9, %s12_s9  }
   0x2   : > { %p120_p1 = scmp.lt.s32.totalorder %s529_s9, 3 }
   0x4   : > { %p121_p2 = pnand %p481_p0, %p120_p1 }
   0x5   : > { %p144_p3 = scmp.lt.s32.totalorder (!%p121_p2), %s477_s10, 1  ;;  %s531_s15 = smov (!%p121_p2), 64  }
   0x6   : > { %124 = sbr.rel (%p121_p2) target bundleno = 1080 (0x438), region = 28  ;;  %s532_s16 = smov (!%p121_p2), 32  }
   0x7   : > { %s534_s20 = smov (!%p121_p2), 96  }
   0xb   : > { %s638_s10 = smov (!%p144_p3, %s477_s10), 1  ;;  %vm164_vm0 = vcmask 261120   ;;  %v533_v7 = vmov 0   ;;  %vm189_vm3 = vcmask 64512   ;;  %vm206_vm4 = vcmask 1043456  }
   0xc   : > { %s494_s11 = smul.u32 24, %s638_s10  ;;  %s151_s19 = scalar_lea.vmem %s633_s1, %s638_s10  ;;  %vm410_vm5 = vcmask 523264   ;;  %vm412_vm6 = vcmask 785408  }
   0xd   : > { %v160_v6 = vld [vmem:[%s151_s19] sm:$0x1]  ;;  %s483_s21 = sshll.u32 %s638_s10, 3 }
   0xe   : > { %s564_s14 = scalar_lea.vmem %s632_s0, %s494_s11  ;;  %vm184_vm1 = vcmp.eq.s32.totalorder %v160_v6, 0  ;;  %s155_s24 = scalar_lea.vmem %s634_s2, %s483_s21 }
   0xf   : > { %v158_v0 = vld [vmem:[%s564_s14 + $0x8] sm:$0xff]  ;;  %v157_v1 = vld [vmem:[%s564_s14] sm:$0xff]  ;;  %v185_v8 = vsel %vm184_vm1, 1, %v533_v7  ;;  %v159_v25 = vld [vmem:[%s564_s14 + $0x10] sm:$0xff] }
  0x10   : > { %v163_v2 = vpack.c.bf16 %v158_v0, %v158_v0  ;;  %v161_v4 = vmul.f32 0.17677669, %v157_v1  ;;  %v186_v9 = vperm.slane %v185_v8, 0  ;;  %v202_v26 = vpack.c.bf16 %v159_v25, %v159_v25 }
  0x12   : > { %v169_v3 = vsel %vm164_vm0, %v163_v2, 0  ;;  %v162_v5 = vpack.c.bf16 %v161_v4, %v161_v4  ;;  %285 = vrot.lane.b32.xlu2 %v163_v2, %s531_s15  ;;  %vm578_vm2 = vcmp.eq.s32.totalorder %v186_v9, 1  ;;  %v208_v27 = vsel %vm206_vm4, %v202_v26, 0 }
  0x13   : > { %178 = vmatpush.bf16.xpose.msra.mxu0 %v169_v3  ;;  %217 = vmatpush.bf16.msra.mxu1 %v208_v27 }
  0x1a   : > { %484 = vmatmul.msk.bf16.vlgmr.msra.gmra.mxu0 %vm164_vm0, %v162_v5  ;;  %342 = vrot.lane.b32.xlu2 %v163_v2, %s532_s16 }
  0x22   : > { %283 = vrot.lane.b32.xlu2 %v162_v5, %s531_s15 }
  0x2a   : > { %340 = vrot.lane.b32.xlu2 %v162_v5, %s532_s16 }
  0x6c   : > { %v286_v15 = vpop.permute.xlu2 %285 }
  0x6d   : > { %v291_v28 = vsel %vm164_vm0, %v286_v15, 0 }
  0x6e   : > { %300 = vmatpush.bf16.xpose.msrb.mxu1 %v291_v28 }
  0x74   : > { %v343_v16 = vpop.permute.xlu2 %342 }
  0x75   : > { %v348_v21 = vsel %vm164_vm0, %v343_v16, 0 }
  0x76   : > { %357 = vmatpush.bf16.xpose.msrb.mxu0 %v348_v21 }
  0x7c   : > { %v284_v20 = vpop.permute.xlu2 %283 }
  0x84   : > { %v341_v24 = vpop.permute.xlu2 %340 }
  0x85   : > { %490 = vmatmul.msk.bf16.vlgmr.msrb.gmra.mxu0 %vm164_vm0, %v341_v24 }
  0x97   : > { %v180_v11 = vpop.f32.mrf.mxu0 }
  0x98   : > { %v188_v12 = vsel %vm578_vm2, -1e+09, %v180_v11 }
  0x99   : > { %v190_v13 = vsel %vm189_vm3, %v188_v12, -inf }
  0x9a   : > { %191 = vmax.xlane.f32.xlu0 %v190_v13 }
  0x9f   : > { %v182_v14 = vpop.f32.mrf.mxu0 }
  0xae   : > { %227 = vrot.lane.b32.xlu0 %v163_v2, %s534_s20 }
 0x102   : > { %v359_v35 = vpop.f32.mrf.mxu0 }
 0x103   : > { %v363_v36 = vsel %vm578_vm2, -1e+09, %v359_v35 }
 0x104   : > { %v364_v37 = vsel %vm189_vm3, %v363_v36, -inf }
 0x10a   : > { %v361_v38 = vpop.f32.mrf.mxu0 }
 0x10d   : > { %v192_v17 = vpop.xlane.xlu0 %191 }
 0x10e   : > { %v193_v18 = vsub.f32 %v188_v12, %v192_v17 }
 0x110   : > { %v194_v19 = vmul.f32 1.442695, %v193_v18 }
 0x112   : > { %507 = vpow2.f32 %v194_v19 }
 0x118   : > { %v508_v22 = vpop.eup %507 }
 0x119   : > { %v196_v23 = vsel %vm189_vm3, %v508_v22, 0.0 }
 0x11a   : > { %197 = vadd.xlane.f32.xlu1 %v196_v23 }
 0x120   : > { %v228_v29 = vpop.permute.xlu0 %227 }
 0x121   : > { %v233_v30 = vsel %vm164_vm0, %v228_v29, 0 }
 0x122   : > { %242 = vmatpush.bf16.xpose.msra.mxu2 %v233_v30 }
 0x133   : > { %224 = vrot.lane.b32.xlu1 %v162_v5, %s534_s20 }
 0x15d   : > { %365 = vmax.xlane.f32.xlu1 %v364_v37 }
 0x18d   : > { %v198_v31 = vpop.xlane.xlu1 %197 }
 0x18e   : > { %509 = vrcp.f32 %v198_v31 }
 0x194   : > { %v510_v32 = vpop.eup %509 }
 0x195   : > { %v200_v33 = vmul.f32 %v510_v32, %v508_v22 }
 0x197   : > { %v201_v34 = vpack.c.bf16 %v200_v33, %v200_v33 }
 0x199   : > { %485 = vmatmul.msk.bf16.vlgmr.msra.gmra.mxu1 %vm189_vm3, %v201_v34 }
 0x1a5   : > { %v225_v39 = vpop.permute.xlu1 %224 }
 0x1a6   : > { %486 = vmatmul.msk.bf16.vlgmr.msra.gmra.mxu2 %vm164_vm0, %v225_v39 }
 0x1a9   : > { %488 = vmatmul.msk.bf16.vlgmr.msrb.gmra.mxu1 %vm164_vm0, %v284_v20 }
 0x1d0   : > { %v366_v52 = vpop.xlane.xlu1 %365 }
 0x1d1   : > { %v367_v56 = vsub.f32 %v363_v36, %v366_v52 }
 0x1d3   : > { %v368_v58 = vmul.f32 1.442695, %v367_v56 }
 0x216   : > { %v600_v40 = vpop.f32.mrf.mxu1 }
 0x21e   : > { %v221_v41 = vpop.f32.mrf.mxu1 }
 0x226   : > { %v302_v42 = vpop.f32.mrf.mxu1 }
 0x227   : > { %v306_v43 = vsel %vm578_vm2, -1e+09, %v302_v42 }
 0x228   : > { %v307_v44 = vsel %vm189_vm3, %v306_v43, -inf }
 0x229   : > { %308 = vmax.xlane.f32.xlu2 %v307_v44  ;;  %v244_v45 = vpop.f32.mrf.mxu2 }
 0x22a   : > { %v248_v46 = vsel %vm578_vm2, -1e+09, %v244_v45 }
 0x22b   : > { %v249_v47 = vsel %vm189_vm3, %v248_v46, -inf }
 0x22c   : > { %250 = vmax.xlane.f32.xlu0 %v249_v47 }
 0x22e   : > { %v304_v48 = vpop.f32.mrf.mxu1 }
 0x231   : > { %v246_v49 = vpop.f32.mrf.mxu2 }
 0x241   : > { %262 = vrot.lane.b32.xlu2 %v202_v26, %s534_s20 }
 0x29c   : > { %v309_v50 = vpop.xlane.xlu2 %308 }
 0x29d   : > { %v310_v51 = vsub.f32 %v306_v43, %v309_v50 }
 0x29f   : > { %v311_v53 = vmul.f32 1.442695, %v310_v51  ;;  %v251_v54 = vpop.xlane.xlu0 %250 }
 0x2a0   : > { %v252_v55 = vsub.f32 %v248_v46, %v251_v54 }
 0x2a1   : > { %511 = vpow2.f32 %v311_v53 }
 0x2a2   : > { %v253_v57 = vmul.f32 1.442695, %v252_v55 }
 0x2a4   : > { %513 = vpow2.f32 %v253_v57  ;;  %v263_v1 = vpop.permute.xlu2 %262 }
 0x2a5   : > { %515 = vpow2.f32 %v368_v58  ;;  %v268_v2 = vsel %vm206_vm4, %v263_v1, 0 }
 0x2a6   : > { %277 = vmatpush.bf16.msra.mxu3 %v268_v2 }
 0x2a7   : > { %v512_v59 = vpop.eup %511 }
 0x2a8   : > { %v313_v60 = vsel %vm189_vm3, %v512_v59, 0.0 }
 0x2a9   : > { %314 = vadd.xlane.f32.xlu1 %v313_v60 }
 0x2aa   : > { %v514_v61 = vpop.eup %513 }
 0x2ab   : > { %v255_v62 = vsel %vm189_vm3, %v514_v61, 0.0  ;;  %v516_v63 = vpop.eup %515 }
 0x2ac   : > { %256 = vadd.xlane.f32.xlu0 %v255_v62  ;;  %v370_v0 = vsel %vm189_vm3, %v516_v63, 0.0 }
 0x2b4   : > { %371 = vadd.xlane.f32.xlu0 %v370_v0 }
 0x2c2   : > { %319 = vrot.lane.b32.xlu1 %v202_v26, %s531_s15 }
 0x2c8   : > { %376 = vrot.lane.b32.xlu0 %v202_v26, %s532_s16 }
 0x31c   : > { %v315_v6 = vpop.xlane.xlu1 %314 }
 0x31f   : > { %v257_v3 = vpop.xlane.xlu0 %256 }
 0x320   : > { %517 = vrcp.f32 %v257_v3 }
 0x321   : > { %519 = vrcp.f32 %v315_v6 }
 0x326   : > { %v518_v4 = vpop.eup %517 }
 0x327   : > { %v259_v5 = vmul.f32 %v518_v4, %v514_v61  ;;  %v372_v8 = vpop.xlane.xlu0 %371  ;;  %v520_v9 = vpop.eup %519 }
 0x328   : > { %521 = vrcp.f32 %v372_v8  ;;  %v317_v11 = vmul.f32 %v520_v9, %v512_v59 }
 0x329   : > { %v260_v7 = vpack.c.bf16 %v259_v5, %v259_v5 }
 0x32a   : > { %v318_v15 = vpack.c.bf16 %v317_v11, %v317_v11 }
 0x32b   : > { %487 = vmatmul.msk.bf16.vlgmr.msra.gmra.mxu3 %vm189_vm3, %v260_v7 }
 0x32e   : > { %v522_v13 = vpop.eup %521 }
 0x32f   : > { %v374_v14 = vmul.f32 %v522_v13, %v516_v63 }
 0x331   : > { %v375_v18 = vpack.c.bf16 %v374_v14, %v374_v14 }
 0x334   : > { %v320_v10 = vpop.permute.xlu1 %319 }
 0x335   : > { %v325_v12 = vsel %vm206_vm4, %v320_v10, 0 }
 0x336   : > { %334 = vmatpush.bf16.msrb.mxu3 %v325_v12 }
 0x33a   : > { %v377_v16 = vpop.permute.xlu0 %376 }
 0x33b   : > { %489 = vmatmul.msk.bf16.vlgmr.msrb.gmra.mxu3 %vm189_vm3, %v318_v15  ;;  %v382_v17 = vsel %vm206_vm4, %v377_v16, 0 }
 0x33c   : > { %391 = vmatpush.bf16.msrb.mxu2 %v382_v17 }
 0x33f   : > { %491 = vmatmul.msk.bf16.vlgmr.msrb.gmra.mxu2 %vm189_vm3, %v375_v18 }
 0x3ae   : > { %v279_v19 = vpop.f32.mrf.mxu3 }
 0x3af   : > { %398 = vrot.lane.b32.xlu2 %v279_v19, %s532_s16 }
 0x3b6   : > { %v281_v20 = vpop.f32.mrf.mxu3 }
 0x3be   : > { %v336_v21 = vpop.f32.mrf.mxu3 }
 0x3bf   : > { %402 = vrot.lane.b32.xlu2 %v336_v21, %s531_s15 }
 0x3c2   : > { %v393_v22 = vpop.f32.mrf.mxu2 }
 0x3c3   : > { %406 = vrot.lane.b32.xlu0 %v393_v22, %s534_s20 }
 0x3c6   : > { %v338_v23 = vpop.f32.mrf.mxu3 }
 0x3ca   : > { %v395_v24 = vpop.f32.mrf.mxu2 }
 0x409   : > { %v399_v25 = vpop.permute.xlu2 %398 }
 0x40a   : > { %v409_v27 = vsel %vm164_vm0, %v600_v40, %v399_v25 }
 0x419   : > { %v403_v26 = vpop.permute.xlu2 %402 }
 0x41a   : > { %v411_v28 = vsel %vm410_vm5, %v409_v27, %v403_v26 }
 0x435   : > { %v407_v29 = vpop.permute.xlu0 %406 }
 0x436   : > { %v413_v30 = vsel %vm412_vm6, %v411_v28, %v407_v29 }
 0x437   : > { %414 = vst [vmem:[%s155_s24] sm:$0xff] %v413_v30 }
 0x438 PF: > { %s12_s9 = sadd.s32 1, %s529_s9  }
 0x439   : > { %p9_p4 = scmp.ge.s32.totalorder %s12_s9, 4  }
 0x43b   :  { %11 = sbr.rel (!%p9_p4) target bundleno = 1 (0x1), region = 61 }

// kernel: encoder_forward.17
= control target key start
LH: loop header
LB: loop body
LE: loop exit
PB: predicated region body
PF: predicated region fallthrough
CT: control target
= control target key end

     0   :  { %s797_s15 = smov 0   ;;  %s799_s16 = smov 0   ;;  %s955_s0 = inlined_call_operand.vmem [shape: f32[16,2048], index: 0, kind: input, shape index: {}]   ;;  %s956_s1 = inlined_call_operand.vmem [shape: f32[2048,128], index: 1, kind: input, shape index: {}]   ;;  %s957_s2 = inlined_call_operand.vmem [shape: f32[1,128], index: 2, kind: input, shape index: {}]   ;;  %s958_s3 = inlined_call_operand.vmem [shape: f32[16,128], index: 3, kind: input, shape index: {}]   ;;  %s959_s4 = inlined_call_operand.vmem [shape: f32[16,128], index: 4, kind: output, shape index: {}]  }
   0x1   :  { %s801_s17 = smov 0   ;;  %s803_s18 = smov 0  }
   0x2   :  { %s805_s19 = smov 0  }
   0x3 LB: > { %s26_s20 = sadd.s32 1, %s765_s18  ;;  %p49_p1 = scmp.ne.s32.totalorder %s757_s16, %s753_s15  ;;  %s769_s19 = sphi %s805_s19, %s14_s19   ;;  %s765_s18 = sphi %s803_s18, %s963_s18   ;;  %s761_s17 = sphi %s801_s17, %s962_s17   ;;  %s757_s16 = sphi %s799_s16, %s961_s16   ;;  %s753_s15 = sphi %s797_s15, %s960_s15  }
   0x4   : > { %p27_p0 = scmp.ge.s32.totalorder %s26_s20, 4  ;;  %p50_p2 = scmp.eq.s32.totalorder %s769_s19, 0 }
   0x5   : > { %s42_s22 = sadd.s32 1, %s757_s16  ;;  %p674_p5 = scmp.ge.s32.totalorder %s769_s19, 4 }
   0x6   : > { %s965_s20 = smov (%p27_p0, %s26_s20), 0  ;;  %p51_p3 = por %p50_p2, %p49_p1 }
   0x7   : > { %s38_s21 = ssub.s32 %s765_s18, %s965_s20  ;;  %203 = sbr.rel (%p674_p5) target bundleno = 24 (0x18), region = 24 }
   0x8   : > { %p40_p4 = scmp.eq.s32.totalorder %s38_s21, 0 }
   0xa   : > { %s832_s23 = scalar_select %p40_p4, %s757_s16, %s42_s22  }
   0xc   : > { %206 = sbr.rel (!%p51_p3) target bundleno = 24 (0x18), region = 28  ;;  %s208_s24 = sand.u32 (%p51_p3), 1, %s757_s16  }
   0xd   : > { %s688_s25 = sshll.u32 (%p51_p3), %s765_s18, 5  ;;  %s675_s26 = sshll.u32 (%p51_p3), %s208_s24, 6 }
   0xe   : > { %s216_s29 = scalar_lea.vmem (%p51_p3), %s955_s0, %s688_s25  ;;  %s210_s30 = scalar_lea.vmem (%p51_p3), [#allocation3], %s675_s26 }
   0xf   : > { %v229_v0 = vld [vmem:[%s216_s29] sm:$0xff] (%p51_p3)  ;;  %v231_v1 = vld [vmem:[%s216_s29 + $0x8] sm:$0xff] (%p51_p3)  ;;  %v233_v2 = vld [vmem:[%s216_s29 + $0x10] sm:$0xff] (%p51_p3) }
  0x10   : > { %230 = vst [vmem:[%s210_s30] sm:$0xff] (%p51_p3), %v229_v0  ;;  %v235_v3 = vld [vmem:[%s216_s29 + $0x18] sm:$0xff] (%p51_p3)  ;;  %v237_v4 = vld [vmem:[%s216_s29 + $0x80] sm:$0xff] (%p51_p3)  ;;  %v239_v5 = vld [vmem:[%s216_s29 + $0x88] sm:$0xff] (%p51_p3) }
  0x11   : > { %232 = vst [vmem:[%s210_s30 + $0x8] sm:$0xff] %v231_v1  ;;  %v241_v6 = vld [vmem:[%s216_s29 + $0x90] sm:$0xff]  ;;  %v243_v7 = vld [vmem:[%s216_s29 + $0x98] sm:$0xff] }
  0x12   : > { %234 = vst [vmem:[%s210_s30 + $0x10] sm:$0xff] %v233_v2 }
  0x13   : > { %236 = vst [vmem:[%s210_s30 + $0x18] sm:$0xff] %v235_v3 }
  0x14   : > { %238 = vst [vmem:[%s210_s30 + $0x20] sm:$0xff] %v237_v4 }
  0x15   : > { %240 = vst [vmem:[%s210_s30 + $0x28] sm:$0xff] %v239_v5 }
  0x16   : > { %242 = vst [vmem:[%s210_s30 + $0x30] sm:$0xff] %v241_v6 }
  0x17   : > { %244 = vst [vmem:[%s210_s30 + $0x38] sm:$0xff] %v243_v7 }
  0x18 PF: > { %p678_p6 = scmp.ge.s32.totalorder %s769_s19, 1  ;;  %p261_p7 = scmp.lt.s32.totalorder %s769_s19, 5 }
  0x1a   : > { %p262_p8 = pnand %p678_p6, %p261_p7 }
  0x1b   : > { %s268_s5 = sand.u32 (!%p262_p8), 1, %s753_s15   ;;  %s680_s6 = sshll.u32 (!%p262_p8), %s761_s17, 6 }
  0x1c   : > { %265 = sbr.rel (%p262_p8) target bundleno = 236 (0xec), region = 55  ;;  %s679_s7 = sshll.u32 (!%p262_p8), %s268_s5, 6 }
  0x1d   : > { %p318_p9 = scmp.lt.s32.totalorder (!%p262_p8), %s680_s6, 255  ;;  %s849_s12 = scalar_lea.vmem (!%p262_p8), [#allocation3], %s679_s7 }
  0x1e   : > { %p682_p10 = scmp.ne.s32.totalorder (!%p262_p8), %s761_s17, 0 }
  0x21   : > { %s967_s6 = smov (!%p318_p9, %s680_s6), 255  ;;  %350 = sbr.rel (%p682_p10) target bundleno = 41 (0x29), region = 63 }
  0x22   : > { %s681_s8 = sshll.u32 %s967_s6, 3 }
  0x23   : > { %s847_s11 = scalar_lea.vmem %s956_s1, %s681_s8 }
  0x26   : > { %v771_v8 = vmov 0.0  }
  0x27   : > { %351 = vst [vmem:[#allocation2] sm:$0xff] %v771_v8 }
  0x28   : > { %352 = vst [vmem:[#allocation2 + $0x8] sm:$0xff] %v771_v8 }
  0x29 PF: > { %v381_v9 = vld [vmem:[%s847_s11 + $0x70] sm:$0xff]  ;;  %v382_v10 = vld [vmem:[%s847_s11 + $0x78] sm:$0xff]  ;;  %v379_v20 = vld [vmem:[%s847_s11 + $0x60] sm:$0xff]  ;;  %p683_p11 = scmp.ne.s32.totalorder %s761_s17, 3 }
  0x2a   : > { %v397_v11 = vld [vmem:[%s847_s11 + $0xf0] sm:$0xff]  ;;  %v438_v12 = vpack.c.bf16 %v382_v10, %v381_v9  ;;  %v398_v13 = vld [vmem:[%s847_s11 + $0xf8] sm:$0xff]  ;;  %v380_v22 = vld [vmem:[%s847_s11 + $0x68] sm:$0xff] }
  0x2b   : > { %v413_v14 = vld [vmem:[%s847_s11 + $0x170] sm:$0xff]  ;;  %v414_v15 = vld [vmem:[%s847_s11 + $0x178] sm:$0xff]  ;;  %v446_v16 = vpack.c.bf16 %v398_v13, %v397_v11  ;;  %v395_v23 = vld [vmem:[%s847_s11 + $0xe0] sm:$0xff]  ;;  %v437_v25 = vpack.c.bf16 %v380_v22, %v379_v20 }
  0x2c   : > { %v454_v17 = vpack.c.bf16 %v414_v15, %v413_v14  ;;  %v429_v18 = vld [vmem:[%s847_s11 + $0x1f0] sm:$0xff]  ;;  %v430_v19 = vld [vmem:[%s847_s11 + $0x1f8] sm:$0xff]  ;;  %463 = vmatpush.bf16.msra.mxu0 %v438_v12  ;;  %v396_v24 = vld [vmem:[%s847_s11 + $0xe8] sm:$0xff] }
  0x2d   : > { %v462_v21 = vpack.c.bf16 %v430_v19, %v429_v18  ;;  %477 = vmatpush.bf16.msra.mxu1 %v446_v16  ;;  %v445_v26 = vpack.c.bf16 %v396_v24, %v395_v23  ;;  %v411_v27 = vld [vmem:[%s847_s11 + $0x160] sm:$0xff]  ;;  %v412_v28 = vld [vmem:[%s847_s11 + $0x168] sm:$0xff]  ;;  %v377_v32 = vld [vmem:[%s847_s11 + $0x50] sm:$0xff] }
  0x2e   : > { %491 = vmatpush.bf16.msra.mxu2 %v454_v17  ;;  %v427_v29 = vld [vmem:[%s847_s11 + $0x1e0] sm:$0xff]  ;;  %v453_v30 = vpack.c.bf16 %v412_v28, %v411_v27  ;;  %v428_v31 = vld [vmem:[%s847_s11 + $0x1e8] sm:$0xff]  ;;  %v378_v33 = vld [vmem:[%s847_s11 + $0x58] sm:$0xff] }
  0x2f   : > { %505 = vmatpush.bf16.msra.mxu3 %v462_v21  ;;  %v461_v34 = vpack.c.bf16 %v428_v31, %v427_v29  ;;  %v393_v35 = vld [vmem:[%s847_s11 + $0xd0] sm:$0xff]  ;;  %v394_v36 = vld [vmem:[%s847_s11 + $0xd8] sm:$0xff]  ;;  %v436_v38 = vpack.c.bf16 %v378_v33, %v377_v32  ;;  %v375_v44 = vld [vmem:[%s847_s11 + $0x40] sm:$0xff] }
  0x30   : > { %v409_v37 = vld [vmem:[%s847_s11 + $0x150] sm:$0xff]  ;;  %464 = vmatpush.bf16.msra.mxu0 %v437_v25  ;;  %v410_v39 = vld [vmem:[%s847_s11 + $0x158] sm:$0xff]  ;;  %v444_v42 = vpack.c.bf16 %v394_v36, %v393_v35  ;;  %v376_v45 = vld [vmem:[%s847_s11 + $0x48] sm:$0xff] }
  0x31   : > { %v425_v40 = vld [vmem:[%s847_s11 + $0x1d0] sm:$0xff]  ;;  %v426_v41 = vld [vmem:[%s847_s11 + $0x1d8] sm:$0xff]  ;;  %478 = vmatpush.bf16.msra.mxu1 %v445_v26  ;;  %v452_v43 = vpack.c.bf16 %v410_v39, %v409_v37  ;;  %v391_v46 = vld [vmem:[%s847_s11 + $0xc0] sm:$0xff]  ;;  %v435_v53 = vpack.c.bf16 %v376_v45, %v375_v44 }
  0x32   : > { %492 = vmatpush.bf16.msra.mxu2 %v453_v30  ;;  %v460_v47 = vpack.c.bf16 %v426_v41, %v425_v40  ;;  %v392_v48 = vld [vmem:[%s847_s11 + $0xc8] sm:$0xff]  ;;  %v407_v49 = vld [vmem:[%s847_s11 + $0x140] sm:$0xff]  ;;  %v373_v56 = vld [vmem:[%s847_s11 + $0x30] sm:$0xff] }
  0x33   : > { %506 = vmatpush.bf16.msra.mxu3 %v461_v34  ;;  %v408_v50 = vld [vmem:[%s847_s11 + $0x148] sm:$0xff]  ;;  %v423_v51 = vld [vmem:[%s847_s11 + $0x1c0] sm:$0xff]  ;;  %v443_v54 = vpack.c.bf16 %v392_v48, %v391_v46  ;;  %v374_v57 = vld [vmem:[%s847_s11 + $0x38] sm:$0xff] }
  0x34   : > { %v424_v52 = vld [vmem:[%s847_s11 + $0x1c8] sm:$0xff]  ;;  %465 = vmatpush.bf16.msra.mxu0 %v436_v38  ;;  %v451_v55 = vpack.c.bf16 %v408_v50, %v407_v49  ;;  %v389_v58 = vld [vmem:[%s847_s11 + $0xb0] sm:$0xff]  ;;  %v390_v60 = vld [vmem:[%s847_s11 + $0xb8] sm:$0xff]  ;;  %v434_v1 = vpack.c.bf16 %v374_v57, %v373_v56 }
  0x35   : > { %479 = vmatpush.bf16.msra.mxu1 %v444_v42  ;;  %v459_v59 = vpack.c.bf16 %v424_v52, %v423_v51  ;;  %v405_v61 = vld [vmem:[%s847_s11 + $0x130] sm:$0xff]  ;;  %v406_v62 = vld [vmem:[%s847_s11 + $0x138] sm:$0xff]  ;;  %v442_v2 = vpack.c.bf16 %v390_v60, %v389_v58  ;;  %v371_v4 = vld [vmem:[%s847_s11 + $0x20] sm:$0xff] }
  0x36   : > { %493 = vmatpush.bf16.msra.mxu2 %v452_v43  ;;  %v421_v63 = vld [vmem:[%s847_s11 + $0x1b0] sm:$0xff]  ;;  %v422_v0 = vld [vmem:[%s847_s11 + $0x1b8] sm:$0xff]  ;;  %v450_v3 = vpack.c.bf16 %v406_v62, %v405_v61  ;;  %v372_v5 = vld [vmem:[%s847_s11 + $0x28] sm:$0xff] }
  0x37   : > { %507 = vmatpush.bf16.msra.mxu3 %v460_v47  ;;  %v387_v6 = vld [vmem:[%s847_s11 + $0xa0] sm:$0xff]  ;;  %v458_v7 = vpack.c.bf16 %v422_v0, %v421_v63  ;;  %v388_v8 = vld [vmem:[%s847_s11 + $0xa8] sm:$0xff]  ;;  %v433_v13 = vpack.c.bf16 %v372_v5, %v371_v4  ;;  %v369_v16 = vld [vmem:[%s847_s11 + $0x10] sm:$0xff] }
  0x38   : > { %466 = vmatpush.bf16.msra.mxu0 %v435_v53  ;;  %v403_v9 = vld [vmem:[%s847_s11 + $0x120] sm:$0xff]  ;;  %v404_v10 = vld [vmem:[%s847_s11 + $0x128] sm:$0xff]  ;;  %v441_v14 = vpack.c.bf16 %v388_v8, %v387_v6  ;;  %v370_v17 = vld [vmem:[%s847_s11 + $0x18] sm:$0xff] }
  0x39   : > { %480 = vmatpush.bf16.msra.mxu1 %v443_v54  ;;  %v419_v11 = vld [vmem:[%s847_s11 + $0x1a0] sm:$0xff]  ;;  %v420_v12 = vld [vmem:[%s847_s11 + $0x1a8] sm:$0xff]  ;;  %v449_v15 = vpack.c.bf16 %v404_v10, %v403_v9  ;;  %v385_v18 = vld [vmem:[%s847_s11 + $0x90] sm:$0xff]  ;;  %v432_v25 = vpack.c.bf16 %v370_v17, %v369_v16 }
  0x3a   : > { %494 = vmatpush.bf16.msra.mxu2 %v451_v55  ;;  %v457_v19 = vpack.c.bf16 %v420_v12, %v419_v11  ;;  %v386_v20 = vld [vmem:[%s847_s11 + $0x98] sm:$0xff]  ;;  %v401_v21 = vld [vmem:[%s847_s11 + $0x110] sm:$0xff]  ;;  %v367_v28 = vld [vmem:[%s847_s11] sm:$0xff] }
  0x3b   : > { %508 = vmatpush.bf16.msra.mxu3 %v459_v59  ;;  %v402_v22 = vld [vmem:[%s847_s11 + $0x118] sm:$0xff]  ;;  %v417_v23 = vld [vmem:[%s847_s11 + $0x190] sm:$0xff]  ;;  %v440_v26 = vpack.c.bf16 %v386_v20, %v385_v18  ;;  %v368_v29 = vld [vmem:[%s847_s11 + $0x8] sm:$0xff] }
  0x3c   : > { %467 = vmatpush.bf16.msra.mxu0 %v434_v1  ;;  %v418_v24 = vld [vmem:[%s847_s11 + $0x198] sm:$0xff]  ;;  %v448_v27 = vpack.c.bf16 %v402_v22, %v401_v21  ;;  %v383_v30 = vld [vmem:[%s847_s11 + $0x80] sm:$0xff]  ;;  %v384_v32 = vld [vmem:[%s847_s11 + $0x88] sm:$0xff]  ;;  %v431_v37 = vpack.c.bf16 %v368_v29, %v367_v28 }
  0x3d   : > { %481 = vmatpush.bf16.msra.mxu1 %v442_v2  ;;  %v456_v31 = vpack.c.bf16 %v418_v24, %v417_v23  ;;  %v399_v33 = vld [vmem:[%s847_s11 + $0x100] sm:$0xff]  ;;  %v400_v34 = vld [vmem:[%s847_s11 + $0x108] sm:$0xff]  ;;  %v355_v38 = vld [vmem:[%s849_s12] sm:$0xff]  ;;  %v439_v41 = vpack.c.bf16 %v384_v32, %v383_v30 }
  0x3e   : > { %495 = vmatpush.bf16.msra.mxu2 %v450_v3  ;;  %v415_v35 = vld [vmem:[%s847_s11 + $0x180] sm:$0xff]  ;;  %v416_v36 = vld [vmem:[%s847_s11 + $0x188] sm:$0xff]  ;;  %v359_v39 = vld [vmem:[%s849_s12 + $0x20] sm:$0xff]  ;;  %v447_v42 = vpack.c.bf16 %v400_v34, %v399_v33 }
  0x3f   : > { %509 = vmatpush.bf16.msra.mxu3 %v458_v7  ;;  %v356_v40 = vld [vmem:[%s849_s12 + $0x8] sm:$0xff]  ;;  %v357_v44 = vld [vmem:[%s849_s12 + $0x10] sm:$0xff]  ;;  %v455_v46 = vpack.c.bf16 %v416_v36, %v415_v35  ;;  %v358_v47 = vld [vmem:[%s849_s12 + $0x18] sm:$0xff]  ;;  %v363_v49 = vpack.c.bf16 %v359_v39, %v355_v38 }
  0x40   : > { %468 = vmatpush.bf16.msra.mxu0 %v433_v13  ;;  %v360_v43 = vld [vmem:[%s849_s12 + $0x28] sm:$0xff]  ;;  %v361_v45 = vld [vmem:[%s849_s12 + $0x30] sm:$0xff]  ;;  %v362_v48 = vld [vmem:[%s849_s12 + $0x38] sm:$0xff] }
  0x41   : > { %482 = vmatpush.bf16.msra.mxu1 %v441_v14  ;;  %v364_v50 = vpack.c.bf16 %v360_v43, %v356_v40  ;;  %v365_v51 = vpack.c.bf16 %v361_v45, %v357_v44  ;;  %v366_v52 = vpack.c.bf16 %v362_v48, %v358_v47  ;;  %v353_v59 = vld [vmem:[#allocation2] sm:$0xff]  ;;  %v354_v3 = vld [vmem:[#allocation2 + $0x8] sm:$0xff] }
  0x42   : > { %496 = vmatpush.bf16.msra.mxu2 %v449_v15 }
  0x43   : > { %510 = vmatpush.bf16.msra.mxu3 %v457_v19 }
  0x44   : > { %469 = vmatpush.bf16.msra.mxu0 %v432_v25 }
  0x45   : > { %483 = vmatpush.bf16.msra.mxu1 %v440_v26 }
  0x46   : > { %497 = vmatpush.bf16.msra.mxu2 %v448_v27 }
  0x47   : > { %511 = vmatpush.bf16.msra.mxu3 %v456_v31 }
  0x48   : > { %470 = vmatpush.bf16.msra.mxu0 %v431_v37 }
  0x49   : > { %484 = vmatpush.bf16.msra.mxu1 %v439_v41 }
  0x4a   : > { %498 = vmatpush.bf16.msra.mxu2 %v447_v42 }
  0x4b   : > { %512 = vmatpush.bf16.msra.mxu3 %v455_v46  ;;  %471 = vmatmul.bf16.vlgmr.msra.gmra.mxu0 %v363_v49 }
  0x4c   : > { %485 = vmatmul.bf16.vlgmr.msra.gmra.mxu1 %v364_v50 }
  0x4d   : > { %499 = vmatmul.bf16.vlgmr.msra.gmra.mxu2 %v365_v51 }
  0x4e   : > { %513 = vmatmul.bf16.vlgmr.msra.gmra.mxu3 %v366_v52 }
  0xc8   : > { %v472_v53 = vpop.f32.mrf.mxu0 }
  0xc9   : > { %v486_v54 = vpop.f32.mrf.mxu1 }
  0xca   : > { %v487_v55 = vadd.f32 %v486_v54, %v472_v53 }
  0xd0   : > { %v500_v56 = vpop.f32.mrf.mxu2  ;;  %v474_v61 = vpop.f32.mrf.mxu0 }
  0xd1   : > { %v501_v57 = vadd.f32 %v500_v56, %v487_v55  ;;  %v514_v58 = vpop.f32.mrf.mxu3  ;;  %v488_v62 = vpop.f32.mrf.mxu1 }
  0xd2   : > { %v489_v0 = vadd.f32 %v488_v62, %v474_v61 }
  0xd3   : > { %v515_v60 = vadd.f32 %v514_v58, %v501_v57 }
  0xd5   : > { %v519_v63 = vadd.f32 %v515_v60, %v353_v59 }
  0xd7   : > { %521 = vst [vmem:[#allocation2] sm:$0xff] %v519_v63 }
  0xd8   : > { %v502_v1 = vpop.f32.mrf.mxu2 }
  0xd9   : > { %v503_v2 = vadd.f32 %v502_v1, %v489_v0  ;;  %v516_v4 = vpop.f32.mrf.mxu3 }
  0xdb   : > { %v517_v5 = vadd.f32 %v516_v4, %v503_v2  ;;  %526 = sbr.rel (%p683_p11) target bundleno = 236 (0xec), region = 67 }
  0xdd   : > { %v520_v6 = vadd.f32 %v517_v5, %v354_v3 }
  0xdf   : > { %522 = vst [vmem:[#allocation2 + $0x8] sm:$0xff] %v520_v6 }
  0xe0   : > { %v527_v7 = vld [vmem:[#allocation2] sm:$0xff]  ;;  %v536_v11 = vld [vmem:[%s958_s3 + $0x8] sm:$0xff] }
  0xe1   : > { %v730_v8 = vld [vmem:[%s957_s2] ss:$0 sm:$0xff] }
  0xe2   : > { %v535_v9 = vld [vmem:[%s958_s3] sm:$0xff]  ;;  %v533_v12 = vadd.f32 %v730_v8, %v527_v7 }
  0xe4   : > { %v537_v14 = vadd.f32 %v535_v9, %v533_v12 }
  0xe6   : > { %v528_v10 = vld [vmem:[#allocation2 + $0x8] sm:$0xff]  ;;  %539 = vst [vmem:[%s959_s4] sm:$0xff] %v537_v14 }
  0xe7   : > { %v534_v13 = vadd.f32 %v730_v8, %v528_v10 }
  0xe9   : > { %v538_v15 = vadd.f32 %v536_v11, %v534_v13 }
  0xeb   : > { %540 = vst [vmem:[%s959_s4 + $0x8] sm:$0xff] %v538_v15 }
  0xec PF: > { %s14_s19 = sadd.s32 1, %s769_s19   ;;  %s960_s15 = smov %s757_s16 }
  0xed   : > { %p11_p12 = scmp.ge.s32.totalorder %s14_s19, 6   ;;  %s961_s16 = smov %s832_s23 }
  0xee   : > { %s962_s17 = smov %s765_s18  ;;  %s963_s18 = smov %s965_s20 }
  0xef   :  { %13 = sbr.rel (!%p11_p12) target bundleno = 3 (0x3), region = 111 }

// kernel: encoder_forward.16
= control target key start
LH: loop header
LB: loop body
LE: loop exit
PB: predicated region body
PF: predicated region fallthrough
CT: control target
= control target key end

     0   :  { %s1359_s0 = inlined_call_operand.vmem [shape: f32[16,128], index: 0, kind: input, shape index: {}]   ;;  %s1360_s1 = inlined_call_operand.hbm [shape: f32[128,2048], index: 1, kind: input, shape index: {}]   ;;  %s1361_s2 = inlined_call_operand.hbm [shape: f32[1,2048], index: 2, kind: input, shape index: {}]   ;;  %s1362_s3 = inlined_call_operand.hbm [shape: f32[1,128], index: 3, kind: input, shape index: {}]   ;;  %s1363_s4 = inlined_call_operand.hbm [shape: f32[1,128], index: 4, kind: input, shape index: {}]   ;;  %s1364_s5 = inlined_call_operand.vmem [shape: f32[16,2048], index: 5, kind: output, shape index: {}]  }
   0x1   :  { %1366 = sst [smem:[#allocation15_spill]] %s1360_s1 }
   0x2   :  { %1367 = sst [smem:[#allocation16_spill]] %s1362_s3 }
   0x3   :  { %1368 = sst [smem:[#allocation17_spill]] %s1363_s4 }
   0x4   :  { %10 = vsyncpa [#allocation3], 0 }
   0x5   :  { %12 = vsyncpa [#allocation3 + $0x1], 0 }
   0x6   :  { %13 = vsyncpa [#allocation5], 0 }
   0x7   :  { %15 = vsyncpa [#allocation5 + $0x1], 0 }
   0x8   :  { %16 = vsyncpa [#allocation8], 0  ;;  %s1101_s18 = smov 0   ;;  %s1103_s19 = smov 0  }
   0x9   :  { %s1105_s20 = smov 0   ;;  %s1107_s21 = smov 0  }
   0xa   :  { %s1109_s22 = smov 0   ;;  %s1111_s23 = smov 0  }
   0xb LB: > { %s1130_s24 = sadd.s32 4294967295, %s1063_s23   ;;  %s67_s25 = sadd.s32 1, %s1051_s20  ;;  %s1063_s23 = sphi %s1111_s23, %s22_s23   ;;  %s1059_s22 = sphi %s1109_s22, %s1383_s22   ;;  %s1055_s21 = sphi %s1107_s21, %s1382_s21   ;;  %s1051_s20 = sphi %s1105_s20, %s1381_s20   ;;  %s1047_s19 = sphi %s1103_s19, %s1380_s19   ;;  %s1043_s18 = sphi %s1101_s18, %s1379_s18  }
   0xc   : > { %p74_p0 = scmp.ne.s32.totalorder %s1051_s20, %s1047_s19  ;;  %p75_p1 = scmp.eq.s32.totalorder %s1063_s23, 0 }
   0xd   : > { %p80_p2 = scmp.ne.s32.totalorder %s1047_s19, %s1043_s18  ;;  %p81_p3 = scmp.eq.s32.totalorder %s1130_s24, 0 }
   0xe   : > { %p1138_p4 = por %p75_p1, %p74_p0  ;;  %p174_p5 = scmp.eq.s32.totalorder %s1130_s24, 3 }
   0xf   : > { %p1145_p6 = por %p81_p3, %p80_p2  ;;  %p765_p7 = scmp.ge.s32.totalorder %s1063_s23, 1 }
  0x10   : > { %p1150_p8 = por %p174_p5, %p74_p0  ;;  %p187_p9 = scmp.lt.s32.totalorder %s1063_s23, 5 }
  0x11   : > { %s1372_s3 = sld [smem:[#allocation16_spill]]  ;;  %s1065_s8 = smov [#allocation6]  }
  0x12   : > { %p1158_p10 = pnand %p765_p7, %p187_p9  ;;  %s210_s9 = sshll.u32 %s1065_s8, 4  ;;  %s211_s9 = int_to_ptr.vmem [resolvable:$true] %s210_s9 }
  0x13   : > { %p816_p12 = scmp.lt.s32.totalorder %s1063_s23, 4  ;;  %s1374_s4 = sld [smem:[#allocation17_spill]] }
  0x14   : > { %p800_p11 = pneg %p1158_p10  ;;  %s1066_s14 = smov [#allocation7]  }
  0x15   : > { %p1172_p0 = pnand %p816_p12, %p1138_p4  ;;  %s222_s15 = sshll.u32 %s1066_s14, 4  ;;  %s223_s15 = int_to_ptr.vmem [resolvable:$true] %s222_s15 }
  0x16   : > { %p801_p13 = pnand %p800_p11, %p81_p3  ;;  %s233_s16 = sand.u32 1, %s1051_s20  }
  0x17   : > { %s208_s6 = sshll.u32 %s1372_s3, 4  ;;  %s31_s17 = sadd.s32 1, %s1059_s22  ;;  %s209_s6 = int_to_ptr.hbm [resolvable:$true] %s208_s6 }
  0x18   : > { %803 = dma.hbm_to_vmem [thread:$0]  (!%p801_p13), %s209_s6, 16, %s211_s9, [#allocation5]  }
  0x19   : > { %s220_s12 = sshll.u32 %s1374_s4, 4  ;;  %p32_p1 = scmp.ge.s32.totalorder %s31_s17, 4  ;;  %s221_s12 = int_to_ptr.hbm [resolvable:$true] %s220_s12 }
  0x1a   : > { %806 = dma.hbm_to_vmem [thread:$0]  (!%p801_p13), %s221_s12, 16, %s223_s15, [#allocation8]  }
  0x1b   : > { %s770_s18 = sshll.u32 %s233_s16, 9  ;;  %s786_s29 = sshll.u32 %s1059_s22, 5 }
  0x1c   : > { %s1385_s17 = smov (%p32_p1, %s31_s17), 0  ;;  %s1377_s1 = sld [smem:[#allocation15_spill]] }
  0x1d   : > { %1376 = sst [smem:[#allocation14_spill]] %s1385_s17  ;;  %s237_s8 = scalar_lea.vmem [#allocation2], %s770_s18 }
  0x1e   : > { %s245_s9 = sshll.u32 %s237_s8, 4  ;;  %s64_s10 = ssub.s32 %s1059_s22, %s1385_s17  ;;  %s246_s9 = int_to_ptr.vmem [resolvable:$true] %s245_s9 }
  0x1f   : > { %p65_p2 = scmp.eq.s32.totalorder %s64_s10, 0  ;;  %s234_s14 = scalar_lea.sflag [#allocation3], %s233_s16 }
  0x20   : > { %s1067_s15 = smov 2048   ;;  %s1068_s3 = smov 512  }
  0x21   : > { %s1189_s12 = scalar_select %p65_p2, %s1051_s20, %s67_s25  }
  0x22   : > { %s242_s6 = scalar_lea.hbm %s1377_s1, %s786_s29  ;;  %s1069_s4 = smov 32  }
  0x23   : > { %s243_s11 = sshll.u32 %s242_s6, 4  ;;  %s255_s26 = sand.u32 1, %s1063_s23   ;;  %s244_s11 = int_to_ptr.hbm [resolvable:$true] %s243_s11 }
  0x24   : > { %810 = dma.hbm_to_vmem [thread:$0]  (!%p1172_p0), %s244_s11, 8192, %s246_s9, %s234_s14, %s1067_s15, %s1068_s3, %s1069_s4  }
  0x25   : > { %s773_s29 = sshll.u32 %s233_s16, 2  ;;  %s774_s30 = sshll.u32 %s1059_s22, 2 }
  0x26   : > { %s259_s18 = scalar_lea.vmem [#allocation4], %s773_s29  ;;  %s263_s10 = scalar_lea.hbm %s1361_s2, %s774_s30 }
  0x27   : > { %s267_s8 = sshll.u32 %s259_s18, 4  ;;  %s265_s17 = sshll.u32 %s263_s10, 4  ;;  %s268_s8 = int_to_ptr.vmem [resolvable:$true] %s267_s8  ;;  %s266_s17 = int_to_ptr.hbm [resolvable:$true] %s265_s17 }
  0x28   : > { %s256_s25 = scalar_lea.sflag [#allocation5], %s255_s26  ;;  %276 = sbr.rel (%p1158_p10) target bundleno = 485 (0x1e5), region = 40 }
  0x29   : > { %813 = dma.hbm_to_vmem [thread:$0]  (!%p1172_p0), %s266_s17, 64, %s268_s8, %s256_s25  }
  0x2a   : > { %s1203_s3 = sand.u32 (!%p1158_p10), 1, %s1047_s19  }
  0x2b   : > { %s776_s4 = sshll.u32 (!%p1158_p10), %s1203_s3, 9  ;;  %s279_s16 = scalar_lea.sflag (!%p1158_p10), [#allocation3], %s1203_s3 }
  0x2c   : > { %s1207_s9 = scalar_lea.vmem (!%p1158_p10), [#allocation2], %s776_s4 }
  0x2d   : > { %1026 = dma.done.wait (%p1145_p6), %s279_s16, 8192  }
  0x2e   : > { %1028 = vsyncadd (%p1145_p6), %s279_s16, 4294959104  ;;  %s288_s1 = sand.u32 1, %s1130_s24   ;;  %s777_s7 = sshll.u32 %s1203_s3, 2 }
  0x2f   : > { %s289_s13 = scalar_lea.sflag [#allocation5], %s288_s1  ;;  %s1215_s17 = scalar_lea.vmem [#allocation4], %s777_s7 }
  0x30   : > { %1030 = dma.done.wait (%p1145_p6), %s289_s13, 64  }
  0x31   : > { %1032 = vsyncadd (%p1145_p6), %s289_s13, 4294967232 }
  0x32   : > { %1034 = dma.done.wait (%p81_p3), [#allocation5], 16  }
  0x33   : > { %1036 = vsyncadd (%p81_p3), [#allocation5], 4294967280 }
  0x34   : > { %1038 = dma.done.wait (%p81_p3), [#allocation8], 16  }
  0x35   : > { %1040 = vsyncadd (%p81_p3), [#allocation8], 4294967280  ;;  %v349_v0 = vld [vmem:[%s1359_s0] sm:$0xff]  ;;  %v350_v1 = vld [vmem:[%s1359_s0 + $0x8] sm:$0xff]  ;;  %v1070_v2 = vmov 128.0   ;;  %s780_s24 = sshll.u32 %s1203_s3, 6 }
  0x36   : > { %351 = vadd.xlane.f32.xlu0 %v349_v0  ;;  %875 = vrcp.f32 %v1070_v2  ;;  %v467_v17 = vld [vmem:[%s1207_s9 + $0x1c0] sm:$0xff]  ;;  %v468_v19 = vld [vmem:[%s1207_s9 + $0x1c8] sm:$0xff]  ;;  %v469_v22 = vld [vmem:[%s1207_s9 + $0x1d0] sm:$0xff]  ;;  %s1317_s26 = scalar_lea.vmem [#allocation9], %s780_s24  ;;  %s787_s29 = sshll.u32 (%p1150_p8), %s1055_s21, 5 }
  0x37   : > { %v471_v18 = vld [vmem:[%s1207_s9 + $0x1e0] sm:$0xff]  ;;  %v472_v21 = vld [vmem:[%s1207_s9 + $0x1e8] sm:$0xff]  ;;  %v473_v23 = vld [vmem:[%s1207_s9 + $0x1f0] sm:$0xff]  ;;  %s601_s8 = scalar_lea.vmem (%p1150_p8), %s1364_s5, %s787_s29 }
  0x38   : > { %v503_v20 = vpack.c.bf16 %v471_v18, %v467_v17  ;;  %v504_v24 = vpack.c.bf16 %v472_v21, %v468_v19  ;;  %v505_v25 = vpack.c.bf16 %v473_v23, %v469_v22  ;;  %v470_v26 = vld [vmem:[%s1207_s9 + $0x1d8] sm:$0xff]  ;;  %v459_v29 = vld [vmem:[%s1207_s9 + $0x180] sm:$0xff]  ;;  %v460_v31 = vld [vmem:[%s1207_s9 + $0x188] sm:$0xff] }
  0x39   : > { %v474_v27 = vld [vmem:[%s1207_s9 + $0x1f8] sm:$0xff]  ;;  %v463_v30 = vld [vmem:[%s1207_s9 + $0x1a0] sm:$0xff]  ;;  %v464_v33 = vld [vmem:[%s1207_s9 + $0x1a8] sm:$0xff] }
  0x3a   : > { %517 = vmatpush.bf16.msra.mxu0 %v503_v20  ;;  %v506_v28 = vpack.c.bf16 %v474_v27, %v470_v26  ;;  %531 = vmatpush.bf16.msra.mxu1 %v504_v24  ;;  %v499_v32 = vpack.c.bf16 %v463_v30, %v459_v29  ;;  %v461_v34 = vld [vmem:[%s1207_s9 + $0x190] sm:$0xff]  ;;  %v500_v36 = vpack.c.bf16 %v464_v33, %v460_v31  ;;  %v462_v38 = vld [vmem:[%s1207_s9 + $0x198] sm:$0xff]  ;;  %v451_v41 = vld [vmem:[%s1207_s9 + $0x140] sm:$0xff] }
  0x3b   : > { %545 = vmatpush.bf16.msra.mxu2 %v505_v25  ;;  %v465_v35 = vld [vmem:[%s1207_s9 + $0x1b0] sm:$0xff]  ;;  %v466_v39 = vld [vmem:[%s1207_s9 + $0x1b8] sm:$0xff]  ;;  %v455_v42 = vld [vmem:[%s1207_s9 + $0x160] sm:$0xff] }
  0x3c   : > { %v876_v3 = vpop.eup %875  ;;  %559 = vmatpush.bf16.msra.mxu3 %v506_v28  ;;  %v501_v37 = vpack.c.bf16 %v465_v35, %v461_v34  ;;  %v502_v40 = vpack.c.bf16 %v466_v39, %v462_v38  ;;  %v452_v43 = vld [vmem:[%s1207_s9 + $0x148] sm:$0xff]  ;;  %v495_v44 = vpack.c.bf16 %v455_v42, %v451_v41  ;;  %v453_v46 = vld [vmem:[%s1207_s9 + $0x150] sm:$0xff]  ;;  %v454_v50 = vld [vmem:[%s1207_s9 + $0x158] sm:$0xff] }
  0x3d   : > { %v356_v4 = vmul.f32 128.0, %v876_v3  ;;  %vm360_vm0 = vweird.f32 %v876_v3  ;;  %v456_v45 = vld [vmem:[%s1207_s9 + $0x168] sm:$0xff]  ;;  %v457_v47 = vld [vmem:[%s1207_s9 + $0x170] sm:$0xff]  ;;  %v458_v51 = vld [vmem:[%s1207_s9 + $0x178] sm:$0xff] }
  0x3e   : > { %353 = vadd.xlane.f32.xlu0 %v350_v1  ;;  %518 = vmatpush.bf16.msra.mxu0 %v499_v32  ;;  %v496_v48 = vpack.c.bf16 %v456_v45, %v452_v43  ;;  %v497_v49 = vpack.c.bf16 %v457_v47, %v453_v46  ;;  %v498_v52 = vpack.c.bf16 %v458_v51, %v454_v50  ;;  %v443_v53 = vld [vmem:[%s1207_s9 + $0x100] sm:$0xff]  ;;  %v444_v55 = vld [vmem:[%s1207_s9 + $0x108] sm:$0xff]  ;;  %v445_v58 = vld [vmem:[%s1207_s9 + $0x110] sm:$0xff] }
  0x3f   : > { %v357_v5 = vsub.f32 1.0, %v356_v4  ;;  %532 = vmatpush.bf16.msra.mxu1 %v500_v36  ;;  %546 = vmatpush.bf16.msra.mxu2 %v501_v37  ;;  %v447_v54 = vld [vmem:[%s1207_s9 + $0x120] sm:$0xff]  ;;  %v448_v57 = vld [vmem:[%s1207_s9 + $0x128] sm:$0xff]  ;;  %v449_v59 = vld [vmem:[%s1207_s9 + $0x130] sm:$0xff] }
  0x40   : > { %560 = vmatpush.bf16.msra.mxu3 %v502_v40  ;;  %v491_v56 = vpack.c.bf16 %v447_v54, %v443_v53  ;;  %v492_v60 = vpack.c.bf16 %v448_v57, %v444_v55  ;;  %v493_v61 = vpack.c.bf16 %v449_v59, %v445_v58  ;;  %v446_v62 = vld [vmem:[%s1207_s9 + $0x118] sm:$0xff]  ;;  %v439_v2 = vld [vmem:[%s1207_s9 + $0xe0] sm:$0xff]  ;;  %v428_v18 = vld [vmem:[%s1207_s9 + $0x88] sm:$0xff] }
  0x41   : > { %v358_v6 = vmul.f32 %v876_v3, %v357_v5  ;;  %v450_v63 = vld [vmem:[%s1207_s9 + $0x138] sm:$0xff]  ;;  %v440_v5 = vld [vmem:[%s1207_s9 + $0xe8] sm:$0xff]  ;;  %v431_v17 = vld [vmem:[%s1207_s9 + $0xa0] sm:$0xff] }
  0x42   : > { %519 = vmatpush.bf16.msra.mxu0 %v495_v44  ;;  %v432_v20 = vld [vmem:[%s1207_s9 + $0xa8] sm:$0xff]  ;;  %v429_v21 = vld [vmem:[%s1207_s9 + $0x90] sm:$0xff]  ;;  %v430_v25 = vld [vmem:[%s1207_s9 + $0x98] sm:$0xff] }
  0x43   : > { %v359_v7 = vadd.f32 %v876_v3, %v358_v6  ;;  %533 = vmatpush.bf16.msra.mxu1 %v496_v48  ;;  %547 = vmatpush.bf16.msra.mxu2 %v497_v49  ;;  %v437_v6 = vld [vmem:[%s1207_s9 + $0xd0] sm:$0xff]  ;;  %v484_v23 = vpack.c.bf16 %v432_v20, %v428_v18  ;;  %v434_v26 = vld [vmem:[%s1207_s9 + $0xb8] sm:$0xff]  ;;  %v419_v28 = vld [vmem:[%s1207_s9 + $0x40] sm:$0xff] }
  0x44   : > { %561 = vmatpush.bf16.msra.mxu3 %v498_v52  ;;  %v433_v22 = vld [vmem:[%s1207_s9 + $0xb0] sm:$0xff]  ;;  %v486_v27 = vpack.c.bf16 %v434_v26, %v430_v25  ;;  %v423_v29 = vld [vmem:[%s1207_s9 + $0x60] sm:$0xff]  ;;  %v420_v30 = vld [vmem:[%s1207_s9 + $0x48] sm:$0xff] }
  0x45   : > { %v1235_v8 = vsel %vm360_vm0, %v876_v3, %v359_v7  ;;  %v436_v3 = vld [vmem:[%s1207_s9 + $0xc8] sm:$0xff]  ;;  %v441_v7 = vld [vmem:[%s1207_s9 + $0xf0] sm:$0xff]  ;;  %v485_v24 = vpack.c.bf16 %v433_v22, %v429_v21  ;;  %v479_v31 = vpack.c.bf16 %v423_v29, %v419_v28  ;;  %v422_v37 = vld [vmem:[%s1207_s9 + $0x58] sm:$0xff] }
  0x46   : > { %520 = vmatpush.bf16.msra.mxu0 %v491_v56  ;;  %v424_v32 = vld [vmem:[%s1207_s9 + $0x68] sm:$0xff]  ;;  %v421_v33 = vld [vmem:[%s1207_s9 + $0x50] sm:$0xff]  ;;  %v426_v38 = vld [vmem:[%s1207_s9 + $0x78] sm:$0xff] }
  0x47   : > { %534 = vmatpush.bf16.msra.mxu1 %v492_v60  ;;  %548 = vmatpush.bf16.msra.mxu2 %v493_v61  ;;  %v425_v34 = vld [vmem:[%s1207_s9 + $0x70] sm:$0xff]  ;;  %v480_v35 = vpack.c.bf16 %v424_v32, %v420_v30  ;;  %v411_v39 = vld [vmem:[%s1207_s9] sm:$0xff]  ;;  %v482_v41 = vpack.c.bf16 %v426_v38, %v422_v37  ;;  %v412_v43 = vld [vmem:[%s1207_s9 + $0x8] sm:$0xff] }
  0x48   : > { %v481_v36 = vpack.c.bf16 %v425_v34, %v421_v33  ;;  %v415_v42 = vld [vmem:[%s1207_s9 + $0x20] sm:$0xff]  ;;  %v416_v44 = vld [vmem:[%s1207_s9 + $0x28] sm:$0xff]  ;;  %v413_v48 = vld [vmem:[%s1207_s9 + $0x10] sm:$0xff] }
  0x49   : > { %v475_v46 = vpack.c.bf16 %v415_v42, %v411_v39  ;;  %v476_v47 = vpack.c.bf16 %v416_v44, %v412_v43  ;;  %v417_v49 = vld [vmem:[%s1207_s9 + $0x30] sm:$0xff]  ;;  %v414_v50 = vld [vmem:[%s1207_s9 + $0x18] sm:$0xff] }
  0x4a   : > { %v477_v51 = vpack.c.bf16 %v417_v49, %v413_v48  ;;  %v418_v52 = vld [vmem:[%s1207_s9 + $0x38] sm:$0xff] }
  0x4b   : > { %v478_v54 = vpack.c.bf16 %v418_v52, %v414_v50 }
  0xa9   : > { %v352_v9 = vpop.xlane.xlu0 %351 }
  0xaa   : > { %v362_v10 = vmul.f32 %v1235_v8, %v352_v9  ;;  %v488_v9 = vpack.c.bf16 %v440_v5, %v436_v3 }
  0xac   : > { %v1238_v11 = vsub.f32 %v349_v0, %v362_v10  ;;  %v494_v0 = vpack.c.bf16 %v450_v63, %v446_v62  ;;  %v489_v10 = vpack.c.bf16 %v441_v7, %v437_v6  ;;  %535 = vmatpush.bf16.msra.mxu1 %v488_v9  ;;  %v873_v6 = vld [vmem:[#allocation6] ss:$0 sm:$0xff] }
  0xae   : > { %v366_v12 = vmul.f32 %v1238_v11, %v1238_v11  ;;  %562 = vmatpush.bf16.msra.mxu3 %v494_v0  ;;  %549 = vmatpush.bf16.msra.mxu2 %v489_v10 }
  0xb0   : > { %368 = vadd.xlane.f32.xlu1 %v366_v12  ;;  %v438_v12 = vld [vmem:[%s1207_s9 + $0xd8] sm:$0xff]  ;;  %536 = vmatpush.bf16.msra.mxu1 %v484_v23 }
  0xb1   : > { %v354_v13 = vpop.xlane.xlu0 %353 }
  0xb2   : > { %v363_v14 = vmul.f32 %v1235_v8, %v354_v13  ;;  %v442_v13 = vld [vmem:[%s1207_s9 + $0xf8] sm:$0xff]  ;;  %550 = vmatpush.bf16.msra.mxu2 %v485_v24 }
  0xb4   : > { %v1243_v15 = vsub.f32 %v350_v1, %v363_v14  ;;  %v435_v1 = vld [vmem:[%s1207_s9 + $0xc0] sm:$0xff]  ;;  %v490_v14 = vpack.c.bf16 %v442_v13, %v438_v12  ;;  %537 = vmatpush.bf16.msra.mxu1 %v480_v35  ;;  %v874_v13 = vld [vmem:[#allocation7] ss:$0 sm:$0xff] }
  0xb5   : > { %v487_v4 = vpack.c.bf16 %v439_v2, %v435_v1 }
  0xb6   : > { %v367_v16 = vmul.f32 %v1243_v15, %v1243_v15  ;;  %563 = vmatpush.bf16.msra.mxu3 %v490_v14  ;;  %551 = vmatpush.bf16.msra.mxu2 %v481_v36 }
  0xb7   : > { %521 = vmatpush.bf16.msra.mxu0 %v487_v4 }
  0xb8   : > { %370 = vadd.xlane.f32.xlu1 %v367_v16  ;;  %v427_v16 = vld [vmem:[%s1207_s9 + $0x80] sm:$0xff]  ;;  %538 = vmatpush.bf16.msra.mxu1 %v476_v47 }
  0xb9   : > { %v483_v19 = vpack.c.bf16 %v431_v17, %v427_v16 }
  0xba   : > { %564 = vmatpush.bf16.msra.mxu3 %v486_v27  ;;  %552 = vmatpush.bf16.msra.mxu2 %v477_v51 }
  0xbb   : > { %522 = vmatpush.bf16.msra.mxu0 %v483_v19 }
  0xbe   : > { %565 = vmatpush.bf16.msra.mxu3 %v482_v41 }
  0xbf   : > { %523 = vmatpush.bf16.msra.mxu0 %v479_v31 }
  0xc2   : > { %566 = vmatpush.bf16.msra.mxu3 %v478_v54 }
  0xc3   : > { %524 = vmatpush.bf16.msra.mxu0 %v475_v46 }
 0x123   : > { %v369_v40 = vpop.xlane.xlu1 %368 }
 0x124   : > { %v372_v45 = vmul.f32 %v369_v40, %v1235_v8 }
 0x126   : > { %v374_v53 = vadd.f32 1e-05, %v372_v45 }
 0x128   : > { %877 = vrsqrt.f32 %v374_v53  ;;  %vm382_vm2 = vweird.f32 %v374_v53 }
 0x12b   : > { %v371_v55 = vpop.xlane.xlu1 %370 }
 0x12c   : > { %v373_v56 = vmul.f32 %v371_v55, %v1235_v8 }
 0x12e   : > { %v878_v57 = vpop.eup %877  ;;  %v375_v58 = vadd.f32 1e-05, %v373_v56 }
 0x12f   : > { %v377_v59 = vmul.f32 %v878_v57, %v374_v53  ;;  %vm383_vm1 = vweird.f32 %v878_v57 }
 0x130   : > { %879 = vrsqrt.f32 %v375_v58  ;;  %vm384_vm3 = vmor %vm382_vm2, %vm383_vm1  ;;  %vm392_vm5 = vweird.f32 %v375_v58 }
 0x131   : > { %v378_v60 = vmul.f32 %v878_v57, %v377_v59 }
 0x133   : > { %v379_v61 = vmul.f32 0.5, %v378_v60 }
 0x135   : > { %v380_v62 = vsub.f32 1.5, %v379_v61 }
 0x136   : > { %v880_v63 = vpop.eup %879 }
 0x137   : > { %v381_v0 = vmul.f32 %v878_v57, %v380_v62  ;;  %v387_v1 = vmul.f32 %v880_v63, %v375_v58  ;;  %vm393_vm4 = vweird.f32 %v880_v63 }
 0x138   : > { %vm394_vm6 = vmor %vm392_vm5, %vm393_vm4 }
 0x139   : > { %v388_v2 = vmul.f32 %v880_v63, %v387_v1  ;;  %v385_v3 = vsel %vm384_vm3, %v878_v57, %v381_v0 }
 0x13a   : > { %v396_v8 = vmul.f32 %v385_v3, %v1238_v11  ;;  %v507_v11 = vld [vmem:[%s1215_s17] sm:$0xf] }
 0x13b   : > { %v389_v4 = vmul.f32 0.5, %v388_v2  ;;  %v509_v19 = vperm.slane %v507_v11, 0  ;;  %v510_v20 = vperm.slane %v507_v11, 1  ;;  %v511_v26 = vperm.slane %v507_v11, 2 }
 0x13c   : > { %v402_v12 = vmul.f32 %v873_v6, %v396_v8  ;;  %v512_v27 = vperm.slane %v507_v11, 3 }
 0x13d   : > { %v390_v5 = vsub.f32 1.5, %v389_v4 }
 0x13e   : > { %v408_v16 = vadd.f32 %v874_v13, %v402_v12 }
 0x13f   : > { %v391_v7 = vmul.f32 %v880_v63, %v390_v5 }
 0x141   : > { %v395_v9 = vsel %vm394_vm6, %v880_v63, %v391_v7 }
 0x142   : > { %v397_v10 = vmul.f32 %v395_v9, %v1243_v15 }
 0x144   : > { %v403_v14 = vmul.f32 %v873_v6, %v397_v10 }
 0x146   : > { %v409_v17 = vadd.f32 %v874_v13, %v403_v14 }
 0x148   : > { %v410_v18 = vpack.c.bf16 %v409_v17, %v408_v16 }
 0x14a   : > { %525 = vmatmul.bf16.vlgmr.msra.gmra.mxu0 %v410_v18  ;;  %539 = vmatmul.bf16.vlgmr.msra.gmra.mxu1 %v410_v18 }
 0x14b   : > { %553 = vmatmul.bf16.vlgmr.msra.gmra.mxu2 %v410_v18  ;;  %567 = vmatmul.bf16.vlgmr.msra.gmra.mxu3 %v410_v18 }
 0x1c7   : > { %v526_v21 = vpop.f32.mrf.mxu0  ;;  %v540_v22 = vpop.f32.mrf.mxu1 }
 0x1c8   : > { %v527_v23 = vadd.f32 %v526_v21, %v509_v19  ;;  %v541_v24 = vadd.f32 %v540_v22, %v510_v20 }
 0x1ca   : > { %v573_v25 = vmax.f32 %v527_v23, 0.0  ;;  %v574_v15 = vmax.f32 %v541_v24, 0.0 }
 0x1cc   : > { %581 = vst [vmem:[%s1317_s26] sm:$0xff] %v573_v25 }
 0x1cd   : > { %582 = vst [vmem:[%s1317_s26 + $0x8] sm:$0xff] %v574_v15 }
 0x1ce   : > { %v554_v28 = vpop.f32.mrf.mxu2  ;;  %v568_v29 = vpop.f32.mrf.mxu3 }
 0x1cf   : > { %v555_v30 = vadd.f32 %v554_v28, %v511_v26  ;;  %v569_v31 = vadd.f32 %v568_v29, %v512_v27  ;;  %v528_v32 = vpop.f32.mrf.mxu0  ;;  %v542_v33 = vpop.f32.mrf.mxu1 }
 0x1d0   : > { %v529_v34 = vadd.f32 %v528_v32, %v509_v19  ;;  %v543_v35 = vadd.f32 %v542_v33, %v510_v20 }
 0x1d1   : > { %v575_v36 = vmax.f32 %v555_v30, 0.0  ;;  %v576_v37 = vmax.f32 %v569_v31, 0.0 }
 0x1d2   : > { %v577_v38 = vmax.f32 %v529_v34, 0.0  ;;  %v578_v39 = vmax.f32 %v543_v35, 0.0 }
 0x1d3   : > { %583 = vst [vmem:[%s1317_s26 + $0x10] sm:$0xff] %v575_v36  ;;  %v614_v46 = vld [vmem:[%s1317_s26] sm:$0xff] (%p1150_p8) }
 0x1d4   : > { %584 = vst [vmem:[%s1317_s26 + $0x18] sm:$0xff] %v576_v37  ;;  %v616_v47 = vld [vmem:[%s1317_s26 + $0x8] sm:$0xff] (%p1150_p8) }
 0x1d5   : > { %585 = vst [vmem:[%s1317_s26 + $0x20] sm:$0xff] %v577_v38 }
 0x1d6   : > { %586 = vst [vmem:[%s1317_s26 + $0x28] sm:$0xff] %v578_v39  ;;  %v556_v40 = vpop.f32.mrf.mxu2  ;;  %v570_v41 = vpop.f32.mrf.mxu3 }
 0x1d7   : > { %v557_v42 = vadd.f32 %v556_v40, %v511_v26  ;;  %v571_v43 = vadd.f32 %v570_v41, %v512_v27  ;;  %615 = vst [vmem:[%s601_s8] sm:$0xff] (%p1150_p8), %v614_v46 }
 0x1d8   : > { %595 = sbr.rel (!%p1150_p8) target bundleno = 485 (0x1e5), region = 60  ;;  %617 = vst [vmem:[%s601_s8 + $0x8] sm:$0xff] (%p1150_p8), %v616_v47 }
 0x1d9   : > { %v579_v44 = vmax.f32 %v557_v42, 0.0  ;;  %v580_v45 = vmax.f32 %v571_v43, 0.0 }
 0x1da   : > { %v618_v48 = vld [vmem:[%s1317_s26 + $0x10] sm:$0xff] (%p1150_p8) }
 0x1db   : > { %587 = vst [vmem:[%s1317_s26 + $0x30] sm:$0xff] %v579_v44  ;;  %v620_v49 = vld [vmem:[%s1317_s26 + $0x18] sm:$0xff] (%p1150_p8) }
 0x1dc   : > { %588 = vst [vmem:[%s1317_s26 + $0x38] sm:$0xff] %v580_v45  ;;  %v622_v50 = vld [vmem:[%s1317_s26 + $0x20] sm:$0xff] (%p1150_p8) }
 0x1dd   : > { %619 = vst [vmem:[%s601_s8 + $0x10] sm:$0xff] %v618_v48  ;;  %v624_v51 = vld [vmem:[%s1317_s26 + $0x28] sm:$0xff] }
 0x1de   : > { %621 = vst [vmem:[%s601_s8 + $0x18] sm:$0xff] %v620_v49 }
 0x1df   : > { %623 = vst [vmem:[%s601_s8 + $0x80] sm:$0xff] %v622_v50 }
 0x1e0   : > { %625 = vst [vmem:[%s601_s8 + $0x88] sm:$0xff] %v624_v51 }
 0x1e2   : > { %v626_v52 = vld [vmem:[%s1317_s26 + $0x30] sm:$0xff] }
 0x1e3   : > { %v628_v53 = vld [vmem:[%s1317_s26 + $0x38] sm:$0xff]  ;;  %627 = vst [vmem:[%s601_s8 + $0x90] sm:$0xff] %v626_v52 }
 0x1e4   : > { %629 = vst [vmem:[%s601_s8 + $0x98] sm:$0xff] %v628_v53 }
 0x1e5 PF: > { %s22_s23 = sadd.s32 1, %s1063_s23   ;;  %s1378_s28 = sld [smem:[#allocation14_spill]] }
 0x1e6   : > { %p19_p3 = scmp.ge.s32.totalorder %s22_s23, 6   ;;  %s1379_s18 = smov %s1047_s19 }
 0x1e7   : > { %s1380_s19 = smov %s1051_s20  ;;  %s1381_s20 = smov %s1189_s12 }
 0x1e8   : > { %s1382_s21 = smov %s1059_s22  ;;  %21 = sbr.rel (!%p19_p3) target bundleno = 11 (0xb), region = 127 }
 0x1eb   : > { %s1383_s22 = smov %s1378_s28 }
 0x1ed   :  { %645 = vsyncpa [#allocation3], 1 }
 0x1ee   :  { %647 = vsyncpa [#allocation3 + $0x1], 1 }
 0x1ef   :  { %648 = vsyncpa [#allocation5], 1 }
 0x1f0   :  { %650 = vsyncpa [#allocation5 + $0x1], 1 }
 0x1f1   :  { %651 = vsyncpa [#allocation8], 1 }

// kernel: encoder_forward.18
= control target key start
LH: loop header
LB: loop body
LE: loop exit
PB: predicated region body
PF: predicated region fallthrough
CT: control target
= control target key end

     0   :  { %s746_s18 = smov 0   ;;  %s748_s19 = smov 0   ;;  %s875_s0 = inlined_call_operand.vmem [shape: f32[16,128], index: 0, kind: input, shape index: {}]   ;;  %s876_s1 = inlined_call_operand.vmem [shape: f32[128,384], index: 1, kind: input, shape index: {}]   ;;  %s877_s2 = inlined_call_operand.vmem [shape: f32[1,384], index: 2, kind: input, shape index: {}]   ;;  %s878_s3 = inlined_call_operand.vmem [shape: f32[1,128], index: 3, kind: input, shape index: {}]   ;;  %s879_s4 = inlined_call_operand.vmem [shape: f32[1,128], index: 4, kind: input, shape index: {}]   ;;  %s880_s5 = inlined_call_operand.vmem [shape: f32[16,384], index: 5, kind: output, shape index: {}]  }
   0x1   :  { %s750_s20 = smov 0   ;;  %s752_s21 = smov 0  }
   0x2   :  { %s754_s22 = smov 0  }
   0x3 LB: > { %s24_s23 = sadd.s32 1, %s709_s21  ;;  %s611_s24 = sadd.s32 4294967295, %s713_s22   ;;  %s713_s22 = sphi %s754_s22, %s15_s22   ;;  %s709_s21 = sphi %s752_s21, %s885_s21   ;;  %s705_s20 = sphi %s750_s20, %s884_s20   ;;  %s701_s19 = sphi %s748_s19, %s883_s19   ;;  %s697_s18 = sphi %s746_s18, %s882_s18  }
   0x4   : > { %p25_p0 = scmp.ge.s32.totalorder %s24_s23, 3  ;;  %p67_p1 = scmp.ne.s32.totalorder %s701_s19, %s697_s18 }
   0x5   : > { %p68_p2 = scmp.eq.s32.totalorder %s713_s22, 0  ;;  %p167_p4 = scmp.eq.s32.totalorder %s611_s24, 2 }
   0x6   : > { %s887_s23 = smov (%p25_p0, %s24_s23), 0  ;;  %s60_s26 = sadd.s32 1, %s701_s19 }
   0x7   : > { %p69_p3 = por %p68_p2, %p67_p1  ;;  %s57_s25 = ssub.s32 %s709_s21, %s887_s23 }
   0x8   : > { %p58_p5 = scmp.eq.s32.totalorder %s57_s25, 0  ;;  %p781_p6 = por %p167_p4, %p67_p1 }
   0x9   : > { %p615_p7 = scmp.ge.s32.totalorder %s713_s22, 3 }
   0xa   : > { %s786_s28 = scalar_select %p58_p5, %s701_s19, %s60_s26  }
   0xb   : > { %204 = sbr.rel (%p615_p7) target bundleno = 36 (0x24), region = 28 }
  0x10   : > { %207 = sbr.rel (!%p69_p3) target bundleno = 36 (0x24), region = 32  ;;  %s209_s29 = sand.u32 (%p69_p3), 1, %s701_s19  }
  0x11   : > { %s617_s30 = sshll.u32 (%p69_p3), %s709_s21, 3  ;;  %s616_s6 = sshll.u32 (%p69_p3), %s209_s29, 7 }
  0x12   : > { %s794_s9 = scalar_lea.vmem (%p69_p3), %s876_s1, %s617_s30  ;;  %s211_s10 = scalar_lea.vmem (%p69_p3), [#allocation2], %s616_s6 }
  0x13   : > { %v272_v0 = vld [vmem:[%s794_s9] sm:$0xff] (%p69_p3)  ;;  %v274_v1 = vld [vmem:[%s794_s9 + $0x18] sm:$0xff] (%p69_p3)  ;;  %v276_v2 = vld [vmem:[%s794_s9 + $0x30] sm:$0xff] (%p69_p3) }
  0x14   : > { %273 = vst [vmem:[%s211_s10] sm:$0xff] (%p69_p3), %v272_v0  ;;  %v278_v3 = vld [vmem:[%s794_s9 + $0x48] sm:$0xff] (%p69_p3)  ;;  %v280_v4 = vld [vmem:[%s794_s9 + $0x60] sm:$0xff] (%p69_p3)  ;;  %v282_v5 = vld [vmem:[%s794_s9 + $0x78] sm:$0xff] (%p69_p3) }
  0x15   : > { %275 = vst [vmem:[%s211_s10 + $0x8] sm:$0xff] %v274_v1  ;;  %v284_v6 = vld [vmem:[%s794_s9 + $0x90] sm:$0xff]  ;;  %v286_v7 = vld [vmem:[%s794_s9 + $0xa8] sm:$0xff]  ;;  %v288_v8 = vld [vmem:[%s794_s9 + $0xc0] sm:$0xff] }
  0x16   : > { %277 = vst [vmem:[%s211_s10 + $0x10] sm:$0xff] %v276_v2  ;;  %v290_v9 = vld [vmem:[%s794_s9 + $0xd8] sm:$0xff]  ;;  %v292_v10 = vld [vmem:[%s794_s9 + $0xf0] sm:$0xff]  ;;  %v294_v11 = vld [vmem:[%s794_s9 + $0x108] sm:$0xff] }
  0x17   : > { %279 = vst [vmem:[%s211_s10 + $0x18] sm:$0xff] %v278_v3  ;;  %v296_v12 = vld [vmem:[%s794_s9 + $0x120] sm:$0xff]  ;;  %v298_v13 = vld [vmem:[%s794_s9 + $0x138] sm:$0xff]  ;;  %v300_v14 = vld [vmem:[%s794_s9 + $0x150] sm:$0xff] }
  0x18   : > { %281 = vst [vmem:[%s211_s10 + $0x20] sm:$0xff] %v280_v4  ;;  %v302_v15 = vld [vmem:[%s794_s9 + $0x168] sm:$0xff] }
  0x19   : > { %283 = vst [vmem:[%s211_s10 + $0x28] sm:$0xff] %v282_v5 }
  0x1a   : > { %285 = vst [vmem:[%s211_s10 + $0x30] sm:$0xff] %v284_v6 }
  0x1b   : > { %287 = vst [vmem:[%s211_s10 + $0x38] sm:$0xff] %v286_v7 }
  0x1c   : > { %289 = vst [vmem:[%s211_s10 + $0x40] sm:$0xff] %v288_v8 }
  0x1d   : > { %291 = vst [vmem:[%s211_s10 + $0x48] sm:$0xff] %v290_v9 }
  0x1e   : > { %293 = vst [vmem:[%s211_s10 + $0x50] sm:$0xff] %v292_v10 }
  0x1f   : > { %295 = vst [vmem:[%s211_s10 + $0x58] sm:$0xff] %v294_v11 }
  0x20   : > { %297 = vst [vmem:[%s211_s10 + $0x60] sm:$0xff] %v296_v12 }
  0x21   : > { %299 = vst [vmem:[%s211_s10 + $0x68] sm:$0xff] %v298_v13 }
  0x22   : > { %301 = vst [vmem:[%s211_s10 + $0x70] sm:$0xff] %v300_v14 }
  0x23   : > { %303 = vst [vmem:[%s211_s10 + $0x78] sm:$0xff] %v302_v15 }
  0x24 PF: > { %p618_p8 = scmp.ge.s32.totalorder %s713_s22, 1  ;;  %p314_p9 = scmp.lt.s32.totalorder %s713_s22, 4 }
  0x26   : > { %p315_p10 = pnand %p618_p8, %p314_p9 }
  0x27   : > { %p361_p11 = scmp.lt.s32.totalorder (!%p315_p10), %s705_s20, 2  ;;  %s321_s25 = sand.u32 (!%p315_p10), 1, %s697_s18  }
  0x28   : > { %318 = sbr.rel (%p315_p10) target bundleno = 467 (0x1d3), region = 74  ;;  %s619_s26 = sshll.u32 (!%p315_p10), %s321_s25, 7 }
  0x29   : > { %s323_s29 = scalar_lea.vmem (!%p315_p10), [#allocation2], %s619_s26  ;;  %s620_s9 = sshll.u32 (!%p315_p10), %s321_s25, 4 }
  0x2a   : > { %s354_s12 = scalar_lea.vmem (!%p315_p10), [#allocation3], %s620_s9 }
  0x2d   : > { %v365_v16 = vld [vmem:[%s875_s0] sm:$0xff]  ;;  %v366_v17 = vld [vmem:[%s875_s0 + $0x8] sm:$0xff]  ;;  %v715_v18 = vmov 128.0   ;;  %s830_s15 = scalar_select %p361_p11, %s705_s20, 2  ;;  %v441_v33 = vld [vmem:[%s323_s29 + $0x70] sm:$0xff] }
  0x2e   : > { %367 = vadd.xlane.f32.xlu0 %v365_v16  ;;  %669 = vrcp.f32 %v715_v18  ;;  %v442_v34 = vld [vmem:[%s323_s29 + $0x78] sm:$0xff]  ;;  %v439_v36 = vld [vmem:[%s323_s29 + $0x60] sm:$0xff]  ;;  %v440_v37 = vld [vmem:[%s323_s29 + $0x68] sm:$0xff]  ;;  %s622_s13 = sshll.u32 (%p781_p6), %s705_s20, 3 }
  0x2f   : > { %s363_s24 = scalar_lea.vmem %s877_s2, %s830_s15  ;;  %v450_v35 = vpack.c.bf16 %v442_v34, %v441_v33  ;;  %v449_v38 = vpack.c.bf16 %v440_v37, %v439_v36  ;;  %v437_v39 = vld [vmem:[%s323_s29 + $0x50] sm:$0xff]  ;;  %v438_v40 = vld [vmem:[%s323_s29 + $0x58] sm:$0xff]  ;;  %v435_v42 = vld [vmem:[%s323_s29 + $0x40] sm:$0xff]  ;;  %s482_s16 = scalar_lea.vmem (%p781_p6), %s880_s5, %s622_s13 }
  0x30   : > { %v448_v41 = vpack.c.bf16 %v438_v40, %v437_v39  ;;  %v436_v43 = vld [vmem:[%s323_s29 + $0x48] sm:$0xff]  ;;  %v433_v45 = vld [vmem:[%s323_s29 + $0x30] sm:$0xff]  ;;  %v434_v46 = vld [vmem:[%s323_s29 + $0x38] sm:$0xff] }
  0x31   : > { %455 = vmatpush.bf16.msra.mxu0 %v450_v35  ;;  %v447_v44 = vpack.c.bf16 %v436_v43, %v435_v42  ;;  %v446_v47 = vpack.c.bf16 %v434_v46, %v433_v45  ;;  %v431_v48 = vld [vmem:[%s323_s29 + $0x20] sm:$0xff]  ;;  %v432_v49 = vld [vmem:[%s323_s29 + $0x28] sm:$0xff]  ;;  %v429_v51 = vld [vmem:[%s323_s29 + $0x10] sm:$0xff] }
  0x32   : > { %v445_v50 = vpack.c.bf16 %v432_v49, %v431_v48  ;;  %v430_v52 = vld [vmem:[%s323_s29 + $0x18] sm:$0xff]  ;;  %v427_v54 = vld [vmem:[%s323_s29] sm:$0xff]  ;;  %v428_v55 = vld [vmem:[%s323_s29 + $0x8] sm:$0xff] }
  0x33   : > { %v444_v53 = vpack.c.bf16 %v430_v52, %v429_v51  ;;  %v443_v57 = vpack.c.bf16 %v428_v55, %v427_v54  ;;  %v666_v12 = vld [vmem:[%s878_s3] ss:$0 sm:$0xff] }
  0x34   : > { %v670_v19 = vpop.eup %669 }
  0x35   : > { %v372_v20 = vmul.f32 128.0, %v670_v19  ;;  %vm376_vm0 = vweird.f32 %v670_v19  ;;  %456 = vmatpush.bf16.msra.mxu0 %v449_v38 }
  0x36   : > { %369 = vadd.xlane.f32.xlu0 %v366_v17 }
  0x37   : > { %v373_v21 = vsub.f32 1.0, %v372_v20 }
  0x39   : > { %v374_v22 = vmul.f32 %v670_v19, %v373_v21  ;;  %457 = vmatpush.bf16.msra.mxu0 %v448_v41 }
  0x3b   : > { %v375_v23 = vadd.f32 %v670_v19, %v374_v22  ;;  %v668_v22 = vld [vmem:[%s363_s24] ss:$0 sm:$0xff] }
  0x3d   : > { %v377_v24 = vsel %vm376_vm0, %v670_v19, %v375_v23  ;;  %458 = vmatpush.bf16.msra.mxu0 %v447_v44 }
  0x41   : > { %459 = vmatpush.bf16.msra.mxu0 %v446_v47 }
  0x45   : > { %460 = vmatpush.bf16.msra.mxu0 %v445_v50 }
  0x49   : > { %461 = vmatpush.bf16.msra.mxu0 %v444_v53 }
  0x4d   : > { %462 = vmatpush.bf16.msra.mxu0 %v443_v57 }
  0xa1   : > { %v368_v25 = vpop.xlane.xlu0 %367 }
  0xa2   : > { %v378_v26 = vmul.f32 %v377_v24, %v368_v25 }
  0xa4   : > { %v820_v27 = vsub.f32 %v365_v16, %v378_v26 }
  0xa6   : > { %v382_v28 = vmul.f32 %v820_v27, %v820_v27 }
  0xa8   : > { %384 = vadd.xlane.f32.xlu1 %v382_v28 }
  0xa9   : > { %v370_v29 = vpop.xlane.xlu0 %369 }
  0xaa   : > { %v379_v30 = vmul.f32 %v377_v24, %v370_v29 }
  0xac   : > { %v824_v31 = vsub.f32 %v366_v17, %v379_v30  ;;  %v667_v17 = vld [vmem:[%s879_s4] ss:$0 sm:$0xff] }
  0xae   : > { %v383_v32 = vmul.f32 %v824_v31, %v824_v31 }
  0xb0   : > { %386 = vadd.xlane.f32.xlu1 %v383_v32 }
 0x11b   : > { %v385_v56 = vpop.xlane.xlu1 %384 }
 0x11c   : > { %v388_v58 = vmul.f32 %v385_v56, %v377_v24 }
 0x11e   : > { %v390_v59 = vadd.f32 1e-05, %v388_v58 }
 0x120   : > { %671 = vrsqrt.f32 %v390_v59  ;;  %vm398_vm2 = vweird.f32 %v390_v59 }
 0x123   : > { %v387_v60 = vpop.xlane.xlu1 %386 }
 0x124   : > { %v389_v61 = vmul.f32 %v387_v60, %v377_v24 }
 0x126   : > { %v672_v62 = vpop.eup %671  ;;  %v391_v63 = vadd.f32 1e-05, %v389_v61 }
 0x127   : > { %v393_v0 = vmul.f32 %v672_v62, %v390_v59  ;;  %vm399_vm1 = vweird.f32 %v672_v62 }
 0x128   : > { %673 = vrsqrt.f32 %v391_v63  ;;  %vm400_vm3 = vmor %vm398_vm2, %vm399_vm1  ;;  %vm408_vm5 = vweird.f32 %v391_v63 }
 0x129   : > { %v394_v1 = vmul.f32 %v672_v62, %v393_v0 }
 0x12b   : > { %v395_v2 = vmul.f32 0.5, %v394_v1 }
 0x12d   : > { %v396_v3 = vsub.f32 1.5, %v395_v2 }
 0x12e   : > { %v674_v4 = vpop.eup %673 }
 0x12f   : > { %v397_v5 = vmul.f32 %v672_v62, %v396_v3  ;;  %v403_v6 = vmul.f32 %v674_v4, %v391_v63  ;;  %vm409_vm4 = vweird.f32 %v674_v4 }
 0x130   : > { %vm410_vm6 = vmor %vm408_vm5, %vm409_vm4 }
 0x131   : > { %v404_v7 = vmul.f32 %v674_v4, %v403_v6  ;;  %v401_v9 = vsel %vm400_vm3, %v672_v62, %v397_v5 }
 0x132   : > { %v412_v11 = vmul.f32 %v401_v9, %v820_v27 }
 0x133   : > { %v405_v8 = vmul.f32 0.5, %v404_v7 }
 0x134   : > { %v418_v16 = vmul.f32 %v666_v12, %v412_v11 }
 0x135   : > { %v406_v10 = vsub.f32 1.5, %v405_v8 }
 0x136   : > { %v424_v19 = vadd.f32 %v667_v17, %v418_v16 }
 0x137   : > { %v407_v13 = vmul.f32 %v674_v4, %v406_v10 }
 0x139   : > { %v411_v14 = vsel %vm410_vm6, %v674_v4, %v407_v13 }
 0x13a   : > { %v413_v15 = vmul.f32 %v411_v14, %v824_v31 }
 0x13c   : > { %v419_v18 = vmul.f32 %v666_v12, %v413_v15 }
 0x13e   : > { %v425_v20 = vadd.f32 %v667_v17, %v419_v18 }
 0x140   : > { %v426_v21 = vpack.c.bf16 %v425_v20, %v424_v19 }
 0x142   : > { %463 = vmatmul.bf16.vlgmr.msra.gmra.mxu0 %v426_v21 }
 0x1bf   : > { %v464_v23 = vpop.f32.mrf.mxu0 }
 0x1c0   : > { %v465_v24 = vadd.f32 %v668_v22, %v464_v23 }
 0x1c2   : > { %469 = vst [vmem:[%s354_s12] sm:$0xff] %v465_v24 }
 0x1c6   : > { %477 = sbr.rel (!%p781_p6) target bundleno = 467 (0x1d3), region = 82 }
 0x1c7   : > { %v466_v25 = vpop.f32.mrf.mxu0 }
 0x1c8   : > { %v467_v26 = vadd.f32 %v668_v22, %v466_v25 }
 0x1c9   : > { %v513_v27 = vld [vmem:[%s354_s12] sm:$0xff] (%p781_p6) }
 0x1ca   : > { %470 = vst [vmem:[%s354_s12 + $0x8] sm:$0xff] %v467_v26 }
 0x1cb   : > { %514 = vst [vmem:[%s482_s16] sm:$0xff] %v513_v27 }
 0x1d1   : > { %v515_v28 = vld [vmem:[%s354_s12 + $0x8] sm:$0xff] }
 0x1d2   : > { %516 = vst [vmem:[%s482_s16 + $0x18] sm:$0xff] %v515_v28 }
 0x1d3 PF: > { %s15_s22 = sadd.s32 1, %s713_s22   ;;  %s882_s18 = smov %s701_s19 }
 0x1d4   : > { %p12_p12 = scmp.ge.s32.totalorder %s15_s22, 5   ;;  %s883_s19 = smov %s786_s28 }
 0x1d5   : > { %s884_s20 = smov %s709_s21  ;;  %s885_s21 = smov %s887_s23 }
 0x1d6   :  { %14 = sbr.rel (!%p12_p12) target bundleno = 3 (0x3), region = 157 }

// kernel: encoder_forward.23
= control target key start
LH: loop header
LB: loop body
LE: loop exit
PB: predicated region body
PF: predicated region fallthrough
CT: control target
= control target key end

     0   :  { %s173_s0 = inlined_call_operand.vmem [shape: f32[16,128], index: 0, kind: input, shape index: {}]   ;;  %s174_s1 = inlined_call_operand.vmem [shape: f32[1,128], index: 1, kind: input, shape index: {}]   ;;  %s175_s2 = inlined_call_operand.vmem [shape: f32[1,128], index: 2, kind: input, shape index: {}]   ;;  %s176_s3 = inlined_call_operand.hbm [shape: f32[16,128], index: 3, kind: output, shape index: {}]  }
   0x1   :  { %v15_v0 = vld [vmem:[%s173_s0] sm:$0xff] }
   0x2   :  { %17 = vadd.xlane.f32.xlu0 %v15_v0 }
   0x3   :  { %8 = vsyncpa [#allocation3], 0  ;;  %v16_v1 = vld [vmem:[%s173_s0 + $0x8] sm:$0xff]  ;;  %v134_v2 = vmov 128.0   ;;  %v100_v31 = vld [vmem:[%s174_s1] ss:$0 sm:$0xff] }
   0x4   :  { %102 = vrcp.f32 %v134_v2  ;;  %v101_v35 = vld [vmem:[%s175_s2] ss:$0 sm:$0xff]  ;;  %s135_s1 = smov [#allocation2]   ;;  %s84_s22 = sshll.u32 %s176_s3, 4  ;;  %s85_s22 = int_to_ptr.hbm [resolvable:$true] %s84_s22 }
   0x5   :  { %s82_s19 = sshll.u32 %s135_s1, 4  ;;  %s136_s2 = smov 128   ;;  %s83_s19 = int_to_ptr.vmem [resolvable:$true] %s82_s19 }
   0x6   :  { %s137_s23 = smov 8  }
   0xa   :  { %19 = vadd.xlane.f32.xlu0 %v16_v1  ;;  %v103_v3 = vpop.eup %102 }
   0xb   :  { %v22_v4 = vmul.f32 128.0, %v103_v3  ;;  %vm26_vm0 = vweird.f32 %v103_v3 }
   0xd   :  { %v23_v5 = vsub.f32 1.0, %v22_v4 }
   0xf   :  { %v24_v6 = vmul.f32 %v103_v3, %v23_v5 }
  0x11   :  { %v25_v7 = vadd.f32 %v103_v3, %v24_v6 }
  0x13   :  { %v27_v8 = vsel %vm26_vm0, %v103_v3, %v25_v7 }
  0x75   :  { %v18_v9 = vpop.xlane.xlu0 %17 }
  0x76   :  { %v28_v10 = vmul.f32 %v27_v8, %v18_v9 }
  0x78   :  { %v30_v11 = vsub.f32 %v15_v0, %v28_v10 }
  0x7a   :  { %v32_v12 = vmul.f32 %v30_v11, %v30_v11 }
  0x7c   :  { %34 = vadd.xlane.f32.xlu1 %v32_v12 }
  0x7d   :  { %v20_v13 = vpop.xlane.xlu0 %19 }
  0x7e   :  { %v29_v14 = vmul.f32 %v27_v8, %v20_v13 }
  0x80   :  { %v31_v15 = vsub.f32 %v16_v1, %v29_v14 }
  0x82   :  { %v33_v16 = vmul.f32 %v31_v15, %v31_v15 }
  0x84   :  { %36 = vadd.xlane.f32.xlu1 %v33_v16 }
  0xef   :  { %v35_v17 = vpop.xlane.xlu1 %34 }
  0xf0   :  { %v38_v18 = vmul.f32 %v35_v17, %v27_v8 }
  0xf2   :  { %v40_v19 = vadd.f32 1e-05, %v38_v18 }
  0xf4   :  { %104 = vrsqrt.f32 %v40_v19  ;;  %vm48_vm2 = vweird.f32 %v40_v19 }
  0xf7   :  { %v37_v20 = vpop.xlane.xlu1 %36 }
  0xf8   :  { %v39_v21 = vmul.f32 %v37_v20, %v27_v8 }
  0xfa   :  { %v105_v22 = vpop.eup %104  ;;  %v41_v23 = vadd.f32 1e-05, %v39_v21 }
  0xfb   :  { %v43_v24 = vmul.f32 %v105_v22, %v40_v19  ;;  %vm49_vm1 = vweird.f32 %v105_v22 }
  0xfc   :  { %106 = vrsqrt.f32 %v41_v23  ;;  %vm50_vm3 = vmor %vm48_vm2, %vm49_vm1  ;;  %vm58_vm5 = vweird.f32 %v41_v23 }
  0xfd   :  { %v44_v25 = vmul.f32 %v105_v22, %v43_v24 }
  0xff   :  { %v45_v26 = vmul.f32 0.5, %v44_v25 }
 0x101   :  { %v46_v27 = vsub.f32 1.5, %v45_v26 }
 0x102   :  { %v107_v28 = vpop.eup %106 }
 0x103   :  { %v47_v29 = vmul.f32 %v105_v22, %v46_v27  ;;  %v53_v30 = vmul.f32 %v107_v28, %v41_v23  ;;  %vm59_vm4 = vweird.f32 %v107_v28 }
 0x104   :  { %vm60_vm6 = vmor %vm58_vm5, %vm59_vm4 }
 0x105   :  { %v51_v32 = vsel %vm50_vm3, %v105_v22, %v47_v29  ;;  %v54_v33 = vmul.f32 %v107_v28, %v53_v30 }
 0x106   :  { %v62_v34 = vmul.f32 %v51_v32, %v30_v11 }
 0x107   :  { %v55_v36 = vmul.f32 0.5, %v54_v33 }
 0x108   :  { %v68_v37 = vmul.f32 %v100_v31, %v62_v34 }
 0x109   :  { %v56_v38 = vsub.f32 1.5, %v55_v36 }
 0x10a   :  { %v74_v39 = vadd.f32 %v101_v35, %v68_v37 }
 0x10b   :  { %v57_v40 = vmul.f32 %v107_v28, %v56_v38 }
 0x10c   :  { %76 = vst [vmem:[#allocation2] sm:$0xff] %v74_v39 }
 0x10d   :  { %v61_v41 = vsel %vm60_vm6, %v107_v28, %v57_v40 }
 0x10e   :  { %v63_v42 = vmul.f32 %v61_v41, %v31_v15 }
 0x110   :  { %v69_v43 = vmul.f32 %v100_v31, %v63_v42 }
 0x112   :  { %v75_v44 = vadd.f32 %v101_v35, %v69_v43 }
 0x114   :  { %77 = vst [vmem:[#allocation2 + $0x8] sm:$0xff] %v75_v44 }
 0x115   :  { %90 = dma.vmem_to_hbm [thread:$0]  %s83_s19, 256, %s85_s22, [#allocation3], %s136_s2, %s136_s2, %s137_s23  }
 0x116   :  { %132 = dma.done.wait [#allocation3], 256  }
 0x117   :  { %133 = vsyncadd [#allocation3], 4294967040 }
 0x118   :  { %95 = vsyncpa [#allocation3], 1 }

// kernel: encoder_forward.21
= control target key start
LH: loop header
LB: loop body
LE: loop exit
PB: predicated region body
PF: predicated region fallthrough
CT: control target
= control target key end

     0   :  { %s938_s18 = smov 0   ;;  %s940_s19 = smov 0   ;;  %s1262_s0 = inlined_call_operand.vmem [shape: f32[16,128], index: 0, kind: input, shape index: {}]   ;;  %s1263_s1 = inlined_call_operand.vmem [shape: f32[128,2048], index: 1, kind: input, shape index: {}]   ;;  %s1264_s2 = inlined_call_operand.vmem [shape: f32[1,2048], index: 2, kind: input, shape index: {}]   ;;  %s1265_s3 = inlined_call_operand.vmem [shape: f32[1,128], index: 3, kind: input, shape index: {}]   ;;  %s1266_s4 = inlined_call_operand.vmem [shape: f32[1,128], index: 4, kind: input, shape index: {}]   ;;  %s1267_s5 = inlined_call_operand.vmem [shape: f32[16,2048], index: 5, kind: output, shape index: {}]  }
   0x1   :  { %s942_s20 = smov 0   ;;  %s944_s21 = smov 0  }
   0x2   :  { %s946_s22 = smov 0  }
   0x3 LB: > { %s24_s23 = sadd.s32 1, %s901_s21  ;;  %s799_s24 = sadd.s32 4294967295, %s905_s22   ;;  %s905_s22 = sphi %s946_s22, %s15_s22   ;;  %s901_s21 = sphi %s944_s21, %s1272_s21   ;;  %s897_s20 = sphi %s942_s20, %s1271_s20   ;;  %s893_s19 = sphi %s940_s19, %s1270_s19   ;;  %s889_s18 = sphi %s938_s18, %s1269_s18  }
   0x4   : > { %p25_p0 = scmp.ge.s32.totalorder %s24_s23, 4  ;;  %p67_p1 = scmp.ne.s32.totalorder %s893_s19, %s889_s18 }
   0x5   : > { %p68_p2 = scmp.eq.s32.totalorder %s905_s22, 0  ;;  %p167_p4 = scmp.eq.s32.totalorder %s799_s24, 3 }
   0x6   : > { %s1274_s23 = smov (%p25_p0, %s24_s23), 0  ;;  %s60_s26 = sadd.s32 1, %s893_s19 }
   0x7   : > { %p69_p3 = por %p68_p2, %p67_p1  ;;  %s57_s25 = ssub.s32 %s901_s21, %s1274_s23 }
   0x8   : > { %p58_p5 = scmp.eq.s32.totalorder %s57_s25, 0  ;;  %p973_p6 = por %p167_p4, %p67_p1 }
   0x9   : > { %p803_p7 = scmp.ge.s32.totalorder %s905_s22, 4 }
   0xa   : > { %s978_s28 = scalar_select %p58_p5, %s893_s19, %s60_s26  }
   0xb   : > { %204 = sbr.rel (%p803_p7) target bundleno = 84 (0x54), region = 28 }
  0x10   : > { %207 = sbr.rel (!%p69_p3) target bundleno = 84 (0x54), region = 32  ;;  %s209_s29 = sand.u32 (%p69_p3), 1, %s893_s19  }
  0x11   : > { %s816_s30 = sshll.u32 (%p69_p3), %s901_s21, 5  ;;  %s804_s6 = sshll.u32 (%p69_p3), %s209_s29, 9 }
  0x12   : > { %s986_s9 = scalar_lea.vmem (%p69_p3), %s1263_s1, %s816_s30  ;;  %s991_s10 = scalar_lea.vmem (%p69_p3), [#allocation2], %s804_s6 }
  0x13   : > { %v227_v0 = vld [vmem:[%s986_s9] sm:$0xff] (%p69_p3)  ;;  %v229_v1 = vld [vmem:[%s986_s9 + $0x8] sm:$0xff] (%p69_p3)  ;;  %v231_v2 = vld [vmem:[%s986_s9 + $0x10] sm:$0xff] (%p69_p3) }
  0x14   : > { %228 = vst [vmem:[%s991_s10] sm:$0xff] (%p69_p3), %v227_v0  ;;  %v233_v3 = vld [vmem:[%s986_s9 + $0x18] sm:$0xff] (%p69_p3)  ;;  %v235_v4 = vld [vmem:[%s986_s9 + $0x80] sm:$0xff] (%p69_p3)  ;;  %v237_v5 = vld [vmem:[%s986_s9 + $0x88] sm:$0xff] (%p69_p3) }
  0x15   : > { %230 = vst [vmem:[%s991_s10 + $0x8] sm:$0xff] %v229_v1  ;;  %v239_v6 = vld [vmem:[%s986_s9 + $0x90] sm:$0xff]  ;;  %v241_v7 = vld [vmem:[%s986_s9 + $0x98] sm:$0xff]  ;;  %v243_v8 = vld [vmem:[%s986_s9 + $0x100] sm:$0xff] }
  0x16   : > { %232 = vst [vmem:[%s991_s10 + $0x10] sm:$0xff] %v231_v2  ;;  %v245_v9 = vld [vmem:[%s986_s9 + $0x108] sm:$0xff]  ;;  %v247_v10 = vld [vmem:[%s986_s9 + $0x110] sm:$0xff]  ;;  %v249_v11 = vld [vmem:[%s986_s9 + $0x118] sm:$0xff] }
  0x17   : > { %234 = vst [vmem:[%s991_s10 + $0x18] sm:$0xff] %v233_v3  ;;  %v251_v12 = vld [vmem:[%s986_s9 + $0x180] sm:$0xff]  ;;  %v253_v13 = vld [vmem:[%s986_s9 + $0x188] sm:$0xff]  ;;  %v255_v14 = vld [vmem:[%s986_s9 + $0x190] sm:$0xff] }
  0x18   : > { %236 = vst [vmem:[%s991_s10 + $0x20] sm:$0xff] %v235_v4  ;;  %v257_v15 = vld [vmem:[%s986_s9 + $0x198] sm:$0xff]  ;;  %v259_v16 = vld [vmem:[%s986_s9 + $0x200] sm:$0xff]  ;;  %v261_v17 = vld [vmem:[%s986_s9 + $0x208] sm:$0xff] }
  0x19   : > { %238 = vst [vmem:[%s991_s10 + $0x28] sm:$0xff] %v237_v5  ;;  %v263_v18 = vld [vmem:[%s986_s9 + $0x210] sm:$0xff]  ;;  %v265_v19 = vld [vmem:[%s986_s9 + $0x218] sm:$0xff]  ;;  %v267_v20 = vld [vmem:[%s986_s9 + $0x280] sm:$0xff] }
  0x1a   : > { %240 = vst [vmem:[%s991_s10 + $0x30] sm:$0xff] %v239_v6  ;;  %v269_v21 = vld [vmem:[%s986_s9 + $0x288] sm:$0xff]  ;;  %v271_v22 = vld [vmem:[%s986_s9 + $0x290] sm:$0xff]  ;;  %v273_v23 = vld [vmem:[%s986_s9 + $0x298] sm:$0xff] }
  0x1b   : > { %242 = vst [vmem:[%s991_s10 + $0x38] sm:$0xff] %v241_v7  ;;  %v275_v24 = vld [vmem:[%s986_s9 + $0x300] sm:$0xff]  ;;  %v277_v25 = vld [vmem:[%s986_s9 + $0x308] sm:$0xff]  ;;  %v279_v26 = vld [vmem:[%s986_s9 + $0x310] sm:$0xff] }
  0x1c   : > { %244 = vst [vmem:[%s991_s10 + $0x40] sm:$0xff] %v243_v8  ;;  %v281_v27 = vld [vmem:[%s986_s9 + $0x318] sm:$0xff]  ;;  %v283_v28 = vld [vmem:[%s986_s9 + $0x380] sm:$0xff]  ;;  %v285_v29 = vld [vmem:[%s986_s9 + $0x388] sm:$0xff] }
  0x1d   : > { %246 = vst [vmem:[%s991_s10 + $0x48] sm:$0xff] %v245_v9  ;;  %v287_v30 = vld [vmem:[%s986_s9 + $0x390] sm:$0xff]  ;;  %v289_v31 = vld [vmem:[%s986_s9 + $0x398] sm:$0xff]  ;;  %v291_v32 = vld [vmem:[%s986_s9 + $0x400] sm:$0xff] }
  0x1e   : > { %248 = vst [vmem:[%s991_s10 + $0x50] sm:$0xff] %v247_v10  ;;  %v293_v33 = vld [vmem:[%s986_s9 + $0x408] sm:$0xff]  ;;  %v295_v34 = vld [vmem:[%s986_s9 + $0x410] sm:$0xff]  ;;  %v297_v35 = vld [vmem:[%s986_s9 + $0x418] sm:$0xff] }
  0x1f   : > { %250 = vst [vmem:[%s991_s10 + $0x58] sm:$0xff] %v249_v11  ;;  %v299_v36 = vld [vmem:[%s986_s9 + $0x480] sm:$0xff]  ;;  %v301_v37 = vld [vmem:[%s986_s9 + $0x488] sm:$0xff]  ;;  %v303_v38 = vld [vmem:[%s986_s9 + $0x490] sm:$0xff] }
  0x20   : > { %252 = vst [vmem:[%s991_s10 + $0x60] sm:$0xff] %v251_v12  ;;  %v305_v39 = vld [vmem:[%s986_s9 + $0x498] sm:$0xff]  ;;  %v307_v40 = vld [vmem:[%s986_s9 + $0x500] sm:$0xff]  ;;  %v309_v41 = vld [vmem:[%s986_s9 + $0x508] sm:$0xff] }
  0x21   : > { %254 = vst [vmem:[%s991_s10 + $0x68] sm:$0xff] %v253_v13  ;;  %v311_v42 = vld [vmem:[%s986_s9 + $0x510] sm:$0xff]  ;;  %v313_v43 = vld [vmem:[%s986_s9 + $0x518] sm:$0xff]  ;;  %v315_v44 = vld [vmem:[%s986_s9 + $0x580] sm:$0xff] }
  0x22   : > { %256 = vst [vmem:[%s991_s10 + $0x70] sm:$0xff] %v255_v14  ;;  %v317_v45 = vld [vmem:[%s986_s9 + $0x588] sm:$0xff]  ;;  %v319_v46 = vld [vmem:[%s986_s9 + $0x590] sm:$0xff]  ;;  %v321_v47 = vld [vmem:[%s986_s9 + $0x598] sm:$0xff] }
  0x23   : > { %258 = vst [vmem:[%s991_s10 + $0x78] sm:$0xff] %v257_v15  ;;  %v323_v48 = vld [vmem:[%s986_s9 + $0x600] sm:$0xff]  ;;  %v325_v49 = vld [vmem:[%s986_s9 + $0x608] sm:$0xff]  ;;  %v327_v50 = vld [vmem:[%s986_s9 + $0x610] sm:$0xff] }
  0x24   : > { %260 = vst [vmem:[%s991_s10 + $0x80] sm:$0xff] %v259_v16  ;;  %v329_v51 = vld [vmem:[%s986_s9 + $0x618] sm:$0xff]  ;;  %v331_v52 = vld [vmem:[%s986_s9 + $0x680] sm:$0xff]  ;;  %v333_v53 = vld [vmem:[%s986_s9 + $0x688] sm:$0xff] }
  0x25   : > { %262 = vst [vmem:[%s991_s10 + $0x88] sm:$0xff] %v261_v17  ;;  %v335_v54 = vld [vmem:[%s986_s9 + $0x690] sm:$0xff]  ;;  %v337_v55 = vld [vmem:[%s986_s9 + $0x698] sm:$0xff]  ;;  %v339_v56 = vld [vmem:[%s986_s9 + $0x700] sm:$0xff] }
  0x26   : > { %264 = vst [vmem:[%s991_s10 + $0x90] sm:$0xff] %v263_v18  ;;  %v341_v57 = vld [vmem:[%s986_s9 + $0x708] sm:$0xff]  ;;  %v343_v58 = vld [vmem:[%s986_s9 + $0x710] sm:$0xff]  ;;  %v345_v59 = vld [vmem:[%s986_s9 + $0x718] sm:$0xff] }
  0x27   : > { %266 = vst [vmem:[%s991_s10 + $0x98] sm:$0xff] %v265_v19  ;;  %v347_v60 = vld [vmem:[%s986_s9 + $0x780] sm:$0xff]  ;;  %v349_v61 = vld [vmem:[%s986_s9 + $0x788] sm:$0xff]  ;;  %v351_v62 = vld [vmem:[%s986_s9 + $0x790] sm:$0xff] }
  0x28   : > { %268 = vst [vmem:[%s991_s10 + $0xa0] sm:$0xff] %v267_v20  ;;  %v353_v63 = vld [vmem:[%s986_s9 + $0x798] sm:$0xff] }
  0x29   : > { %270 = vst [vmem:[%s991_s10 + $0xa8] sm:$0xff] %v269_v21 }
  0x2a   : > { %272 = vst [vmem:[%s991_s10 + $0xb0] sm:$0xff] %v271_v22 }
  0x2b   : > { %274 = vst [vmem:[%s991_s10 + $0xb8] sm:$0xff] %v273_v23 }
  0x2c   : > { %276 = vst [vmem:[%s991_s10 + $0xc0] sm:$0xff] %v275_v24 }
  0x2d   : > { %278 = vst [vmem:[%s991_s10 + $0xc8] sm:$0xff] %v277_v25 }
  0x2e   : > { %280 = vst [vmem:[%s991_s10 + $0xd0] sm:$0xff] %v279_v26 }
  0x2f   : > { %282 = vst [vmem:[%s991_s10 + $0xd8] sm:$0xff] %v281_v27 }
  0x30   : > { %284 = vst [vmem:[%s991_s10 + $0xe0] sm:$0xff] %v283_v28 }
  0x31   : > { %286 = vst [vmem:[%s991_s10 + $0xe8] sm:$0xff] %v285_v29 }
  0x32   : > { %288 = vst [vmem:[%s991_s10 + $0xf0] sm:$0xff] %v287_v30 }
  0x33   : > { %290 = vst [vmem:[%s991_s10 + $0xf8] sm:$0xff] %v289_v31 }
  0x34   : > { %292 = vst [vmem:[%s991_s10 + $0x100] sm:$0xff] %v291_v32 }
  0x35   : > { %294 = vst [vmem:[%s991_s10 + $0x108] sm:$0xff] %v293_v33 }
  0x36   : > { %296 = vst [vmem:[%s991_s10 + $0x110] sm:$0xff] %v295_v34 }
  0x37   : > { %298 = vst [vmem:[%s991_s10 + $0x118] sm:$0xff] %v297_v35 }
  0x38   : > { %300 = vst [vmem:[%s991_s10 + $0x120] sm:$0xff] %v299_v36 }
  0x39   : > { %302 = vst [vmem:[%s991_s10 + $0x128] sm:$0xff] %v301_v37 }
  0x3a   : > { %304 = vst [vmem:[%s991_s10 + $0x130] sm:$0xff] %v303_v38 }
  0x3b   : > { %306 = vst [vmem:[%s991_s10 + $0x138] sm:$0xff] %v305_v39 }
  0x3c   : > { %308 = vst [vmem:[%s991_s10 + $0x140] sm:$0xff] %v307_v40 }
  0x3d   : > { %310 = vst [vmem:[%s991_s10 + $0x148] sm:$0xff] %v309_v41 }
  0x3e   : > { %312 = vst [vmem:[%s991_s10 + $0x150] sm:$0xff] %v311_v42 }
  0x3f   : > { %314 = vst [vmem:[%s991_s10 + $0x158] sm:$0xff] %v313_v43 }
  0x40   : > { %316 = vst [vmem:[%s991_s10 + $0x160] sm:$0xff] %v315_v44 }
  0x41   : > { %318 = vst [vmem:[%s991_s10 + $0x168] sm:$0xff] %v317_v45 }
  0x42   : > { %320 = vst [vmem:[%s991_s10 + $0x170] sm:$0xff] %v319_v46 }
  0x43   : > { %322 = vst [vmem:[%s991_s10 + $0x178] sm:$0xff] %v321_v47 }
  0x44   : > { %324 = vst [vmem:[%s991_s10 + $0x180] sm:$0xff] %v323_v48 }
  0x45   : > { %326 = vst [vmem:[%s991_s10 + $0x188] sm:$0xff] %v325_v49 }
  0x46   : > { %328 = vst [vmem:[%s991_s10 + $0x190] sm:$0xff] %v327_v50 }
  0x47   : > { %330 = vst [vmem:[%s991_s10 + $0x198] sm:$0xff] %v329_v51 }
  0x48   : > { %332 = vst [vmem:[%s991_s10 + $0x1a0] sm:$0xff] %v331_v52 }
  0x49   : > { %334 = vst [vmem:[%s991_s10 + $0x1a8] sm:$0xff] %v333_v53 }
  0x4a   : > { %336 = vst [vmem:[%s991_s10 + $0x1b0] sm:$0xff] %v335_v54 }
  0x4b   : > { %338 = vst [vmem:[%s991_s10 + $0x1b8] sm:$0xff] %v337_v55 }
  0x4c   : > { %340 = vst [vmem:[%s991_s10 + $0x1c0] sm:$0xff] %v339_v56 }
  0x4d   : > { %342 = vst [vmem:[%s991_s10 + $0x1c8] sm:$0xff] %v341_v57 }
  0x4e   : > { %344 = vst [vmem:[%s991_s10 + $0x1d0] sm:$0xff] %v343_v58 }
  0x4f   : > { %346 = vst [vmem:[%s991_s10 + $0x1d8] sm:$0xff] %v345_v59 }
  0x50   : > { %348 = vst [vmem:[%s991_s10 + $0x1e0] sm:$0xff] %v347_v60 }
  0x51   : > { %350 = vst [vmem:[%s991_s10 + $0x1e8] sm:$0xff] %v349_v61 }
  0x52   : > { %352 = vst [vmem:[%s991_s10 + $0x1f0] sm:$0xff] %v351_v62 }
  0x53   : > { %354 = vst [vmem:[%s991_s10 + $0x1f8] sm:$0xff] %v353_v63 }
  0x54 PF: > { %p807_p8 = scmp.ge.s32.totalorder %s905_s22, 1  ;;  %p367_p9 = scmp.lt.s32.totalorder %s905_s22, 5 }
  0x56   : > { %p368_p10 = pnand %p807_p8, %p367_p9 }
  0x57   : > { %s374_s15 = sand.u32 (!%p368_p10), 1, %s889_s18   ;;  %s810_s30 = sshll.u32 (!%p368_p10), %s897_s20, 2 }
  0x58   : > { %371 = sbr.rel (%p368_p10) target bundleno = 525 (0x20d), region = 59  ;;  %s808_s16 = sshll.u32 (!%p368_p10), %s374_s15, 9 }
  0x59   : > { %s1141_s17 = scalar_lea.vmem (!%p368_p10), [#allocation2], %s808_s16  ;;  %p417_p11 = scmp.lt.s32.totalorder (!%p368_p10), %s810_s30, 15 }
  0x5a   : > { %s809_s9 = sshll.u32 (!%p368_p10), %s374_s15, 6 }
  0x5b   : > { %s1223_s10 = scalar_lea.vmem (!%p368_p10), [#allocation3], %s809_s9 }
  0x5d   : > { %v423_v0 = vld [vmem:[%s1262_s0] sm:$0xff]  ;;  %v424_v1 = vld [vmem:[%s1262_s0 + $0x8] sm:$0xff]  ;;  %v907_v2 = vmov 128.0   ;;  %v543_v22 = vld [vmem:[%s1141_s17 + $0x1d0] sm:$0xff]  ;;  %s1276_s30 = smov (!%p417_p11, %s810_s30), 15  ;;  %s817_s18 = sshll.u32 (%p973_p6), %s897_s20, 5 }
  0x5e   : > { %425 = vadd.xlane.f32.xlu0 %v423_v0  ;;  %861 = vrcp.f32 %v907_v2  ;;  %v541_v17 = vld [vmem:[%s1141_s17 + $0x1c0] sm:$0xff]  ;;  %v542_v19 = vld [vmem:[%s1141_s17 + $0x1c8] sm:$0xff]  ;;  %v547_v23 = vld [vmem:[%s1141_s17 + $0x1f0] sm:$0xff]  ;;  %s419_s8 = scalar_lea.vmem %s1264_s2, %s1276_s30  ;;  %s675_s13 = scalar_lea.vmem (%p973_p6), %s1267_s5, %s817_s18 }
  0x5f   : > { %v545_v18 = vld [vmem:[%s1141_s17 + $0x1e0] sm:$0xff]  ;;  %v546_v21 = vld [vmem:[%s1141_s17 + $0x1e8] sm:$0xff]  ;;  %v579_v25 = vpack.c.bf16 %v547_v23, %v543_v22  ;;  %v544_v26 = vld [vmem:[%s1141_s17 + $0x1d8] sm:$0xff] }
  0x60   : > { %v577_v20 = vpack.c.bf16 %v545_v18, %v541_v17  ;;  %v578_v24 = vpack.c.bf16 %v546_v21, %v542_v19  ;;  %v548_v27 = vld [vmem:[%s1141_s17 + $0x1f8] sm:$0xff]  ;;  %v533_v29 = vld [vmem:[%s1141_s17 + $0x180] sm:$0xff]  ;;  %v534_v31 = vld [vmem:[%s1141_s17 + $0x188] sm:$0xff] }
  0x61   : > { %v580_v28 = vpack.c.bf16 %v548_v27, %v544_v26  ;;  %619 = vmatpush.bf16.msra.mxu2 %v579_v25  ;;  %v537_v30 = vld [vmem:[%s1141_s17 + $0x1a0] sm:$0xff]  ;;  %v538_v33 = vld [vmem:[%s1141_s17 + $0x1a8] sm:$0xff]  ;;  %v535_v34 = vld [vmem:[%s1141_s17 + $0x190] sm:$0xff] }
  0x62   : > { %591 = vmatpush.bf16.msra.mxu0 %v577_v20  ;;  %605 = vmatpush.bf16.msra.mxu1 %v578_v24  ;;  %v573_v32 = vpack.c.bf16 %v537_v30, %v533_v29  ;;  %v539_v35 = vld [vmem:[%s1141_s17 + $0x1b0] sm:$0xff]  ;;  %v574_v36 = vpack.c.bf16 %v538_v33, %v534_v31  ;;  %v536_v38 = vld [vmem:[%s1141_s17 + $0x198] sm:$0xff]  ;;  %v525_v41 = vld [vmem:[%s1141_s17 + $0x140] sm:$0xff] }
  0x63   : > { %633 = vmatpush.bf16.msra.mxu3 %v580_v28  ;;  %v575_v37 = vpack.c.bf16 %v539_v35, %v535_v34  ;;  %v540_v39 = vld [vmem:[%s1141_s17 + $0x1b8] sm:$0xff]  ;;  %v529_v42 = vld [vmem:[%s1141_s17 + $0x160] sm:$0xff]  ;;  %v526_v43 = vld [vmem:[%s1141_s17 + $0x148] sm:$0xff] }
  0x64   : > { %v862_v3 = vpop.eup %861  ;;  %v576_v40 = vpack.c.bf16 %v540_v39, %v536_v38  ;;  %v569_v44 = vpack.c.bf16 %v529_v42, %v525_v41  ;;  %v530_v45 = vld [vmem:[%s1141_s17 + $0x168] sm:$0xff]  ;;  %v527_v46 = vld [vmem:[%s1141_s17 + $0x150] sm:$0xff]  ;;  %v528_v50 = vld [vmem:[%s1141_s17 + $0x158] sm:$0xff] }
  0x65   : > { %v430_v4 = vmul.f32 128.0, %v862_v3  ;;  %vm434_vm0 = vweird.f32 %v862_v3  ;;  %620 = vmatpush.bf16.msra.mxu2 %v575_v37  ;;  %v531_v47 = vld [vmem:[%s1141_s17 + $0x170] sm:$0xff]  ;;  %v570_v48 = vpack.c.bf16 %v530_v45, %v526_v43  ;;  %v532_v51 = vld [vmem:[%s1141_s17 + $0x178] sm:$0xff]  ;;  %v517_v53 = vld [vmem:[%s1141_s17 + $0x100] sm:$0xff] }
  0x66   : > { %427 = vadd.xlane.f32.xlu0 %v424_v1  ;;  %592 = vmatpush.bf16.msra.mxu0 %v573_v32  ;;  %v571_v49 = vpack.c.bf16 %v531_v47, %v527_v46  ;;  %v572_v52 = vpack.c.bf16 %v532_v51, %v528_v50  ;;  %v521_v54 = vld [vmem:[%s1141_s17 + $0x120] sm:$0xff]  ;;  %v518_v55 = vld [vmem:[%s1141_s17 + $0x108] sm:$0xff]  ;;  %v519_v58 = vld [vmem:[%s1141_s17 + $0x110] sm:$0xff] }
  0x67   : > { %v431_v5 = vsub.f32 1.0, %v430_v4  ;;  %606 = vmatpush.bf16.msra.mxu1 %v574_v36  ;;  %634 = vmatpush.bf16.msra.mxu3 %v576_v40  ;;  %v565_v56 = vpack.c.bf16 %v521_v54, %v517_v53  ;;  %v522_v57 = vld [vmem:[%s1141_s17 + $0x128] sm:$0xff]  ;;  %v523_v59 = vld [vmem:[%s1141_s17 + $0x130] sm:$0xff]  ;;  %v520_v62 = vld [vmem:[%s1141_s17 + $0x118] sm:$0xff] }
  0x68   : > { %v566_v60 = vpack.c.bf16 %v522_v57, %v518_v55  ;;  %v567_v61 = vpack.c.bf16 %v523_v59, %v519_v58  ;;  %v524_v63 = vld [vmem:[%s1141_s17 + $0x138] sm:$0xff]  ;;  %v513_v2 = vld [vmem:[%s1141_s17 + $0xe0] sm:$0xff]  ;;  %v502_v18 = vld [vmem:[%s1141_s17 + $0x88] sm:$0xff] }
  0x69   : > { %v432_v6 = vmul.f32 %v862_v3, %v431_v5  ;;  %621 = vmatpush.bf16.msra.mxu2 %v571_v49  ;;  %v514_v5 = vld [vmem:[%s1141_s17 + $0xe8] sm:$0xff]  ;;  %v505_v17 = vld [vmem:[%s1141_s17 + $0xa0] sm:$0xff]  ;;  %v503_v21 = vld [vmem:[%s1141_s17 + $0x90] sm:$0xff] }
  0x6a   : > { %593 = vmatpush.bf16.msra.mxu0 %v569_v44  ;;  %v506_v20 = vld [vmem:[%s1141_s17 + $0xa8] sm:$0xff]  ;;  %v507_v22 = vld [vmem:[%s1141_s17 + $0xb0] sm:$0xff]  ;;  %v504_v25 = vld [vmem:[%s1141_s17 + $0x98] sm:$0xff] }
  0x6b   : > { %v433_v7 = vadd.f32 %v862_v3, %v432_v6  ;;  %607 = vmatpush.bf16.msra.mxu1 %v570_v48  ;;  %635 = vmatpush.bf16.msra.mxu3 %v572_v52  ;;  %v511_v6 = vld [vmem:[%s1141_s17 + $0xd0] sm:$0xff]  ;;  %v558_v23 = vpack.c.bf16 %v506_v20, %v502_v18  ;;  %v559_v24 = vpack.c.bf16 %v507_v22, %v503_v21  ;;  %v508_v26 = vld [vmem:[%s1141_s17 + $0xb8] sm:$0xff]  ;;  %v493_v28 = vld [vmem:[%s1141_s17 + $0x40] sm:$0xff] }
  0x6c   : > { %v560_v27 = vpack.c.bf16 %v508_v26, %v504_v25  ;;  %v497_v29 = vld [vmem:[%s1141_s17 + $0x60] sm:$0xff]  ;;  %v494_v30 = vld [vmem:[%s1141_s17 + $0x48] sm:$0xff]  ;;  %v495_v33 = vld [vmem:[%s1141_s17 + $0x50] sm:$0xff] }
  0x6d   : > { %v1126_v8 = vsel %vm434_vm0, %v862_v3, %v433_v7  ;;  %622 = vmatpush.bf16.msra.mxu2 %v567_v61  ;;  %v510_v3 = vld [vmem:[%s1141_s17 + $0xc8] sm:$0xff]  ;;  %v515_v7 = vld [vmem:[%s1141_s17 + $0xf0] sm:$0xff]  ;;  %v553_v31 = vpack.c.bf16 %v497_v29, %v493_v28  ;;  %v496_v37 = vld [vmem:[%s1141_s17 + $0x58] sm:$0xff] }
  0x6e   : > { %594 = vmatpush.bf16.msra.mxu0 %v565_v56  ;;  %v498_v32 = vld [vmem:[%s1141_s17 + $0x68] sm:$0xff]  ;;  %v499_v34 = vld [vmem:[%s1141_s17 + $0x70] sm:$0xff]  ;;  %v500_v38 = vld [vmem:[%s1141_s17 + $0x78] sm:$0xff] }
  0x6f   : > { %608 = vmatpush.bf16.msra.mxu1 %v566_v60  ;;  %v554_v35 = vpack.c.bf16 %v498_v32, %v494_v30  ;;  %v555_v36 = vpack.c.bf16 %v499_v34, %v495_v33  ;;  %v485_v39 = vld [vmem:[%s1141_s17] sm:$0xff]  ;;  %v556_v41 = vpack.c.bf16 %v500_v38, %v496_v37  ;;  %v486_v43 = vld [vmem:[%s1141_s17 + $0x8] sm:$0xff]  ;;  %v487_v48 = vld [vmem:[%s1141_s17 + $0x10] sm:$0xff] }
  0x70   : > { %v489_v42 = vld [vmem:[%s1141_s17 + $0x20] sm:$0xff]  ;;  %v490_v44 = vld [vmem:[%s1141_s17 + $0x28] sm:$0xff]  ;;  %v491_v49 = vld [vmem:[%s1141_s17 + $0x30] sm:$0xff] }
  0x71   : > { %v549_v46 = vpack.c.bf16 %v489_v42, %v485_v39  ;;  %v550_v47 = vpack.c.bf16 %v490_v44, %v486_v43  ;;  %v488_v50 = vld [vmem:[%s1141_s17 + $0x18] sm:$0xff]  ;;  %v551_v51 = vpack.c.bf16 %v491_v49, %v487_v48 }
  0x72   : > { %v492_v52 = vld [vmem:[%s1141_s17 + $0x38] sm:$0xff] }
  0x73   : > { %v552_v54 = vpack.c.bf16 %v492_v52, %v488_v50 }
  0xd1   : > { %v426_v9 = vpop.xlane.xlu0 %425 }
  0xd2   : > { %v436_v10 = vmul.f32 %v1126_v8, %v426_v9  ;;  %v562_v9 = vpack.c.bf16 %v514_v5, %v510_v3 }
  0xd4   : > { %v1129_v11 = vsub.f32 %v423_v0, %v436_v10  ;;  %v568_v0 = vpack.c.bf16 %v524_v63, %v520_v62  ;;  %v563_v10 = vpack.c.bf16 %v515_v7, %v511_v6  ;;  %609 = vmatpush.bf16.msra.mxu1 %v562_v9  ;;  %v859_v6 = vld [vmem:[%s1265_s3] ss:$0 sm:$0xff] }
  0xd6   : > { %v440_v12 = vmul.f32 %v1129_v11, %v1129_v11  ;;  %636 = vmatpush.bf16.msra.mxu3 %v568_v0  ;;  %623 = vmatpush.bf16.msra.mxu2 %v563_v10 }
  0xd8   : > { %442 = vadd.xlane.f32.xlu1 %v440_v12  ;;  %v512_v12 = vld [vmem:[%s1141_s17 + $0xd8] sm:$0xff]  ;;  %610 = vmatpush.bf16.msra.mxu1 %v558_v23 }
  0xd9   : > { %v428_v13 = vpop.xlane.xlu0 %427 }
  0xda   : > { %v437_v14 = vmul.f32 %v1126_v8, %v428_v13  ;;  %v516_v13 = vld [vmem:[%s1141_s17 + $0xf8] sm:$0xff]  ;;  %624 = vmatpush.bf16.msra.mxu2 %v559_v24 }
  0xdc   : > { %v1134_v15 = vsub.f32 %v424_v1, %v437_v14  ;;  %v509_v1 = vld [vmem:[%s1141_s17 + $0xc0] sm:$0xff]  ;;  %v564_v14 = vpack.c.bf16 %v516_v13, %v512_v12  ;;  %611 = vmatpush.bf16.msra.mxu1 %v554_v35 }
  0xdd   : > { %v561_v4 = vpack.c.bf16 %v513_v2, %v509_v1  ;;  %v860_v13 = vld [vmem:[%s1266_s4] ss:$0 sm:$0xff] }
  0xde   : > { %v441_v16 = vmul.f32 %v1134_v15, %v1134_v15  ;;  %637 = vmatpush.bf16.msra.mxu3 %v564_v14  ;;  %625 = vmatpush.bf16.msra.mxu2 %v555_v36 }
  0xdf   : > { %595 = vmatpush.bf16.msra.mxu0 %v561_v4 }
  0xe0   : > { %444 = vadd.xlane.f32.xlu1 %v441_v16  ;;  %v501_v16 = vld [vmem:[%s1141_s17 + $0x80] sm:$0xff]  ;;  %612 = vmatpush.bf16.msra.mxu1 %v550_v47 }
  0xe1   : > { %v557_v19 = vpack.c.bf16 %v505_v17, %v501_v16 }
  0xe2   : > { %638 = vmatpush.bf16.msra.mxu3 %v560_v27  ;;  %626 = vmatpush.bf16.msra.mxu2 %v551_v51 }
  0xe3   : > { %596 = vmatpush.bf16.msra.mxu0 %v557_v19 }
  0xe6   : > { %639 = vmatpush.bf16.msra.mxu3 %v556_v41 }
  0xe7   : > { %597 = vmatpush.bf16.msra.mxu0 %v553_v31 }
  0xea   : > { %640 = vmatpush.bf16.msra.mxu3 %v552_v54 }
  0xeb   : > { %598 = vmatpush.bf16.msra.mxu0 %v549_v46 }
 0x14b   : > { %v443_v40 = vpop.xlane.xlu1 %442 }
 0x14c   : > { %v446_v45 = vmul.f32 %v443_v40, %v1126_v8 }
 0x14e   : > { %v448_v53 = vadd.f32 1e-05, %v446_v45 }
 0x150   : > { %863 = vrsqrt.f32 %v448_v53  ;;  %vm456_vm2 = vweird.f32 %v448_v53 }
 0x153   : > { %v445_v55 = vpop.xlane.xlu1 %444 }
 0x154   : > { %v447_v56 = vmul.f32 %v445_v55, %v1126_v8 }
 0x156   : > { %v864_v57 = vpop.eup %863  ;;  %v449_v58 = vadd.f32 1e-05, %v447_v56 }
 0x157   : > { %v451_v59 = vmul.f32 %v864_v57, %v448_v53  ;;  %vm457_vm1 = vweird.f32 %v864_v57 }
 0x158   : > { %865 = vrsqrt.f32 %v449_v58  ;;  %vm458_vm3 = vmor %vm456_vm2, %vm457_vm1  ;;  %vm466_vm5 = vweird.f32 %v449_v58 }
 0x159   : > { %v452_v60 = vmul.f32 %v864_v57, %v451_v59 }
 0x15b   : > { %v453_v61 = vmul.f32 0.5, %v452_v60 }
 0x15d   : > { %v454_v62 = vsub.f32 1.5, %v453_v61 }
 0x15e   : > { %v866_v63 = vpop.eup %865 }
 0x15f   : > { %v455_v0 = vmul.f32 %v864_v57, %v454_v62  ;;  %v461_v1 = vmul.f32 %v866_v63, %v449_v58  ;;  %vm467_vm4 = vweird.f32 %v866_v63 }
 0x160   : > { %vm468_vm6 = vmor %vm466_vm5, %vm467_vm4 }
 0x161   : > { %v462_v2 = vmul.f32 %v866_v63, %v461_v1  ;;  %v459_v3 = vsel %vm458_vm3, %v864_v57, %v455_v0 }
 0x162   : > { %v470_v8 = vmul.f32 %v459_v3, %v1129_v11 }
 0x163   : > { %v463_v4 = vmul.f32 0.5, %v462_v2 }
 0x164   : > { %v476_v12 = vmul.f32 %v859_v6, %v470_v8 }
 0x165   : > { %v464_v5 = vsub.f32 1.5, %v463_v4 }
 0x166   : > { %v482_v16 = vadd.f32 %v860_v13, %v476_v12 }
 0x167   : > { %v465_v7 = vmul.f32 %v866_v63, %v464_v5 }
 0x169   : > { %v469_v9 = vsel %vm468_vm6, %v866_v63, %v465_v7 }
 0x16a   : > { %v471_v10 = vmul.f32 %v469_v9, %v1134_v15  ;;  %v581_v15 = vld [vmem:[%s419_s8] sm:$0xf] }
 0x16b   : > { %v583_v18 = vperm.slane %v581_v15, 0  ;;  %v584_v19 = vperm.slane %v581_v15, 1  ;;  %v585_v26 = vperm.slane %v581_v15, 2  ;;  %v586_v27 = vperm.slane %v581_v15, 3 }
 0x16c   : > { %v477_v14 = vmul.f32 %v859_v6, %v471_v10 }
 0x16e   : > { %v483_v11 = vadd.f32 %v860_v13, %v477_v14 }
 0x170   : > { %v484_v17 = vpack.c.bf16 %v483_v11, %v482_v16 }
 0x172   : > { %599 = vmatmul.bf16.vlgmr.msra.gmra.mxu0 %v484_v17  ;;  %613 = vmatmul.bf16.vlgmr.msra.gmra.mxu1 %v484_v17 }
 0x173   : > { %627 = vmatmul.bf16.vlgmr.msra.gmra.mxu2 %v484_v17  ;;  %641 = vmatmul.bf16.vlgmr.msra.gmra.mxu3 %v484_v17 }
 0x1ef   : > { %v600_v20 = vpop.f32.mrf.mxu0  ;;  %v614_v21 = vpop.f32.mrf.mxu1 }
 0x1f0   : > { %v601_v22 = vadd.f32 %v600_v20, %v583_v18  ;;  %v615_v23 = vadd.f32 %v614_v21, %v584_v19 }
 0x1f2   : > { %v647_v24 = vmax.f32 %v601_v22, 0.0  ;;  %v648_v25 = vmax.f32 %v615_v23, 0.0 }
 0x1f4   : > { %655 = vst [vmem:[%s1223_s10] sm:$0xff] %v647_v24 }
 0x1f5   : > { %656 = vst [vmem:[%s1223_s10 + $0x8] sm:$0xff] %v648_v25 }
 0x1f6   : > { %v628_v28 = vpop.f32.mrf.mxu2  ;;  %v642_v29 = vpop.f32.mrf.mxu3 }
 0x1f7   : > { %v629_v30 = vadd.f32 %v628_v28, %v585_v26  ;;  %v643_v31 = vadd.f32 %v642_v29, %v586_v27  ;;  %v602_v32 = vpop.f32.mrf.mxu0  ;;  %v616_v33 = vpop.f32.mrf.mxu1 }
 0x1f8   : > { %v603_v34 = vadd.f32 %v602_v32, %v583_v18  ;;  %v617_v35 = vadd.f32 %v616_v33, %v584_v19 }
 0x1f9   : > { %v649_v36 = vmax.f32 %v629_v30, 0.0  ;;  %v650_v37 = vmax.f32 %v643_v31, 0.0 }
 0x1fa   : > { %v651_v38 = vmax.f32 %v603_v34, 0.0  ;;  %v652_v39 = vmax.f32 %v617_v35, 0.0 }
 0x1fb   : > { %657 = vst [vmem:[%s1223_s10 + $0x10] sm:$0xff] %v649_v36  ;;  %v688_v46 = vld [vmem:[%s1223_s10] sm:$0xff] (%p973_p6) }
 0x1fc   : > { %658 = vst [vmem:[%s1223_s10 + $0x18] sm:$0xff] %v650_v37  ;;  %v690_v47 = vld [vmem:[%s1223_s10 + $0x8] sm:$0xff] (%p973_p6) }
 0x1fd   : > { %659 = vst [vmem:[%s1223_s10 + $0x20] sm:$0xff] %v651_v38 }
 0x1fe   : > { %660 = vst [vmem:[%s1223_s10 + $0x28] sm:$0xff] %v652_v39  ;;  %v630_v40 = vpop.f32.mrf.mxu2  ;;  %v644_v41 = vpop.f32.mrf.mxu3 }
 0x1ff   : > { %v631_v42 = vadd.f32 %v630_v40, %v585_v26  ;;  %v645_v43 = vadd.f32 %v644_v41, %v586_v27  ;;  %689 = vst [vmem:[%s675_s13] sm:$0xff] (%p973_p6), %v688_v46 }
 0x200   : > { %669 = sbr.rel (!%p973_p6) target bundleno = 525 (0x20d), region = 67  ;;  %691 = vst [vmem:[%s675_s13 + $0x8] sm:$0xff] (%p973_p6), %v690_v47 }
 0x201   : > { %v653_v44 = vmax.f32 %v631_v42, 0.0  ;;  %v654_v45 = vmax.f32 %v645_v43, 0.0 }
 0x202   : > { %v692_v48 = vld [vmem:[%s1223_s10 + $0x10] sm:$0xff] (%p973_p6) }
 0x203   : > { %661 = vst [vmem:[%s1223_s10 + $0x30] sm:$0xff] %v653_v44  ;;  %v694_v49 = vld [vmem:[%s1223_s10 + $0x18] sm:$0xff] (%p973_p6) }
 0x204   : > { %662 = vst [vmem:[%s1223_s10 + $0x38] sm:$0xff] %v654_v45  ;;  %v696_v50 = vld [vmem:[%s1223_s10 + $0x20] sm:$0xff] (%p973_p6) }
 0x205   : > { %693 = vst [vmem:[%s675_s13 + $0x10] sm:$0xff] %v692_v48  ;;  %v698_v51 = vld [vmem:[%s1223_s10 + $0x28] sm:$0xff] }
 0x206   : > { %695 = vst [vmem:[%s675_s13 + $0x18] sm:$0xff] %v694_v49 }
 0x207   : > { %697 = vst [vmem:[%s675_s13 + $0x80] sm:$0xff] %v696_v50 }
 0x208   : > { %699 = vst [vmem:[%s675_s13 + $0x88] sm:$0xff] %v698_v51 }
 0x20a   : > { %v700_v52 = vld [vmem:[%s1223_s10 + $0x30] sm:$0xff] }
 0x20b   : > { %v702_v53 = vld [vmem:[%s1223_s10 + $0x38] sm:$0xff]  ;;  %701 = vst [vmem:[%s675_s13 + $0x90] sm:$0xff] %v700_v52 }
 0x20c   : > { %703 = vst [vmem:[%s675_s13 + $0x98] sm:$0xff] %v702_v53 }
 0x20d PF: > { %s15_s22 = sadd.s32 1, %s905_s22   ;;  %s1269_s18 = smov %s893_s19 }
 0x20e   : > { %p12_p12 = scmp.ge.s32.totalorder %s15_s22, 6   ;;  %s1270_s19 = smov %s978_s28 }
 0x20f   : > { %s1271_s20 = smov %s901_s21  ;;  %s1272_s21 = smov %s1274_s23 }
 0x210   :  { %14 = sbr.rel (!%p12_p12) target bundleno = 3 (0x3), region = 127 }

</bundles_post_ra>
